<compile_context>
chip_gen: v7x
topology: tpu7x:2x2x1
jax: 0.10.0
libtpu: 0.0.40
codegen_flags: <defaults>
</compile_context>

<pallas_src>
import functools
import math

import numpy as np
import jax
import jax.numpy as jnp
from jax import lax
from jax.experimental import pallas as pl
from jax.experimental.pallas import tpu as pltpu

# ----------------------------- small config ---------------------------------
DIM = 32          # conf.dim
NUM_HEADS = 4     # conf.num_heads  (head_dim = 8)
DFF = DIM * 3     # dff_k = 3
CHANNEL_LAYERS = 1
CROSS_LAYERS = 1
N_BINS = 4        # bin_times = [0.2, 0.4, 0.6, 0.8]
N_CLASSES = 2 ** (2 * N_BINS)   # 256
T = 8             # sequence length (frames)
CONTEXT_LIMIT = -1
NEG_INF = -1e9
LANES = 128


# ----------------------- host-side constants (glue) --------------------------
def _alibi_slopes(n):
    def pow2(m):
        start = 2.0 ** (-(2.0 ** -(math.log2(m) - 3)))
        return [start * (start ** i) for i in range(m)]
    if math.log2(n).is_integer():
        return pow2(n)
    cp2 = 2 ** math.floor(math.log2(n))
    return pow2(cp2) + _alibi_slopes(2 * cp2)[0::2][: n - cp2]


def build_alibi_biases(num_heads, t, context_limit=-1):
    """bias_self : block-diagonal causal ALiBi bias for the stacked (2T) slab
       bias_cross: same causal blocks in the OFF-diagonal positions, so the
                   cross-attention attends only to the other speaker without
                   rolling / swapping the KV slab."""
    slopes = np.asarray(_alibi_slopes(num_heads), np.float32)          # (H,)
    i = np.arange(t)[:, None]
    j = np.arange(t)[None, :]
    rel = (i - j).astype(np.float32)
    blk = -slopes[:, None, None] * rel[None]                           # (H,T,T)
    mask = j > i
    if context_limit is not None and context_limit > 0:
        mask = mask | ((i - j) >= context_limit)
    blk = np.where(mask[None], np.float32(NEG_INF), blk)
    b_self = np.full((num_heads, 2 * t, 2 * t), NEG_INF, np.float32)
    b_self[:, :t, :t] = blk
    b_self[:, t:, t:] = blk
    b_cross = np.full((num_heads, 2 * t, 2 * t), NEG_INF, np.float32)
    b_cross[:, :t, t:] = blk
    b_cross[:, t:, :t] = blk
    return b_self, b_cross


def vap_bin_weights(n_bins, from_bin, to_bin):
    # ObjectiveVAP codebook: class idx -> binary projection window (2, n_bins)
    n_classes = 2 ** (2 * n_bins)
    idx = np.arange(n_classes)
    states = np.zeros((n_classes, 2, n_bins), dtype=np.float32)
    for c in range(2):
        for b in range(n_bins):
            states[:, c, b] = (idx >> (c * n_bins + b)) & 1
    return states[:, :, from_bin:to_bin + 1].sum(-1).astype(np.float32)   # (n_classes, 2)


# ----------------------------- parameters -----------------------------------
def init_params(seed, dim, dff, n_channel_layers, n_cross_layers, n_classes):
    rng = np.random.default_rng(seed)

    def lin(din, dout):
        return {"w": (rng.standard_normal((din, dout)) / math.sqrt(din)).astype(np.float32),
                "b": (0.02 * rng.standard_normal((1, dout))).astype(np.float32)}

    def ln(d):
        return {"g": np.ones((1, d), np.float32), "b": np.zeros((1, d), np.float32)}

    def mha():
        return {"q": lin(dim, dim), "k": lin(dim, dim),
                "v": lin(dim, dim), "o": lin(dim, dim)}

    def tlayer():
        return {"ln1": ln(dim), "ln2": ln(dim), "mha": mha(),
                "ffn": {"l1": lin(dim, dff), "l2": lin(dff, dim)}}

    def slayer():
        p = tlayer()
        p["lnc"] = ln(dim)
        p["mha_cross"] = mha()
        return p

    return {
        "ar_channel": [tlayer() for _ in range(n_channel_layers)],
        "ar": {"layers": [slayer() for _ in range(n_cross_layers)],
               "comb": lin(2 * dim, dim)},
        "va": {"w": (rng.standard_normal((1, dim)) / math.sqrt(dim)).astype(np.float32),
               "b": np.zeros((1, 1), np.float32)},
        "vap": lin(dim, n_classes),
    }


# ----------------------------- weight slab packing ---------------------------
class _SlabBuilder:
    """Packs many small weight matrices into one (N, 128) f32 slab.
    Every entry is row-aligned to 8 sublanes and lane-aligned to lane 0."""

    def __init__(self, lanes=LANES):
        self.lanes = lanes
        self._chunks = []
        self.offsets = {}        # name -> (row_offset, rows, cols)  (static ints)
        self._row = 0

    def add(self, name, arr):
        a = np.asarray(arr, dtype=np.float32)
        if a.ndim == 1:
            a = a[None, :]
        r, c = a.shape
        assert c <= self.lanes, (name, a.shape)
        rp = ((r + 7) // 8) * 8
        buf = np.zeros((rp, self.lanes), np.float32)
        buf[:r, :c] = a
        self.offsets[name] = (self._row, r, c)
        self._chunks.append(buf)
        self._row += rp

    def build(self):
        return np.concatenate(self._chunks, axis=0)


def _pack_mha(sb, name, p, dim, num_heads):
    hd = dim // num_heads
    scale = 1.0 / math.sqrt(hd)
    wq = p["q"]["w"] * scale            # fold softmax scale into Wq / bq
    bq = p["q"]["b"] * scale
    wk, bk = p["k"]["w"], p["k"]["b"]
    wv, bv = p["v"]["w"], p["v"]["b"]
    wo, bo = p["o"]["w"], p["o"]["b"]
    for h in range(num_heads):          # per-head 8-lane weight columns
        cols = slice(h * hd, (h + 1) * hd)
        sb.add(f"{name}.wq{h}", wq[:, cols])
        sb.add(f"{name}.wk{h}", wk[:, cols])
        sb.add(f"{name}.wv{h}", wv[:, cols])
        sb.add(f"{name}.wo{h}", wo[cols, :])
    sb.add(f"{name}.bqk", np.concatenate([bq.reshape(num_heads, hd),
                                          bk.reshape(num_heads, hd)], axis=0))
    # V-bias folded through the output projection (softmax rows sum to 1)
    sb.add(f"{name}.bo", bo + bv @ wo)


def _pack_ln(sb, name, p):
    sb.add(name, np.concatenate([p["g"], p["b"]], axis=0))          # (2, D)


def _pack_ffn(sb, name, p):
    sb.add(f"{name}.w1", p["l1"]["w"])
    sb.add(f"{name}.b1", p["l1"]["b"])
    sb.add(f"{name}.w2", p["l2"]["w"])
    sb.add(f"{name}.b2", p["l2"]["b"])


def pack_params(params, *, dim, num_heads, t, context_limit):
    sb = _SlabBuilder()

    b_self, b_cross = build_alibi_biases(num_heads, t, context_limit)
    sb.add("bias_self", b_self.reshape(num_heads * 2 * t, 2 * t))
    sb.add("bias_cross", b_cross.reshape(num_heads * 2 * t, 2 * t))

    for i, lp in enumerate(params["ar_channel"]):
        _pack_ln(sb, f"ch{i}.ln1", lp["ln1"])
        _pack_mha(sb, f"ch{i}.mha", lp["mha"], dim, num_heads)
        _pack_ln(sb, f"ch{i}.ln2", lp["ln2"])
        _pack_ffn(sb, f"ch{i}.ffn", lp["ffn"])

    for i, lp in enumerate(params["ar"]["layers"]):
        _pack_ln(sb, f"st{i}.ln1", lp["ln1"])
        _pack_mha(sb, f"st{i}.mha", lp["mha"], dim, num_heads)
        _pack_ln(sb, f"st{i}.lnc", lp["lnc"])
        _pack_mha(sb, f"st{i}.mha_cross", lp["mha_cross"], dim, num_heads)
        _pack_ln(sb, f"st{i}.ln2", lp["ln2"])
        _pack_ffn(sb, f"st{i}.ffn", lp["ffn"])

    cw, cb = params["ar"]["comb"]["w"], params["ar"]["comb"]["b"]
    sb.add("comb.w1", cw[:dim])
    sb.add("comb.w2", cw[dim:])
    sb.add("comb.b", cb)

    va = np.zeros((2, dim), np.float32)
    va[0] = params["va"]["w"][0]
    va[1, 0] = params["va"]["b"][0, 0]
    sb.add("va", va)

    vw, vb = params["vap"]["w"], params["vap"]["b"]
    assert vw.shape[1] == 2 * LANES, "VAP head packed as two 128-lane halves"
    sb.add("vap.w0", vw[:, :LANES])
    sb.add("vap.w1", vw[:, LANES:])
    sb.add("vap.b", vb.reshape(2, LANES))

    abp = np.concatenate([vap_bin_weights(N_BINS, 0, 1),     # BINS_P_NOW   = [0, 1]
                          vap_bin_weights(N_BINS, 2, 3)],    # BINS_PFUTURE = [2, 3]
                         axis=1)                              # (256, 4)
    sb.add("abp0", abp[:LANES])
    sb.add("abp1", abp[LANES:])

    return jnp.asarray(sb.build()), sb.offsets


# ----------------------------- the fused kernel -------------------------------
def _vap_fused_kernel(x_ref, slab_ref, out_ref, *, offsets, num_heads, t, dim,
                      n_channel_layers, n_cross_layers):
    f32 = jnp.float32
    tt = 2 * t

    def rd(name):
        off, r, c = offsets[name]                    # static python ints
        return slab_ref[off:off + r, 0:c]

    def bias_list(name):
        off, _, _ = offsets[name]
        return [slab_ref[off + h * tt: off + (h + 1) * tt, 0:tt]
                for h in range(num_heads)]

    bias_self = bias_list("bias_self")               # loaded once, reused
    bias_cross = bias_list("bias_cross")

    def gelu(v):
        # tanh-approx GELU (EUP tanh keeps VALU pressure low)
        c = 0.7978845608028654
        return 0.5 * v * (1.0 + jnp.tanh(c * (v + 0.044715 * v * v * v)))

    def layernorm(name, h):
        p = rd(name)                                 # (2, D): gamma | beta
        mu = jnp.mean(h, axis=-1, keepdims=True)
        var = jnp.mean(jnp.square(h - mu), axis=-1, keepdims=True)
        return (h - mu) * lax.rsqrt(var + 1e-5) * p[0:1, :] + p[1:2, :]

    def mha(name, xin, bias_heads):
        """MultiHeadAttentionAlibi on the stacked (2T, D) slab.  Per-head
        pre-split weights; softmax scale folded into Wq/bq; V-bias folded
        into the output bias; exact softmax divide."""
        bqk = rd(f"{name}.bqk")                      # (2H, hd): bq rows | bk rows
        acc = None
        for h in range(num_heads):                   # static unroll (H = 4)
            q = jnp.dot(xin, rd(f"{name}.wq{h}"),
                        preferred_element_type=f32) + bqk[h:h + 1, :]
            k = jnp.dot(xin, rd(f"{name}.wk{h}"),
                        preferred_element_type=f32) + bqk[num_heads + h:num_heads + h + 1, :]
            v = jnp.dot(xin, rd(f"{name}.wv{h}"), preferred_element_type=f32)
            s = lax.dot_general(q, k, (((1,), (1,)), ((), ())),
                                preferred_element_type=f32) + bias_heads[h]
            s = s - jnp.max(s, axis=-1, keepdims=True)
            e = jnp.exp(s)
            pr = e / jnp.sum(e, axis=-1, keepdims=True)          # exact divide
            ctx = jnp.dot(pr, v, preferred_element_type=f32)
            contrib = jnp.dot(ctx, rd(f"{name}.wo{h}"), preferred_element_type=f32)
            acc = contrib if acc is None else acc + contrib
        return acc + rd(f"{name}.bo")

    def ffn(name, v):
        h1 = jnp.dot(v, rd(f"{name}.w1"), preferred_element_type=f32) + rd(f"{name}.b1")
        h1 = gelu(h1)
        return jnp.dot(h1, rd(f"{name}.w2"), preferred_element_type=f32) + rd(f"{name}.b2")

    def transformer_layer(name, v):
        h = layernorm(f"{name}.ln1", v)
        v = v + mha(f"{name}.mha", h, bias_self)
        h = layernorm(f"{name}.ln2", v)
        return v + ffn(f"{name}.ffn", h)

    def stereo_layer(name, v):
        h = layernorm(f"{name}.ln1", v)
        v = v + mha(f"{name}.mha", h, bias_self)
        z = layernorm(f"{name}.lnc", v)
        # cross-attention: same un-swapped slab, off-diagonal causal bias
        v = v + mha(f"{name}.mha_cross", z, bias_cross)
        h = layernorm(f"{name}.ln2", v)
        return v + ffn(f"{name}.ffn", h)

    x = x_ref[...]                                   # (2T, D): rows [0:T] spk1, [T:2T] spk2

    # ---- ar_channel: shared GPT tower, both speakers batched ----
    for li in range(n_channel_layers):
        x = transformer_layer(f"ch{li}", x)
    o_stack = x                                      # used by the VAD head

    # ---- ar: GPTStereo stereo layers ----
    for li in range(n_cross_layers):
        x = stereo_layer(f"st{li}", x)

    # ---- Combinator ----
    # TODO(synk): exact GPTStereo Combinator internals were not in the
    # provided source; modeled as GELU(Linear(concat(s1, s2))).
    comb = (jnp.dot(x[:t], rd("comb.w1"), preferred_element_type=f32)
            + jnp.dot(x[t:], rd("comb.w2"), preferred_element_type=f32)
            + rd("comb.b"))
    comb = gelu(comb)                                # (T, D)

    # ---- VAD head: sigmoid(Linear(D, 1)) on the channel-tower features ----
    va = rd("va")                                    # (2, D): weight row, bias at [1, 0]
    y = jnp.sum(o_stack * va[0:1, :], axis=-1, keepdims=True) + va[1:2, 0:1]
    vad = 1.0 / (1.0 + jnp.exp(-y))                  # (2T, 1), exact divide

    # ---- VAP head: Linear(D, 256) split into two 128-lane halves + softmax ----
    vb = rd("vap.b")                                 # (2, 128)
    lg0 = jnp.dot(comb, rd("vap.w0"), preferred_element_type=f32) + vb[0:1, :]
    lg1 = jnp.dot(comb, rd("vap.w1"), preferred_element_type=f32) + vb[1:2, :]
    m = jnp.maximum(jnp.max(lg0, axis=-1, keepdims=True),
                    jnp.max(lg1, axis=-1, keepdims=True))
    e0 = jnp.exp(lg0 - m)
    e1 = jnp.exp(lg1 - m)
    inv = 1.0 / (jnp.sum(e0, axis=-1, keepdims=True) + jnp.sum(e1, axis=-1, keepdims=True))
    p0 = e0 * inv
    p1 = e1 * inv

    # next-speaker aggregation: probs @ [abp_now | abp_fut] -> (T, 4)
    pnpf = (jnp.dot(p0, rd("abp0"), preferred_element_type=f32)
            + jnp.dot(p1, rd("abp1"), preferred_element_type=f32))
    pn = pnpf[:, 0:2]
    pf = pnpf[:, 2:4]
    pn = pn / (jnp.sum(pn, axis=-1, keepdims=True) + 1e-5)
    pf = pf / (jnp.sum(pf, axis=-1, keepdims=True) + 1e-5)

    # ---- single packed lane-dense output block ----
    # lanes 0:2 = p_now, 2:4 = p_future, 4 = vad spk1, 5 = vad spk2
    out_ref[...] = jnp.zeros_like(out_ref)
    out_ref[:, 0:2] = pn
    out_ref[:, 2:4] = pf
    out_ref[:, 4:5] = vad[:t]
    out_ref[:, 5:6] = vad[t:]


# ----------------------------- full forward ------------------------------------
def vap_gpt_forward(slab, x1, x2, *, offsets, num_heads, t, dim,
                    n_channel_layers, n_cross_layers):
    # x1, x2: (1, T, D) encoder embeddings for speakers 1 and 2
    assert x1.shape == x2.shape and x1.shape[0] == 1
    assert x1.shape[1] == t and x1.shape[2] == dim
    x = jnp.concatenate([x1[0], x2[0]], axis=0)                     # (2T, D) stacked slab

    kernel = functools.partial(
        _vap_fused_kernel, offsets=offsets, num_heads=num_heads, t=t, dim=dim,
        n_channel_layers=n_channel_layers, n_cross_layers=n_cross_layers)

    vmem = pl.BlockSpec(memory_space=pltpu.MemorySpace.VMEM)
    out = pl.pallas_call(                      # no grid: single invocation, whole-array VMEM blocks
        kernel,
        out_shape=jax.ShapeDtypeStruct((t, LANES), jnp.float32),
        in_specs=[vmem, vmem],
        out_specs=vmem,
    )(x, slab)

    p_now = out[:, 0:2]
    p_future = out[:, 2:4]
    vad = out[:, 4:6]                          # column 0: speaker 1, column 1: speaker 2
    return p_now, p_future, vad


# ----------------------------- main ---------------------------------------------
if __name__ == "__main__":
    # deterministic inputs (encoder embeddings for the two speakers)
    key = jax.random.PRNGKey(0)
    k1, k2 = jax.random.split(key)
    x1 = jax.random.normal(k1, (1, T, DIM), jnp.float32)
    x2 = jax.random.normal(k2, (1, T, DIM), jnp.float32)

    params = init_params(42, DIM, DFF, CHANNEL_LAYERS, CROSS_LAYERS, N_CLASSES)
    slab, offsets = pack_params(params, dim=DIM, num_heads=NUM_HEADS, t=T,
                                context_limit=CONTEXT_LIMIT)
    # TODO(synk): for real-time streaming, keep the packed weight slab resident
    # across calls (cross-pallas_call VMEM future) instead of re-sending ~1 MB per frame.

    fwd = jax.jit(functools.partial(
        vap_gpt_forward, offsets=offsets, num_heads=NUM_HEADS, t=T, dim=DIM,
        n_channel_layers=CHANNEL_LAYERS, n_cross_layers=CROSS_LAYERS))

    p_now, p_future, vad = fwd(slab, x1, x2)
    jax.block_until_ready((p_now, p_future, vad))

    # host-side extraction mirroring `.to('cpu').tolist()[0][-1]` of the module
    p_now_np, p_fut_np, vad_np = map(np.asarray, (p_now, p_future, vad))
    ret = {
        "p_now": p_now_np[-1].tolist(),
        "p_future": p_fut_np[-1].tolist(),
        "vad": [float(vad_np[-1, 0]), float(vad_np[-1, 1])],
    }
    assert len(ret["p_now"]) == 2 and len(ret["p_future"]) == 2 and len(ret["vad"]) == 2
    assert all(np.isfinite(ret["p_now"])) and all(np.isfinite(ret["p_future"]))
    assert all(np.isfinite(ret["vad"]))

    print("KERNEL_OK")
</pallas_src>

<mosaic_0001>
module attributes {stable_mosaic.version = 11 : i64} {
  func.func @_vap_fused_kernel(%arg0: memref<16x32xf32, #tpu.memory_space<vmem>>, %arg1: memref<2160x128xf32, #tpu.memory_space<vmem>>, %arg2: memref<8x128xf32, #tpu.memory_space<vmem>>) attributes {dimension_semantics = [], scalar_prefetch = 0 : i64, scratch_operands = 0 : i64, tpu.core_type = #tpu.core_type<tc>} {
    %c0 = arith.constant 0 : index
    %c0_0 = arith.constant 0 : index
    %0 = vector.load %arg1[%c0, %c0_0] : memref<2160x128xf32, #tpu.memory_space<vmem>>, vector<16x16xf32>
    %c16 = arith.constant 16 : index
    %c0_1 = arith.constant 0 : index
    %1 = vector.load %arg1[%c16, %c0_1] : memref<2160x128xf32, #tpu.memory_space<vmem>>, vector<16x16xf32>
    %c32 = arith.constant 32 : index
    %c0_2 = arith.constant 0 : index
    %2 = vector.load %arg1[%c32, %c0_2] : memref<2160x128xf32, #tpu.memory_space<vmem>>, vector<16x16xf32>
    %c48 = arith.constant 48 : index
    %c0_3 = arith.constant 0 : index
    %3 = vector.load %arg1[%c48, %c0_3] : memref<2160x128xf32, #tpu.memory_space<vmem>>, vector<16x16xf32>
    %c64 = arith.constant 64 : index
    %c0_4 = arith.constant 0 : index
    %4 = vector.load %arg1[%c64, %c0_4] : memref<2160x128xf32, #tpu.memory_space<vmem>>, vector<16x16xf32>
    %c80 = arith.constant 80 : index
    %c0_5 = arith.constant 0 : index
    %5 = vector.load %arg1[%c80, %c0_5] : memref<2160x128xf32, #tpu.memory_space<vmem>>, vector<16x16xf32>
    %c96 = arith.constant 96 : index
    %c0_6 = arith.constant 0 : index
    %6 = vector.load %arg1[%c96, %c0_6] : memref<2160x128xf32, #tpu.memory_space<vmem>>, vector<16x16xf32>
    %c112 = arith.constant 112 : index
    %c0_7 = arith.constant 0 : index
    %7 = vector.load %arg1[%c112, %c0_7] : memref<2160x128xf32, #tpu.memory_space<vmem>>, vector<16x16xf32>
    %c0_8 = arith.constant 0 : index
    %c0_9 = arith.constant 0 : index
    %8 = vector.load %arg0[%c0_8, %c0_9] : memref<16x32xf32, #tpu.memory_space<vmem>>, vector<16x32xf32>
    %c128 = arith.constant 128 : index
    %c0_10 = arith.constant 0 : index
    %9 = vector.load %arg1[%c128, %c0_10] : memref<2160x128xf32, #tpu.memory_space<vmem>>, vector<2x32xf32>
    %cst = arith.constant dense<0.000000e+00> : vector<16xf32>
    %10 = vector.multi_reduction <add>, %8, %cst [1] : vector<16x32xf32> to vector<16xf32>
    %11 = vector.shape_cast %10 : vector<16xf32> to vector<16x1xf32>
    %cst_11 = arith.constant 3.200000e+01 : f32
    %12 = vector.broadcast %cst_11 : f32 to vector<16x1xf32>
    %13 = arith.divf %11, %12 : vector<16x1xf32>
    %14 = vector.broadcast %13 : vector<16x1xf32> to vector<16x32xf32>
    %15 = arith.subf %8, %14 : vector<16x32xf32>
    %16 = arith.mulf %15, %15 : vector<16x32xf32>
    %cst_12 = arith.constant dense<0.000000e+00> : vector<16xf32>
    %17 = vector.multi_reduction <add>, %16, %cst_12 [1] : vector<16x32xf32> to vector<16xf32>
    %18 = vector.shape_cast %17 : vector<16xf32> to vector<16x1xf32>
    %cst_13 = arith.constant 3.200000e+01 : f32
    %19 = vector.broadcast %cst_13 : f32 to vector<16x1xf32>
    %20 = arith.divf %18, %19 : vector<16x1xf32>
    %21 = vector.broadcast %13 : vector<16x1xf32> to vector<16x32xf32>
    %22 = arith.subf %8, %21 : vector<16x32xf32>
    %cst_14 = arith.constant 9.99999974E-6 : f32
    %23 = vector.broadcast %cst_14 : f32 to vector<16x1xf32>
    %24 = arith.addf %20, %23 : vector<16x1xf32>
    %25 = math.rsqrt %24 : vector<16x1xf32>
    %26 = vector.broadcast %25 : vector<16x1xf32> to vector<16x32xf32>
    %27 = arith.mulf %22, %26 : vector<16x32xf32>
    %28 = vector.extract_strided_slice %9 {offsets = [0, 0], sizes = [1, 32], strides = [1, 1]} : vector<2x32xf32> to vector<1x32xf32>
    %29 = vector.broadcast %28 : vector<1x32xf32> to vector<16x32xf32>
    %30 = arith.mulf %27, %29 : vector<16x32xf32>
    %31 = vector.extract_strided_slice %9 {offsets = [1, 0], sizes = [1, 32], strides = [1, 1]} : vector<2x32xf32> to vector<1x32xf32>
    %32 = vector.broadcast %31 : vector<1x32xf32> to vector<16x32xf32>
    %33 = arith.addf %30, %32 : vector<16x32xf32>
    %c552 = arith.constant 552 : index
    %c0_15 = arith.constant 0 : index
    %34 = vector.load %arg1[%c552, %c0_15] : memref<2160x128xf32, #tpu.memory_space<vmem>>, vector<8x8xf32>
    %c136 = arith.constant 136 : index
    %c0_16 = arith.constant 0 : index
    %35 = vector.load %arg1[%c136, %c0_16] : memref<2160x128xf32, #tpu.memory_space<vmem>>, vector<32x8xf32>
    %cst_17 = arith.constant dense<0.000000e+00> : vector<16x8xf32>
    %36 = tpu.matmul %33, %35, %cst_17 {dimension_numbers = #tpu.dot_dimension_numbers<[1], [0], [0], [1], [0, 0, 1, 1], [], []>} : vector<16x32xf32>, vector<32x8xf32>, vector<16x8xf32> -> vector<16x8xf32>
    %37 = vector.extract_strided_slice %34 {offsets = [0, 0], sizes = [1, 8], strides = [1, 1]} : vector<8x8xf32> to vector<1x8xf32>
    %38 = vector.broadcast %37 : vector<1x8xf32> to vector<16x8xf32>
    %39 = arith.addf %36, %38 : vector<16x8xf32>
    %c168 = arith.constant 168 : index
    %c0_18 = arith.constant 0 : index
    %40 = vector.load %arg1[%c168, %c0_18] : memref<2160x128xf32, #tpu.memory_space<vmem>>, vector<32x8xf32>
    %cst_19 = arith.constant dense<0.000000e+00> : vector<16x8xf32>
    %41 = tpu.matmul %33, %40, %cst_19 {dimension_numbers = #tpu.dot_dimension_numbers<[1], [0], [0], [1], [0, 0, 1, 1], [], []>} : vector<16x32xf32>, vector<32x8xf32>, vector<16x8xf32> -> vector<16x8xf32>
    %42 = vector.extract_strided_slice %34 {offsets = [4, 0], sizes = [1, 8], strides = [1, 1]} : vector<8x8xf32> to vector<1x8xf32>
    %43 = vector.broadcast %42 : vector<1x8xf32> to vector<16x8xf32>
    %44 = arith.addf %41, %43 : vector<16x8xf32>
    %c200 = arith.constant 200 : index
    %c0_20 = arith.constant 0 : index
    %45 = vector.load %arg1[%c200, %c0_20] : memref<2160x128xf32, #tpu.memory_space<vmem>>, vector<32x8xf32>
    %cst_21 = arith.constant dense<0.000000e+00> : vector<16x8xf32>
    %46 = tpu.matmul %33, %45, %cst_21 {dimension_numbers = #tpu.dot_dimension_numbers<[1], [0], [0], [1], [0, 0, 1, 1], [], []>} : vector<16x32xf32>, vector<32x8xf32>, vector<16x8xf32> -> vector<16x8xf32>
    %cst_22 = arith.constant dense<0.000000e+00> : vector<16x16xf32>
    %47 = tpu.matmul %39, %44, %cst_22 {dimension_numbers = #tpu.dot_dimension_numbers<[1], [1], [0], [0], [0, 0, 1, 0], [], []>} : vector<16x8xf32>, vector<16x8xf32>, vector<16x16xf32> -> vector<16x16xf32>
    %48 = arith.addf %47, %0 : vector<16x16xf32>
    %cst_23 = arith.constant dense<0xFF800000> : vector<16xf32>
    %49 = vector.multi_reduction <maximumf>, %48, %cst_23 [1] : vector<16x16xf32> to vector<16xf32>
    %50 = vector.shape_cast %49 : vector<16xf32> to vector<16x1xf32>
    %51 = vector.broadcast %50 : vector<16x1xf32> to vector<16x16xf32>
    %52 = arith.subf %48, %51 : vector<16x16xf32>
    %53 = math.exp %52 : vector<16x16xf32>
    %cst_24 = arith.constant dense<0.000000e+00> : vector<16xf32>
    %54 = vector.multi_reduction <add>, %53, %cst_24 [1] : vector<16x16xf32> to vector<16xf32>
    %55 = vector.shape_cast %54 : vector<16xf32> to vector<16x1xf32>
    %56 = vector.broadcast %55 : vector<16x1xf32> to vector<16x16xf32>
    %57 = arith.divf %53, %56 : vector<16x16xf32>
    %cst_25 = arith.constant dense<0.000000e+00> : vector<16x8xf32>
    %58 = tpu.matmul %57, %46, %cst_25 {dimension_numbers = #tpu.dot_dimension_numbers<[1], [0], [0], [1], [0, 0, 1, 1], [], []>} : vector<16x16xf32>, vector<16x8xf32>, vector<16x8xf32> -> vector<16x8xf32>
    %c232 = arith.constant 232 : index
    %c0_26 = arith.constant 0 : index
    %59 = vector.load %arg1[%c232, %c0_26] : memref<2160x128xf32, #tpu.memory_space<vmem>>, vector<8x32xf32>
    %cst_27 = arith.constant dense<0.000000e+00> : vector<16x32xf32>
    %60 = tpu.matmul %58, %59, %cst_27 {dimension_numbers = #tpu.dot_dimension_numbers<[1], [0], [0], [1], [0, 0, 1, 1], [], []>} : vector<16x8xf32>, vector<8x32xf32>, vector<16x32xf32> -> vector<16x32xf32>
    %c240 = arith.constant 240 : index
    %c0_28 = arith.constant 0 : index
    %61 = vector.load %arg1[%c240, %c0_28] : memref<2160x128xf32, #tpu.memory_space<vmem>>, vector<32x8xf32>
    %cst_29 = arith.constant dense<0.000000e+00> : vector<16x8xf32>
    %62 = tpu.matmul %33, %61, %cst_29 {dimension_numbers = #tpu.dot_dimension_numbers<[1], [0], [0], [1], [0, 0, 1, 1], [], []>} : vector<16x32xf32>, vector<32x8xf32>, vector<16x8xf32> -> vector<16x8xf32>
    %63 = vector.extract_strided_slice %34 {offsets = [1, 0], sizes = [1, 8], strides = [1, 1]} : vector<8x8xf32> to vector<1x8xf32>
    %64 = vector.broadcast %63 : vector<1x8xf32> to vector<16x8xf32>
    %65 = arith.addf %62, %64 : vector<16x8xf32>
    %c272 = arith.constant 272 : index
    %c0_30 = arith.constant 0 : index
    %66 = vector.load %arg1[%c272, %c0_30] : memref<2160x128xf32, #tpu.memory_space<vmem>>, vector<32x8xf32>
    %cst_31 = arith.constant dense<0.000000e+00> : vector<16x8xf32>
    %67 = tpu.matmul %33, %66, %cst_31 {dimension_numbers = #tpu.dot_dimension_numbers<[1], [0], [0], [1], [0, 0, 1, 1], [], []>} : vector<16x32xf32>, vector<32x8xf32>, vector<16x8xf32> -> vector<16x8xf32>
    %68 = vector.extract_strided_slice %34 {offsets = [5, 0], sizes = [1, 8], strides = [1, 1]} : vector<8x8xf32> to vector<1x8xf32>
    %69 = vector.broadcast %68 : vector<1x8xf32> to vector<16x8xf32>
    %70 = arith.addf %67, %69 : vector<16x8xf32>
    %c304 = arith.constant 304 : index
    %c0_32 = arith.constant 0 : index
    %71 = vector.load %arg1[%c304, %c0_32] : memref<2160x128xf32, #tpu.memory_space<vmem>>, vector<32x8xf32>
    %cst_33 = arith.constant dense<0.000000e+00> : vector<16x8xf32>
    %72 = tpu.matmul %33, %71, %cst_33 {dimension_numbers = #tpu.dot_dimension_numbers<[1], [0], [0], [1], [0, 0, 1, 1], [], []>} : vector<16x32xf32>, vector<32x8xf32>, vector<16x8xf32> -> vector<16x8xf32>
    %cst_34 = arith.constant dense<0.000000e+00> : vector<16x16xf32>
    %73 = tpu.matmul %65, %70, %cst_34 {dimension_numbers = #tpu.dot_dimension_numbers<[1], [1], [0], [0], [0, 0, 1, 0], [], []>} : vector<16x8xf32>, vector<16x8xf32>, vector<16x16xf32> -> vector<16x16xf32>
    %74 = arith.addf %73, %1 : vector<16x16xf32>
    %cst_35 = arith.constant dense<0xFF800000> : vector<16xf32>
    %75 = vector.multi_reduction <maximumf>, %74, %cst_35 [1] : vector<16x16xf32> to vector<16xf32>
    %76 = vector.shape_cast %75 : vector<16xf32> to vector<16x1xf32>
    %77 = vector.broadcast %76 : vector<16x1xf32> to vector<16x16xf32>
    %78 = arith.subf %74, %77 : vector<16x16xf32>
    %79 = math.exp %78 : vector<16x16xf32>
    %cst_36 = arith.constant dense<0.000000e+00> : vector<16xf32>
    %80 = vector.multi_reduction <add>, %79, %cst_36 [1] : vector<16x16xf32> to vector<16xf32>
    %81 = vector.shape_cast %80 : vector<16xf32> to vector<16x1xf32>
    %82 = vector.broadcast %81 : vector<16x1xf32> to vector<16x16xf32>
    %83 = arith.divf %79, %82 : vector<16x16xf32>
    %cst_37 = arith.constant dense<0.000000e+00> : vector<16x8xf32>
    %84 = tpu.matmul %83, %72, %cst_37 {dimension_numbers = #tpu.dot_dimension_numbers<[1], [0], [0], [1], [0, 0, 1, 1], [], []>} : vector<16x16xf32>, vector<16x8xf32>, vector<16x8xf32> -> vector<16x8xf32>
    %c336 = arith.constant 336 : index
    %c0_38 = arith.constant 0 : index
    %85 = vector.load %arg1[%c336, %c0_38] : memref<2160x128xf32, #tpu.memory_space<vmem>>, vector<8x32xf32>
    %cst_39 = arith.constant dense<0.000000e+00> : vector<16x32xf32>
    %86 = tpu.matmul %84, %85, %cst_39 {dimension_numbers = #tpu.dot_dimension_numbers<[1], [0], [0], [1], [0, 0, 1, 1], [], []>} : vector<16x8xf32>, vector<8x32xf32>, vector<16x32xf32> -> vector<16x32xf32>
    %87 = arith.addf %60, %86 : vector<16x32xf32>
    %c344 = arith.constant 344 : index
    %c0_40 = arith.constant 0 : index
    %88 = vector.load %arg1[%c344, %c0_40] : memref<2160x128xf32, #tpu.memory_space<vmem>>, vector<32x8xf32>
    %cst_41 = arith.constant dense<0.000000e+00> : vector<16x8xf32>
    %89 = tpu.matmul %33, %88, %cst_41 {dimension_numbers = #tpu.dot_dimension_numbers<[1], [0], [0], [1], [0, 0, 1, 1], [], []>} : vector<16x32xf32>, vector<32x8xf32>, vector<16x8xf32> -> vector<16x8xf32>
    %90 = vector.extract_strided_slice %34 {offsets = [2, 0], sizes = [1, 8], strides = [1, 1]} : vector<8x8xf32> to vector<1x8xf32>
    %91 = vector.broadcast %90 : vector<1x8xf32> to vector<16x8xf32>
    %92 = arith.addf %89, %91 : vector<16x8xf32>
    %c376 = arith.constant 376 : index
    %c0_42 = arith.constant 0 : index
    %93 = vector.load %arg1[%c376, %c0_42] : memref<2160x128xf32, #tpu.memory_space<vmem>>, vector<32x8xf32>
    %cst_43 = arith.constant dense<0.000000e+00> : vector<16x8xf32>
    %94 = tpu.matmul %33, %93, %cst_43 {dimension_numbers = #tpu.dot_dimension_numbers<[1], [0], [0], [1], [0, 0, 1, 1], [], []>} : vector<16x32xf32>, vector<32x8xf32>, vector<16x8xf32> -> vector<16x8xf32>
    %95 = vector.extract_strided_slice %34 {offsets = [6, 0], sizes = [1, 8], strides = [1, 1]} : vector<8x8xf32> to vector<1x8xf32>
    %96 = vector.broadcast %95 : vector<1x8xf32> to vector<16x8xf32>
    %97 = arith.addf %94, %96 : vector<16x8xf32>
    %c408 = arith.constant 408 : index
    %c0_44 = arith.constant 0 : index
    %98 = vector.load %arg1[%c408, %c0_44] : memref<2160x128xf32, #tpu.memory_space<vmem>>, vector<32x8xf32>
    %cst_45 = arith.constant dense<0.000000e+00> : vector<16x8xf32>
    %99 = tpu.matmul %33, %98, %cst_45 {dimension_numbers = #tpu.dot_dimension_numbers<[1], [0], [0], [1], [0, 0, 1, 1], [], []>} : vector<16x32xf32>, vector<32x8xf32>, vector<16x8xf32> -> vector<16x8xf32>
    %cst_46 = arith.constant dense<0.000000e+00> : vector<16x16xf32>
    %100 = tpu.matmul %92, %97, %cst_46 {dimension_numbers = #tpu.dot_dimension_numbers<[1], [1], [0], [0], [0, 0, 1, 0], [], []>} : vector<16x8xf32>, vector<16x8xf32>, vector<16x16xf32> -> vector<16x16xf32>
    %101 = arith.addf %100, %2 : vector<16x16xf32>
    %cst_47 = arith.constant dense<0xFF800000> : vector<16xf32>
    %102 = vector.multi_reduction <maximumf>, %101, %cst_47 [1] : vector<16x16xf32> to vector<16xf32>
    %103 = vector.shape_cast %102 : vector<16xf32> to vector<16x1xf32>
    %104 = vector.broadcast %103 : vector<16x1xf32> to vector<16x16xf32>
    %105 = arith.subf %101, %104 : vector<16x16xf32>
    %106 = math.exp %105 : vector<16x16xf32>
    %cst_48 = arith.constant dense<0.000000e+00> : vector<16xf32>
    %107 = vector.multi_reduction <add>, %106, %cst_48 [1] : vector<16x16xf32> to vector<16xf32>
    %108 = vector.shape_cast %107 : vector<16xf32> to vector<16x1xf32>
    %109 = vector.broadcast %108 : vector<16x1xf32> to vector<16x16xf32>
    %110 = arith.divf %106, %109 : vector<16x16xf32>
    %cst_49 = arith.constant dense<0.000000e+00> : vector<16x8xf32>
    %111 = tpu.matmul %110, %99, %cst_49 {dimension_numbers = #tpu.dot_dimension_numbers<[1], [0], [0], [1], [0, 0, 1, 1], [], []>} : vector<16x16xf32>, vector<16x8xf32>, vector<16x8xf32> -> vector<16x8xf32>
    %c440 = arith.constant 440 : index
    %c0_50 = arith.constant 0 : index
    %112 = vector.load %arg1[%c440, %c0_50] : memref<2160x128xf32, #tpu.memory_space<vmem>>, vector<8x32xf32>
    %cst_51 = arith.constant dense<0.000000e+00> : vector<16x32xf32>
    %113 = tpu.matmul %111, %112, %cst_51 {dimension_numbers = #tpu.dot_dimension_numbers<[1], [0], [0], [1], [0, 0, 1, 1], [], []>} : vector<16x8xf32>, vector<8x32xf32>, vector<16x32xf32> -> vector<16x32xf32>
    %114 = arith.addf %87, %113 : vector<16x32xf32>
    %c448 = arith.constant 448 : index
    %c0_52 = arith.constant 0 : index
    %115 = vector.load %arg1[%c448, %c0_52] : memref<2160x128xf32, #tpu.memory_space<vmem>>, vector<32x8xf32>
    %cst_53 = arith.constant dense<0.000000e+00> : vector<16x8xf32>
    %116 = tpu.matmul %33, %115, %cst_53 {dimension_numbers = #tpu.dot_dimension_numbers<[1], [0], [0], [1], [0, 0, 1, 1], [], []>} : vector<16x32xf32>, vector<32x8xf32>, vector<16x8xf32> -> vector<16x8xf32>
    %117 = vector.extract_strided_slice %34 {offsets = [3, 0], sizes = [1, 8], strides = [1, 1]} : vector<8x8xf32> to vector<1x8xf32>
    %118 = vector.broadcast %117 : vector<1x8xf32> to vector<16x8xf32>
    %119 = arith.addf %116, %118 : vector<16x8xf32>
    %c480 = arith.constant 480 : index
    %c0_54 = arith.constant 0 : index
    %120 = vector.load %arg1[%c480, %c0_54] : memref<2160x128xf32, #tpu.memory_space<vmem>>, vector<32x8xf32>
    %cst_55 = arith.constant dense<0.000000e+00> : vector<16x8xf32>
    %121 = tpu.matmul %33, %120, %cst_55 {dimension_numbers = #tpu.dot_dimension_numbers<[1], [0], [0], [1], [0, 0, 1, 1], [], []>} : vector<16x32xf32>, vector<32x8xf32>, vector<16x8xf32> -> vector<16x8xf32>
    %122 = vector.extract_strided_slice %34 {offsets = [7, 0], sizes = [1, 8], strides = [1, 1]} : vector<8x8xf32> to vector<1x8xf32>
    %123 = vector.broadcast %122 : vector<1x8xf32> to vector<16x8xf32>
    %124 = arith.addf %121, %123 : vector<16x8xf32>
    %c512 = arith.constant 512 : index
    %c0_56 = arith.constant 0 : index
    %125 = vector.load %arg1[%c512, %c0_56] : memref<2160x128xf32, #tpu.memory_space<vmem>>, vector<32x8xf32>
    %cst_57 = arith.constant dense<0.000000e+00> : vector<16x8xf32>
    %126 = tpu.matmul %33, %125, %cst_57 {dimension_numbers = #tpu.dot_dimension_numbers<[1], [0], [0], [1], [0, 0, 1, 1], [], []>} : vector<16x32xf32>, vector<32x8xf32>, vector<16x8xf32> -> vector<16x8xf32>
    %cst_58 = arith.constant dense<0.000000e+00> : vector<16x16xf32>
    %127 = tpu.matmul %119, %124, %cst_58 {dimension_numbers = #tpu.dot_dimension_numbers<[1], [1], [0], [0], [0, 0, 1, 0], [], []>} : vector<16x8xf32>, vector<16x8xf32>, vector<16x16xf32> -> vector<16x16xf32>
    %128 = arith.addf %127, %3 : vector<16x16xf32>
    %cst_59 = arith.constant dense<0xFF800000> : vector<16xf32>
    %129 = vector.multi_reduction <maximumf>, %128, %cst_59 [1] : vector<16x16xf32> to vector<16xf32>
    %130 = vector.shape_cast %129 : vector<16xf32> to vector<16x1xf32>
    %131 = vector.broadcast %130 : vector<16x1xf32> to vector<16x16xf32>
    %132 = arith.subf %128, %131 : vector<16x16xf32>
    %133 = math.exp %132 : vector<16x16xf32>
    %cst_60 = arith.constant dense<0.000000e+00> : vector<16xf32>
    %134 = vector.multi_reduction <add>, %133, %cst_60 [1] : vector<16x16xf32> to vector<16xf32>
    %135 = vector.shape_cast %134 : vector<16xf32> to vector<16x1xf32>
    %136 = vector.broadcast %135 : vector<16x1xf32> to vector<16x16xf32>
    %137 = arith.divf %133, %136 : vector<16x16xf32>
    %cst_61 = arith.constant dense<0.000000e+00> : vector<16x8xf32>
    %138 = tpu.matmul %137, %126, %cst_61 {dimension_numbers = #tpu.dot_dimension_numbers<[1], [0], [0], [1], [0, 0, 1, 1], [], []>} : vector<16x16xf32>, vector<16x8xf32>, vector<16x8xf32> -> vector<16x8xf32>
    %c544 = arith.constant 544 : index
    %c0_62 = arith.constant 0 : index
    %139 = vector.load %arg1[%c544, %c0_62] : memref<2160x128xf32, #tpu.memory_space<vmem>>, vector<8x32xf32>
    %cst_63 = arith.constant dense<0.000000e+00> : vector<16x32xf32>
    %140 = tpu.matmul %138, %139, %cst_63 {dimension_numbers = #tpu.dot_dimension_numbers<[1], [0], [0], [1], [0, 0, 1, 1], [], []>} : vector<16x8xf32>, vector<8x32xf32>, vector<16x32xf32> -> vector<16x32xf32>
    %141 = arith.addf %114, %140 : vector<16x32xf32>
    %c560 = arith.constant 560 : index
    %c0_64 = arith.constant 0 : index
    %142 = vector.load %arg1[%c560, %c0_64] : memref<2160x128xf32, #tpu.memory_space<vmem>>, vector<1x32xf32>
    %143 = vector.broadcast %142 : vector<1x32xf32> to vector<16x32xf32>
    %144 = arith.addf %141, %143 : vector<16x32xf32>
    %145 = arith.addf %8, %144 : vector<16x32xf32>
    %c568 = arith.constant 568 : index
    %c0_65 = arith.constant 0 : index
    %146 = vector.load %arg1[%c568, %c0_65] : memref<2160x128xf32, #tpu.memory_space<vmem>>, vector<2x32xf32>
    %cst_66 = arith.constant dense<0.000000e+00> : vector<16xf32>
    %147 = vector.multi_reduction <add>, %145, %cst_66 [1] : vector<16x32xf32> to vector<16xf32>
    %148 = vector.shape_cast %147 : vector<16xf32> to vector<16x1xf32>
    %cst_67 = arith.constant 3.200000e+01 : f32
    %149 = vector.broadcast %cst_67 : f32 to vector<16x1xf32>
    %150 = arith.divf %148, %149 : vector<16x1xf32>
    %151 = vector.broadcast %150 : vector<16x1xf32> to vector<16x32xf32>
    %152 = arith.subf %145, %151 : vector<16x32xf32>
    %153 = arith.mulf %152, %152 : vector<16x32xf32>
    %cst_68 = arith.constant dense<0.000000e+00> : vector<16xf32>
    %154 = vector.multi_reduction <add>, %153, %cst_68 [1] : vector<16x32xf32> to vector<16xf32>
    %155 = vector.shape_cast %154 : vector<16xf32> to vector<16x1xf32>
    %cst_69 = arith.constant 3.200000e+01 : f32
    %156 = vector.broadcast %cst_69 : f32 to vector<16x1xf32>
    %157 = arith.divf %155, %156 : vector<16x1xf32>
    %158 = vector.broadcast %150 : vector<16x1xf32> to vector<16x32xf32>
    %159 = arith.subf %145, %158 : vector<16x32xf32>
    %cst_70 = arith.constant 9.99999974E-6 : f32
    %160 = vector.broadcast %cst_70 : f32 to vector<16x1xf32>
    %161 = arith.addf %157, %160 : vector<16x1xf32>
    %162 = math.rsqrt %161 : vector<16x1xf32>
    %163 = vector.broadcast %162 : vector<16x1xf32> to vector<16x32xf32>
    %164 = arith.mulf %159, %163 : vector<16x32xf32>
    %165 = vector.extract_strided_slice %146 {offsets = [0, 0], sizes = [1, 32], strides = [1, 1]} : vector<2x32xf32> to vector<1x32xf32>
    %166 = vector.broadcast %165 : vector<1x32xf32> to vector<16x32xf32>
    %167 = arith.mulf %164, %166 : vector<16x32xf32>
    %168 = vector.extract_strided_slice %146 {offsets = [1, 0], sizes = [1, 32], strides = [1, 1]} : vector<2x32xf32> to vector<1x32xf32>
    %169 = vector.broadcast %168 : vector<1x32xf32> to vector<16x32xf32>
    %170 = arith.addf %167, %169 : vector<16x32xf32>
    %c576 = arith.constant 576 : index
    %c0_71 = arith.constant 0 : index
    %171 = vector.load %arg1[%c576, %c0_71] : memref<2160x128xf32, #tpu.memory_space<vmem>>, vector<32x96xf32>
    %cst_72 = arith.constant dense<0.000000e+00> : vector<16x96xf32>
    %172 = tpu.matmul %170, %171, %cst_72 {dimension_numbers = #tpu.dot_dimension_numbers<[1], [0], [0], [1], [0, 0, 1, 1], [], []>} : vector<16x32xf32>, vector<32x96xf32>, vector<16x96xf32> -> vector<16x96xf32>
    %c608 = arith.constant 608 : index
    %c0_73 = arith.constant 0 : index
    %173 = vector.load %arg1[%c608, %c0_73] : memref<2160x128xf32, #tpu.memory_space<vmem>>, vector<1x96xf32>
    %174 = vector.broadcast %173 : vector<1x96xf32> to vector<16x96xf32>
    %175 = arith.addf %172, %174 : vector<16x96xf32>
    %cst_74 = arith.constant 5.000000e-01 : f32
    %176 = vector.broadcast %cst_74 : f32 to vector<16x96xf32>
    %177 = arith.mulf %176, %175 : vector<16x96xf32>
    %cst_75 = arith.constant 4.471500e-02 : f32
    %178 = vector.broadcast %cst_75 : f32 to vector<16x96xf32>
    %179 = arith.mulf %178, %175 : vector<16x96xf32>
    %180 = arith.mulf %179, %175 : vector<16x96xf32>
    %181 = arith.mulf %180, %175 : vector<16x96xf32>
    %182 = arith.addf %175, %181 : vector<16x96xf32>
    %cst_76 = arith.constant 0.797884583 : f32
    %183 = vector.broadcast %cst_76 : f32 to vector<16x96xf32>
    %184 = arith.mulf %183, %182 : vector<16x96xf32>
    %185 = math.tanh %184 : vector<16x96xf32>
    %cst_77 = arith.constant 1.000000e+00 : f32
    %186 = vector.broadcast %cst_77 : f32 to vector<16x96xf32>
    %187 = arith.addf %186, %185 : vector<16x96xf32>
    %188 = arith.mulf %177, %187 : vector<16x96xf32>
    %c616 = arith.constant 616 : index
    %c0_78 = arith.constant 0 : index
    %189 = vector.load %arg1[%c616, %c0_78] : memref<2160x128xf32, #tpu.memory_space<vmem>>, vector<96x32xf32>
    %cst_79 = arith.constant dense<0.000000e+00> : vector<16x32xf32>
    %190 = tpu.matmul %188, %189, %cst_79 {dimension_numbers = #tpu.dot_dimension_numbers<[1], [0], [0], [1], [0, 0, 1, 1], [], []>} : vector<16x96xf32>, vector<96x32xf32>, vector<16x32xf32> -> vector<16x32xf32>
    %c712 = arith.constant 712 : index
    %c0_80 = arith.constant 0 : index
    %191 = vector.load %arg1[%c712, %c0_80] : memref<2160x128xf32, #tpu.memory_space<vmem>>, vector<1x32xf32>
    %192 = vector.broadcast %191 : vector<1x32xf32> to vector<16x32xf32>
    %193 = arith.addf %190, %192 : vector<16x32xf32>
    %194 = arith.addf %145, %193 : vector<16x32xf32>
    %c720 = arith.constant 720 : index
    %c0_81 = arith.constant 0 : index
    %195 = vector.load %arg1[%c720, %c0_81] : memref<2160x128xf32, #tpu.memory_space<vmem>>, vector<2x32xf32>
    %cst_82 = arith.constant dense<0.000000e+00> : vector<16xf32>
    %196 = vector.multi_reduction <add>, %194, %cst_82 [1] : vector<16x32xf32> to vector<16xf32>
    %197 = vector.shape_cast %196 : vector<16xf32> to vector<16x1xf32>
    %cst_83 = arith.constant 3.200000e+01 : f32
    %198 = vector.broadcast %cst_83 : f32 to vector<16x1xf32>
    %199 = arith.divf %197, %198 : vector<16x1xf32>
    %200 = vector.broadcast %199 : vector<16x1xf32> to vector<16x32xf32>
    %201 = arith.subf %194, %200 : vector<16x32xf32>
    %202 = arith.mulf %201, %201 : vector<16x32xf32>
    %cst_84 = arith.constant dense<0.000000e+00> : vector<16xf32>
    %203 = vector.multi_reduction <add>, %202, %cst_84 [1] : vector<16x32xf32> to vector<16xf32>
    %204 = vector.shape_cast %203 : vector<16xf32> to vector<16x1xf32>
    %cst_85 = arith.constant 3.200000e+01 : f32
    %205 = vector.broadcast %cst_85 : f32 to vector<16x1xf32>
    %206 = arith.divf %204, %205 : vector<16x1xf32>
    %207 = vector.broadcast %199 : vector<16x1xf32> to vector<16x32xf32>
    %208 = arith.subf %194, %207 : vector<16x32xf32>
    %cst_86 = arith.constant 9.99999974E-6 : f32
    %209 = vector.broadcast %cst_86 : f32 to vector<16x1xf32>
    %210 = arith.addf %206, %209 : vector<16x1xf32>
    %211 = math.rsqrt %210 : vector<16x1xf32>
    %212 = vector.broadcast %211 : vector<16x1xf32> to vector<16x32xf32>
    %213 = arith.mulf %208, %212 : vector<16x32xf32>
    %214 = vector.extract_strided_slice %195 {offsets = [0, 0], sizes = [1, 32], strides = [1, 1]} : vector<2x32xf32> to vector<1x32xf32>
    %215 = vector.broadcast %214 : vector<1x32xf32> to vector<16x32xf32>
    %216 = arith.mulf %213, %215 : vector<16x32xf32>
    %217 = vector.extract_strided_slice %195 {offsets = [1, 0], sizes = [1, 32], strides = [1, 1]} : vector<2x32xf32> to vector<1x32xf32>
    %218 = vector.broadcast %217 : vector<1x32xf32> to vector<16x32xf32>
    %219 = arith.addf %216, %218 : vector<16x32xf32>
    %c1144 = arith.constant 1144 : index
    %c0_87 = arith.constant 0 : index
    %220 = vector.load %arg1[%c1144, %c0_87] : memref<2160x128xf32, #tpu.memory_space<vmem>>, vector<8x8xf32>
    %c728 = arith.constant 728 : index
    %c0_88 = arith.constant 0 : index
    %221 = vector.load %arg1[%c728, %c0_88] : memref<2160x128xf32, #tpu.memory_space<vmem>>, vector<32x8xf32>
    %cst_89 = arith.constant dense<0.000000e+00> : vector<16x8xf32>
    %222 = tpu.matmul %219, %221, %cst_89 {dimension_numbers = #tpu.dot_dimension_numbers<[1], [0], [0], [1], [0, 0, 1, 1], [], []>} : vector<16x32xf32>, vector<32x8xf32>, vector<16x8xf32> -> vector<16x8xf32>
    %223 = vector.extract_strided_slice %220 {offsets = [0, 0], sizes = [1, 8], strides = [1, 1]} : vector<8x8xf32> to vector<1x8xf32>
    %224 = vector.broadcast %223 : vector<1x8xf32> to vector<16x8xf32>
    %225 = arith.addf %222, %224 : vector<16x8xf32>
    %c760 = arith.constant 760 : index
    %c0_90 = arith.constant 0 : index
    %226 = vector.load %arg1[%c760, %c0_90] : memref<2160x128xf32, #tpu.memory_space<vmem>>, vector<32x8xf32>
    %cst_91 = arith.constant dense<0.000000e+00> : vector<16x8xf32>
    %227 = tpu.matmul %219, %226, %cst_91 {dimension_numbers = #tpu.dot_dimension_numbers<[1], [0], [0], [1], [0, 0, 1, 1], [], []>} : vector<16x32xf32>, vector<32x8xf32>, vector<16x8xf32> -> vector<16x8xf32>
    %228 = vector.extract_strided_slice %220 {offsets = [4, 0], sizes = [1, 8], strides = [1, 1]} : vector<8x8xf32> to vector<1x8xf32>
    %229 = vector.broadcast %228 : vector<1x8xf32> to vector<16x8xf32>
    %230 = arith.addf %227, %229 : vector<16x8xf32>
    %c792 = arith.constant 792 : index
    %c0_92 = arith.constant 0 : index
    %231 = vector.load %arg1[%c792, %c0_92] : memref<2160x128xf32, #tpu.memory_space<vmem>>, vector<32x8xf32>
    %cst_93 = arith.constant dense<0.000000e+00> : vector<16x8xf32>
    %232 = tpu.matmul %219, %231, %cst_93 {dimension_numbers = #tpu.dot_dimension_numbers<[1], [0], [0], [1], [0, 0, 1, 1], [], []>} : vector<16x32xf32>, vector<32x8xf32>, vector<16x8xf32> -> vector<16x8xf32>
    %cst_94 = arith.constant dense<0.000000e+00> : vector<16x16xf32>
    %233 = tpu.matmul %225, %230, %cst_94 {dimension_numbers = #tpu.dot_dimension_numbers<[1], [1], [0], [0], [0, 0, 1, 0], [], []>} : vector<16x8xf32>, vector<16x8xf32>, vector<16x16xf32> -> vector<16x16xf32>
    %234 = arith.addf %233, %0 : vector<16x16xf32>
    %cst_95 = arith.constant dense<0xFF800000> : vector<16xf32>
    %235 = vector.multi_reduction <maximumf>, %234, %cst_95 [1] : vector<16x16xf32> to vector<16xf32>
    %236 = vector.shape_cast %235 : vector<16xf32> to vector<16x1xf32>
    %237 = vector.broadcast %236 : vector<16x1xf32> to vector<16x16xf32>
    %238 = arith.subf %234, %237 : vector<16x16xf32>
    %239 = math.exp %238 : vector<16x16xf32>
    %cst_96 = arith.constant dense<0.000000e+00> : vector<16xf32>
    %240 = vector.multi_reduction <add>, %239, %cst_96 [1] : vector<16x16xf32> to vector<16xf32>
    %241 = vector.shape_cast %240 : vector<16xf32> to vector<16x1xf32>
    %242 = vector.broadcast %241 : vector<16x1xf32> to vector<16x16xf32>
    %243 = arith.divf %239, %242 : vector<16x16xf32>
    %cst_97 = arith.constant dense<0.000000e+00> : vector<16x8xf32>
    %244 = tpu.matmul %243, %232, %cst_97 {dimension_numbers = #tpu.dot_dimension_numbers<[1], [0], [0], [1], [0, 0, 1, 1], [], []>} : vector<16x16xf32>, vector<16x8xf32>, vector<16x8xf32> -> vector<16x8xf32>
    %c824 = arith.constant 824 : index
    %c0_98 = arith.constant 0 : index
    %245 = vector.load %arg1[%c824, %c0_98] : memref<2160x128xf32, #tpu.memory_space<vmem>>, vector<8x32xf32>
    %cst_99 = arith.constant dense<0.000000e+00> : vector<16x32xf32>
    %246 = tpu.matmul %244, %245, %cst_99 {dimension_numbers = #tpu.dot_dimension_numbers<[1], [0], [0], [1], [0, 0, 1, 1], [], []>} : vector<16x8xf32>, vector<8x32xf32>, vector<16x32xf32> -> vector<16x32xf32>
    %c832 = arith.constant 832 : index
    %c0_100 = arith.constant 0 : index
    %247 = vector.load %arg1[%c832, %c0_100] : memref<2160x128xf32, #tpu.memory_space<vmem>>, vector<32x8xf32>
    %cst_101 = arith.constant dense<0.000000e+00> : vector<16x8xf32>
    %248 = tpu.matmul %219, %247, %cst_101 {dimension_numbers = #tpu.dot_dimension_numbers<[1], [0], [0], [1], [0, 0, 1, 1], [], []>} : vector<16x32xf32>, vector<32x8xf32>, vector<16x8xf32> -> vector<16x8xf32>
    %249 = vector.extract_strided_slice %220 {offsets = [1, 0], sizes = [1, 8], strides = [1, 1]} : vector<8x8xf32> to vector<1x8xf32>
    %250 = vector.broadcast %249 : vector<1x8xf32> to vector<16x8xf32>
    %251 = arith.addf %248, %250 : vector<16x8xf32>
    %c864 = arith.constant 864 : index
    %c0_102 = arith.constant 0 : index
    %252 = vector.load %arg1[%c864, %c0_102] : memref<2160x128xf32, #tpu.memory_space<vmem>>, vector<32x8xf32>
    %cst_103 = arith.constant dense<0.000000e+00> : vector<16x8xf32>
    %253 = tpu.matmul %219, %252, %cst_103 {dimension_numbers = #tpu.dot_dimension_numbers<[1], [0], [0], [1], [0, 0, 1, 1], [], []>} : vector<16x32xf32>, vector<32x8xf32>, vector<16x8xf32> -> vector<16x8xf32>
    %254 = vector.extract_strided_slice %220 {offsets = [5, 0], sizes = [1, 8], strides = [1, 1]} : vector<8x8xf32> to vector<1x8xf32>
    %255 = vector.broadcast %254 : vector<1x8xf32> to vector<16x8xf32>
    %256 = arith.addf %253, %255 : vector<16x8xf32>
    %c896 = arith.constant 896 : index
    %c0_104 = arith.constant 0 : index
    %257 = vector.load %arg1[%c896, %c0_104] : memref<2160x128xf32, #tpu.memory_space<vmem>>, vector<32x8xf32>
    %cst_105 = arith.constant dense<0.000000e+00> : vector<16x8xf32>
    %258 = tpu.matmul %219, %257, %cst_105 {dimension_numbers = #tpu.dot_dimension_numbers<[1], [0], [0], [1], [0, 0, 1, 1], [], []>} : vector<16x32xf32>, vector<32x8xf32>, vector<16x8xf32> -> vector<16x8xf32>
    %cst_106 = arith.constant dense<0.000000e+00> : vector<16x16xf32>
    %259 = tpu.matmul %251, %256, %cst_106 {dimension_numbers = #tpu.dot_dimension_numbers<[1], [1], [0], [0], [0, 0, 1, 0], [], []>} : vector<16x8xf32>, vector<16x8xf32>, vector<16x16xf32> -> vector<16x16xf32>
    %260 = arith.addf %259, %1 : vector<16x16xf32>
    %cst_107 = arith.constant dense<0xFF800000> : vector<16xf32>
    %261 = vector.multi_reduction <maximumf>, %260, %cst_107 [1] : vector<16x16xf32> to vector<16xf32>
    %262 = vector.shape_cast %261 : vector<16xf32> to vector<16x1xf32>
    %263 = vector.broadcast %262 : vector<16x1xf32> to vector<16x16xf32>
    %264 = arith.subf %260, %263 : vector<16x16xf32>
    %265 = math.exp %264 : vector<16x16xf32>
    %cst_108 = arith.constant dense<0.000000e+00> : vector<16xf32>
    %266 = vector.multi_reduction <add>, %265, %cst_108 [1] : vector<16x16xf32> to vector<16xf32>
    %267 = vector.shape_cast %266 : vector<16xf32> to vector<16x1xf32>
    %268 = vector.broadcast %267 : vector<16x1xf32> to vector<16x16xf32>
    %269 = arith.divf %265, %268 : vector<16x16xf32>
    %cst_109 = arith.constant dense<0.000000e+00> : vector<16x8xf32>
    %270 = tpu.matmul %269, %258, %cst_109 {dimension_numbers = #tpu.dot_dimension_numbers<[1], [0], [0], [1], [0, 0, 1, 1], [], []>} : vector<16x16xf32>, vector<16x8xf32>, vector<16x8xf32> -> vector<16x8xf32>
    %c928 = arith.constant 928 : index
    %c0_110 = arith.constant 0 : index
    %271 = vector.load %arg1[%c928, %c0_110] : memref<2160x128xf32, #tpu.memory_space<vmem>>, vector<8x32xf32>
    %cst_111 = arith.constant dense<0.000000e+00> : vector<16x32xf32>
    %272 = tpu.matmul %270, %271, %cst_111 {dimension_numbers = #tpu.dot_dimension_numbers<[1], [0], [0], [1], [0, 0, 1, 1], [], []>} : vector<16x8xf32>, vector<8x32xf32>, vector<16x32xf32> -> vector<16x32xf32>
    %273 = arith.addf %246, %272 : vector<16x32xf32>
    %c936 = arith.constant 936 : index
    %c0_112 = arith.constant 0 : index
    %274 = vector.load %arg1[%c936, %c0_112] : memref<2160x128xf32, #tpu.memory_space<vmem>>, vector<32x8xf32>
    %cst_113 = arith.constant dense<0.000000e+00> : vector<16x8xf32>
    %275 = tpu.matmul %219, %274, %cst_113 {dimension_numbers = #tpu.dot_dimension_numbers<[1], [0], [0], [1], [0, 0, 1, 1], [], []>} : vector<16x32xf32>, vector<32x8xf32>, vector<16x8xf32> -> vector<16x8xf32>
    %276 = vector.extract_strided_slice %220 {offsets = [2, 0], sizes = [1, 8], strides = [1, 1]} : vector<8x8xf32> to vector<1x8xf32>
    %277 = vector.broadcast %276 : vector<1x8xf32> to vector<16x8xf32>
    %278 = arith.addf %275, %277 : vector<16x8xf32>
    %c968 = arith.constant 968 : index
    %c0_114 = arith.constant 0 : index
    %279 = vector.load %arg1[%c968, %c0_114] : memref<2160x128xf32, #tpu.memory_space<vmem>>, vector<32x8xf32>
    %cst_115 = arith.constant dense<0.000000e+00> : vector<16x8xf32>
    %280 = tpu.matmul %219, %279, %cst_115 {dimension_numbers = #tpu.dot_dimension_numbers<[1], [0], [0], [1], [0, 0, 1, 1], [], []>} : vector<16x32xf32>, vector<32x8xf32>, vector<16x8xf32> -> vector<16x8xf32>
    %281 = vector.extract_strided_slice %220 {offsets = [6, 0], sizes = [1, 8], strides = [1, 1]} : vector<8x8xf32> to vector<1x8xf32>
    %282 = vector.broadcast %281 : vector<1x8xf32> to vector<16x8xf32>
    %283 = arith.addf %280, %282 : vector<16x8xf32>
    %c1000 = arith.constant 1000 : index
    %c0_116 = arith.constant 0 : index
    %284 = vector.load %arg1[%c1000, %c0_116] : memref<2160x128xf32, #tpu.memory_space<vmem>>, vector<32x8xf32>
    %cst_117 = arith.constant dense<0.000000e+00> : vector<16x8xf32>
    %285 = tpu.matmul %219, %284, %cst_117 {dimension_numbers = #tpu.dot_dimension_numbers<[1], [0], [0], [1], [0, 0, 1, 1], [], []>} : vector<16x32xf32>, vector<32x8xf32>, vector<16x8xf32> -> vector<16x8xf32>
    %cst_118 = arith.constant dense<0.000000e+00> : vector<16x16xf32>
    %286 = tpu.matmul %278, %283, %cst_118 {dimension_numbers = #tpu.dot_dimension_numbers<[1], [1], [0], [0], [0, 0, 1, 0], [], []>} : vector<16x8xf32>, vector<16x8xf32>, vector<16x16xf32> -> vector<16x16xf32>
    %287 = arith.addf %286, %2 : vector<16x16xf32>
    %cst_119 = arith.constant dense<0xFF800000> : vector<16xf32>
    %288 = vector.multi_reduction <maximumf>, %287, %cst_119 [1] : vector<16x16xf32> to vector<16xf32>
    %289 = vector.shape_cast %288 : vector<16xf32> to vector<16x1xf32>
    %290 = vector.broadcast %289 : vector<16x1xf32> to vector<16x16xf32>
    %291 = arith.subf %287, %290 : vector<16x16xf32>
    %292 = math.exp %291 : vector<16x16xf32>
    %cst_120 = arith.constant dense<0.000000e+00> : vector<16xf32>
    %293 = vector.multi_reduction <add>, %292, %cst_120 [1] : vector<16x16xf32> to vector<16xf32>
    %294 = vector.shape_cast %293 : vector<16xf32> to vector<16x1xf32>
    %295 = vector.broadcast %294 : vector<16x1xf32> to vector<16x16xf32>
    %296 = arith.divf %292, %295 : vector<16x16xf32>
    %cst_121 = arith.constant dense<0.000000e+00> : vector<16x8xf32>
    %297 = tpu.matmul %296, %285, %cst_121 {dimension_numbers = #tpu.dot_dimension_numbers<[1], [0], [0], [1], [0, 0, 1, 1], [], []>} : vector<16x16xf32>, vector<16x8xf32>, vector<16x8xf32> -> vector<16x8xf32>
    %c1032 = arith.constant 1032 : index
    %c0_122 = arith.constant 0 : index
    %298 = vector.load %arg1[%c1032, %c0_122] : memref<2160x128xf32, #tpu.memory_space<vmem>>, vector<8x32xf32>
    %cst_123 = arith.constant dense<0.000000e+00> : vector<16x32xf32>
    %299 = tpu.matmul %297, %298, %cst_123 {dimension_numbers = #tpu.dot_dimension_numbers<[1], [0], [0], [1], [0, 0, 1, 1], [], []>} : vector<16x8xf32>, vector<8x32xf32>, vector<16x32xf32> -> vector<16x32xf32>
    %300 = arith.addf %273, %299 : vector<16x32xf32>
    %c1040 = arith.constant 1040 : index
    %c0_124 = arith.constant 0 : index
    %301 = vector.load %arg1[%c1040, %c0_124] : memref<2160x128xf32, #tpu.memory_space<vmem>>, vector<32x8xf32>
    %cst_125 = arith.constant dense<0.000000e+00> : vector<16x8xf32>
    %302 = tpu.matmul %219, %301, %cst_125 {dimension_numbers = #tpu.dot_dimension_numbers<[1], [0], [0], [1], [0, 0, 1, 1], [], []>} : vector<16x32xf32>, vector<32x8xf32>, vector<16x8xf32> -> vector<16x8xf32>
    %303 = vector.extract_strided_slice %220 {offsets = [3, 0], sizes = [1, 8], strides = [1, 1]} : vector<8x8xf32> to vector<1x8xf32>
    %304 = vector.broadcast %303 : vector<1x8xf32> to vector<16x8xf32>
    %305 = arith.addf %302, %304 : vector<16x8xf32>
    %c1072 = arith.constant 1072 : index
    %c0_126 = arith.constant 0 : index
    %306 = vector.load %arg1[%c1072, %c0_126] : memref<2160x128xf32, #tpu.memory_space<vmem>>, vector<32x8xf32>
    %cst_127 = arith.constant dense<0.000000e+00> : vector<16x8xf32>
    %307 = tpu.matmul %219, %306, %cst_127 {dimension_numbers = #tpu.dot_dimension_numbers<[1], [0], [0], [1], [0, 0, 1, 1], [], []>} : vector<16x32xf32>, vector<32x8xf32>, vector<16x8xf32> -> vector<16x8xf32>
    %308 = vector.extract_strided_slice %220 {offsets = [7, 0], sizes = [1, 8], strides = [1, 1]} : vector<8x8xf32> to vector<1x8xf32>
    %309 = vector.broadcast %308 : vector<1x8xf32> to vector<16x8xf32>
    %310 = arith.addf %307, %309 : vector<16x8xf32>
    %c1104 = arith.constant 1104 : index
    %c0_128 = arith.constant 0 : index
    %311 = vector.load %arg1[%c1104, %c0_128] : memref<2160x128xf32, #tpu.memory_space<vmem>>, vector<32x8xf32>
    %cst_129 = arith.constant dense<0.000000e+00> : vector<16x8xf32>
    %312 = tpu.matmul %219, %311, %cst_129 {dimension_numbers = #tpu.dot_dimension_numbers<[1], [0], [0], [1], [0, 0, 1, 1], [], []>} : vector<16x32xf32>, vector<32x8xf32>, vector<16x8xf32> -> vector<16x8xf32>
    %cst_130 = arith.constant dense<0.000000e+00> : vector<16x16xf32>
    %313 = tpu.matmul %305, %310, %cst_130 {dimension_numbers = #tpu.dot_dimension_numbers<[1], [1], [0], [0], [0, 0, 1, 0], [], []>} : vector<16x8xf32>, vector<16x8xf32>, vector<16x16xf32> -> vector<16x16xf32>
    %314 = arith.addf %313, %3 : vector<16x16xf32>
    %cst_131 = arith.constant dense<0xFF800000> : vector<16xf32>
    %315 = vector.multi_reduction <maximumf>, %314, %cst_131 [1] : vector<16x16xf32> to vector<16xf32>
    %316 = vector.shape_cast %315 : vector<16xf32> to vector<16x1xf32>
    %317 = vector.broadcast %316 : vector<16x1xf32> to vector<16x16xf32>
    %318 = arith.subf %314, %317 : vector<16x16xf32>
    %319 = math.exp %318 : vector<16x16xf32>
    %cst_132 = arith.constant dense<0.000000e+00> : vector<16xf32>
    %320 = vector.multi_reduction <add>, %319, %cst_132 [1] : vector<16x16xf32> to vector<16xf32>
    %321 = vector.shape_cast %320 : vector<16xf32> to vector<16x1xf32>
    %322 = vector.broadcast %321 : vector<16x1xf32> to vector<16x16xf32>
    %323 = arith.divf %319, %322 : vector<16x16xf32>
    %cst_133 = arith.constant dense<0.000000e+00> : vector<16x8xf32>
    %324 = tpu.matmul %323, %312, %cst_133 {dimension_numbers = #tpu.dot_dimension_numbers<[1], [0], [0], [1], [0, 0, 1, 1], [], []>} : vector<16x16xf32>, vector<16x8xf32>, vector<16x8xf32> -> vector<16x8xf32>
    %c1136 = arith.constant 1136 : index
    %c0_134 = arith.constant 0 : index
    %325 = vector.load %arg1[%c1136, %c0_134] : memref<2160x128xf32, #tpu.memory_space<vmem>>, vector<8x32xf32>
    %cst_135 = arith.constant dense<0.000000e+00> : vector<16x32xf32>
    %326 = tpu.matmul %324, %325, %cst_135 {dimension_numbers = #tpu.dot_dimension_numbers<[1], [0], [0], [1], [0, 0, 1, 1], [], []>} : vector<16x8xf32>, vector<8x32xf32>, vector<16x32xf32> -> vector<16x32xf32>
    %327 = arith.addf %300, %326 : vector<16x32xf32>
    %c1152 = arith.constant 1152 : index
    %c0_136 = arith.constant 0 : index
    %328 = vector.load %arg1[%c1152, %c0_136] : memref<2160x128xf32, #tpu.memory_space<vmem>>, vector<1x32xf32>
    %329 = vector.broadcast %328 : vector<1x32xf32> to vector<16x32xf32>
    %330 = arith.addf %327, %329 : vector<16x32xf32>
    %331 = arith.addf %194, %330 : vector<16x32xf32>
    %c1160 = arith.constant 1160 : index
    %c0_137 = arith.constant 0 : index
    %332 = vector.load %arg1[%c1160, %c0_137] : memref<2160x128xf32, #tpu.memory_space<vmem>>, vector<2x32xf32>
    %cst_138 = arith.constant dense<0.000000e+00> : vector<16xf32>
    %333 = vector.multi_reduction <add>, %331, %cst_138 [1] : vector<16x32xf32> to vector<16xf32>
    %334 = vector.shape_cast %333 : vector<16xf32> to vector<16x1xf32>
    %cst_139 = arith.constant 3.200000e+01 : f32
    %335 = vector.broadcast %cst_139 : f32 to vector<16x1xf32>
    %336 = arith.divf %334, %335 : vector<16x1xf32>
    %337 = vector.broadcast %336 : vector<16x1xf32> to vector<16x32xf32>
    %338 = arith.subf %331, %337 : vector<16x32xf32>
    %339 = arith.mulf %338, %338 : vector<16x32xf32>
    %cst_140 = arith.constant dense<0.000000e+00> : vector<16xf32>
    %340 = vector.multi_reduction <add>, %339, %cst_140 [1] : vector<16x32xf32> to vector<16xf32>
    %341 = vector.shape_cast %340 : vector<16xf32> to vector<16x1xf32>
    %cst_141 = arith.constant 3.200000e+01 : f32
    %342 = vector.broadcast %cst_141 : f32 to vector<16x1xf32>
    %343 = arith.divf %341, %342 : vector<16x1xf32>
    %344 = vector.broadcast %336 : vector<16x1xf32> to vector<16x32xf32>
    %345 = arith.subf %331, %344 : vector<16x32xf32>
    %cst_142 = arith.constant 9.99999974E-6 : f32
    %346 = vector.broadcast %cst_142 : f32 to vector<16x1xf32>
    %347 = arith.addf %343, %346 : vector<16x1xf32>
    %348 = math.rsqrt %347 : vector<16x1xf32>
    %349 = vector.broadcast %348 : vector<16x1xf32> to vector<16x32xf32>
    %350 = arith.mulf %345, %349 : vector<16x32xf32>
    %351 = vector.extract_strided_slice %332 {offsets = [0, 0], sizes = [1, 32], strides = [1, 1]} : vector<2x32xf32> to vector<1x32xf32>
    %352 = vector.broadcast %351 : vector<1x32xf32> to vector<16x32xf32>
    %353 = arith.mulf %350, %352 : vector<16x32xf32>
    %354 = vector.extract_strided_slice %332 {offsets = [1, 0], sizes = [1, 32], strides = [1, 1]} : vector<2x32xf32> to vector<1x32xf32>
    %355 = vector.broadcast %354 : vector<1x32xf32> to vector<16x32xf32>
    %356 = arith.addf %353, %355 : vector<16x32xf32>
    %c1584 = arith.constant 1584 : index
    %c0_143 = arith.constant 0 : index
    %357 = vector.load %arg1[%c1584, %c0_143] : memref<2160x128xf32, #tpu.memory_space<vmem>>, vector<8x8xf32>
    %c1168 = arith.constant 1168 : index
    %c0_144 = arith.constant 0 : index
    %358 = vector.load %arg1[%c1168, %c0_144] : memref<2160x128xf32, #tpu.memory_space<vmem>>, vector<32x8xf32>
    %cst_145 = arith.constant dense<0.000000e+00> : vector<16x8xf32>
    %359 = tpu.matmul %356, %358, %cst_145 {dimension_numbers = #tpu.dot_dimension_numbers<[1], [0], [0], [1], [0, 0, 1, 1], [], []>} : vector<16x32xf32>, vector<32x8xf32>, vector<16x8xf32> -> vector<16x8xf32>
    %360 = vector.extract_strided_slice %357 {offsets = [0, 0], sizes = [1, 8], strides = [1, 1]} : vector<8x8xf32> to vector<1x8xf32>
    %361 = vector.broadcast %360 : vector<1x8xf32> to vector<16x8xf32>
    %362 = arith.addf %359, %361 : vector<16x8xf32>
    %c1200 = arith.constant 1200 : index
    %c0_146 = arith.constant 0 : index
    %363 = vector.load %arg1[%c1200, %c0_146] : memref<2160x128xf32, #tpu.memory_space<vmem>>, vector<32x8xf32>
    %cst_147 = arith.constant dense<0.000000e+00> : vector<16x8xf32>
    %364 = tpu.matmul %356, %363, %cst_147 {dimension_numbers = #tpu.dot_dimension_numbers<[1], [0], [0], [1], [0, 0, 1, 1], [], []>} : vector<16x32xf32>, vector<32x8xf32>, vector<16x8xf32> -> vector<16x8xf32>
    %365 = vector.extract_strided_slice %357 {offsets = [4, 0], sizes = [1, 8], strides = [1, 1]} : vector<8x8xf32> to vector<1x8xf32>
    %366 = vector.broadcast %365 : vector<1x8xf32> to vector<16x8xf32>
    %367 = arith.addf %364, %366 : vector<16x8xf32>
    %c1232 = arith.constant 1232 : index
    %c0_148 = arith.constant 0 : index
    %368 = vector.load %arg1[%c1232, %c0_148] : memref<2160x128xf32, #tpu.memory_space<vmem>>, vector<32x8xf32>
    %cst_149 = arith.constant dense<0.000000e+00> : vector<16x8xf32>
    %369 = tpu.matmul %356, %368, %cst_149 {dimension_numbers = #tpu.dot_dimension_numbers<[1], [0], [0], [1], [0, 0, 1, 1], [], []>} : vector<16x32xf32>, vector<32x8xf32>, vector<16x8xf32> -> vector<16x8xf32>
    %cst_150 = arith.constant dense<0.000000e+00> : vector<16x16xf32>
    %370 = tpu.matmul %362, %367, %cst_150 {dimension_numbers = #tpu.dot_dimension_numbers<[1], [1], [0], [0], [0, 0, 1, 0], [], []>} : vector<16x8xf32>, vector<16x8xf32>, vector<16x16xf32> -> vector<16x16xf32>
    %371 = arith.addf %370, %4 : vector<16x16xf32>
    %cst_151 = arith.constant dense<0xFF800000> : vector<16xf32>
    %372 = vector.multi_reduction <maximumf>, %371, %cst_151 [1] : vector<16x16xf32> to vector<16xf32>
    %373 = vector.shape_cast %372 : vector<16xf32> to vector<16x1xf32>
    %374 = vector.broadcast %373 : vector<16x1xf32> to vector<16x16xf32>
    %375 = arith.subf %371, %374 : vector<16x16xf32>
    %376 = math.exp %375 : vector<16x16xf32>
    %cst_152 = arith.constant dense<0.000000e+00> : vector<16xf32>
    %377 = vector.multi_reduction <add>, %376, %cst_152 [1] : vector<16x16xf32> to vector<16xf32>
    %378 = vector.shape_cast %377 : vector<16xf32> to vector<16x1xf32>
    %379 = vector.broadcast %378 : vector<16x1xf32> to vector<16x16xf32>
    %380 = arith.divf %376, %379 : vector<16x16xf32>
    %cst_153 = arith.constant dense<0.000000e+00> : vector<16x8xf32>
    %381 = tpu.matmul %380, %369, %cst_153 {dimension_numbers = #tpu.dot_dimension_numbers<[1], [0], [0], [1], [0, 0, 1, 1], [], []>} : vector<16x16xf32>, vector<16x8xf32>, vector<16x8xf32> -> vector<16x8xf32>
    %c1264 = arith.constant 1264 : index
    %c0_154 = arith.constant 0 : index
    %382 = vector.load %arg1[%c1264, %c0_154] : memref<2160x128xf32, #tpu.memory_space<vmem>>, vector<8x32xf32>
    %cst_155 = arith.constant dense<0.000000e+00> : vector<16x32xf32>
    %383 = tpu.matmul %381, %382, %cst_155 {dimension_numbers = #tpu.dot_dimension_numbers<[1], [0], [0], [1], [0, 0, 1, 1], [], []>} : vector<16x8xf32>, vector<8x32xf32>, vector<16x32xf32> -> vector<16x32xf32>
    %c1272 = arith.constant 1272 : index
    %c0_156 = arith.constant 0 : index
    %384 = vector.load %arg1[%c1272, %c0_156] : memref<2160x128xf32, #tpu.memory_space<vmem>>, vector<32x8xf32>
    %cst_157 = arith.constant dense<0.000000e+00> : vector<16x8xf32>
    %385 = tpu.matmul %356, %384, %cst_157 {dimension_numbers = #tpu.dot_dimension_numbers<[1], [0], [0], [1], [0, 0, 1, 1], [], []>} : vector<16x32xf32>, vector<32x8xf32>, vector<16x8xf32> -> vector<16x8xf32>
    %386 = vector.extract_strided_slice %357 {offsets = [1, 0], sizes = [1, 8], strides = [1, 1]} : vector<8x8xf32> to vector<1x8xf32>
    %387 = vector.broadcast %386 : vector<1x8xf32> to vector<16x8xf32>
    %388 = arith.addf %385, %387 : vector<16x8xf32>
    %c1304 = arith.constant 1304 : index
    %c0_158 = arith.constant 0 : index
    %389 = vector.load %arg1[%c1304, %c0_158] : memref<2160x128xf32, #tpu.memory_space<vmem>>, vector<32x8xf32>
    %cst_159 = arith.constant dense<0.000000e+00> : vector<16x8xf32>
    %390 = tpu.matmul %356, %389, %cst_159 {dimension_numbers = #tpu.dot_dimension_numbers<[1], [0], [0], [1], [0, 0, 1, 1], [], []>} : vector<16x32xf32>, vector<32x8xf32>, vector<16x8xf32> -> vector<16x8xf32>
    %391 = vector.extract_strided_slice %357 {offsets = [5, 0], sizes = [1, 8], strides = [1, 1]} : vector<8x8xf32> to vector<1x8xf32>
    %392 = vector.broadcast %391 : vector<1x8xf32> to vector<16x8xf32>
    %393 = arith.addf %390, %392 : vector<16x8xf32>
    %c1336 = arith.constant 1336 : index
    %c0_160 = arith.constant 0 : index
    %394 = vector.load %arg1[%c1336, %c0_160] : memref<2160x128xf32, #tpu.memory_space<vmem>>, vector<32x8xf32>
    %cst_161 = arith.constant dense<0.000000e+00> : vector<16x8xf32>
    %395 = tpu.matmul %356, %394, %cst_161 {dimension_numbers = #tpu.dot_dimension_numbers<[1], [0], [0], [1], [0, 0, 1, 1], [], []>} : vector<16x32xf32>, vector<32x8xf32>, vector<16x8xf32> -> vector<16x8xf32>
    %cst_162 = arith.constant dense<0.000000e+00> : vector<16x16xf32>
    %396 = tpu.matmul %388, %393, %cst_162 {dimension_numbers = #tpu.dot_dimension_numbers<[1], [1], [0], [0], [0, 0, 1, 0], [], []>} : vector<16x8xf32>, vector<16x8xf32>, vector<16x16xf32> -> vector<16x16xf32>
    %397 = arith.addf %396, %5 : vector<16x16xf32>
    %cst_163 = arith.constant dense<0xFF800000> : vector<16xf32>
    %398 = vector.multi_reduction <maximumf>, %397, %cst_163 [1] : vector<16x16xf32> to vector<16xf32>
    %399 = vector.shape_cast %398 : vector<16xf32> to vector<16x1xf32>
    %400 = vector.broadcast %399 : vector<16x1xf32> to vector<16x16xf32>
    %401 = arith.subf %397, %400 : vector<16x16xf32>
    %402 = math.exp %401 : vector<16x16xf32>
    %cst_164 = arith.constant dense<0.000000e+00> : vector<16xf32>
    %403 = vector.multi_reduction <add>, %402, %cst_164 [1] : vector<16x16xf32> to vector<16xf32>
    %404 = vector.shape_cast %403 : vector<16xf32> to vector<16x1xf32>
    %405 = vector.broadcast %404 : vector<16x1xf32> to vector<16x16xf32>
    %406 = arith.divf %402, %405 : vector<16x16xf32>
    %cst_165 = arith.constant dense<0.000000e+00> : vector<16x8xf32>
    %407 = tpu.matmul %406, %395, %cst_165 {dimension_numbers = #tpu.dot_dimension_numbers<[1], [0], [0], [1], [0, 0, 1, 1], [], []>} : vector<16x16xf32>, vector<16x8xf32>, vector<16x8xf32> -> vector<16x8xf32>
    %c1368 = arith.constant 1368 : index
    %c0_166 = arith.constant 0 : index
    %408 = vector.load %arg1[%c1368, %c0_166] : memref<2160x128xf32, #tpu.memory_space<vmem>>, vector<8x32xf32>
    %cst_167 = arith.constant dense<0.000000e+00> : vector<16x32xf32>
    %409 = tpu.matmul %407, %408, %cst_167 {dimension_numbers = #tpu.dot_dimension_numbers<[1], [0], [0], [1], [0, 0, 1, 1], [], []>} : vector<16x8xf32>, vector<8x32xf32>, vector<16x32xf32> -> vector<16x32xf32>
    %410 = arith.addf %383, %409 : vector<16x32xf32>
    %c1376 = arith.constant 1376 : index
    %c0_168 = arith.constant 0 : index
    %411 = vector.load %arg1[%c1376, %c0_168] : memref<2160x128xf32, #tpu.memory_space<vmem>>, vector<32x8xf32>
    %cst_169 = arith.constant dense<0.000000e+00> : vector<16x8xf32>
    %412 = tpu.matmul %356, %411, %cst_169 {dimension_numbers = #tpu.dot_dimension_numbers<[1], [0], [0], [1], [0, 0, 1, 1], [], []>} : vector<16x32xf32>, vector<32x8xf32>, vector<16x8xf32> -> vector<16x8xf32>
    %413 = vector.extract_strided_slice %357 {offsets = [2, 0], sizes = [1, 8], strides = [1, 1]} : vector<8x8xf32> to vector<1x8xf32>
    %414 = vector.broadcast %413 : vector<1x8xf32> to vector<16x8xf32>
    %415 = arith.addf %412, %414 : vector<16x8xf32>
    %c1408 = arith.constant 1408 : index
    %c0_170 = arith.constant 0 : index
    %416 = vector.load %arg1[%c1408, %c0_170] : memref<2160x128xf32, #tpu.memory_space<vmem>>, vector<32x8xf32>
    %cst_171 = arith.constant dense<0.000000e+00> : vector<16x8xf32>
    %417 = tpu.matmul %356, %416, %cst_171 {dimension_numbers = #tpu.dot_dimension_numbers<[1], [0], [0], [1], [0, 0, 1, 1], [], []>} : vector<16x32xf32>, vector<32x8xf32>, vector<16x8xf32> -> vector<16x8xf32>
    %418 = vector.extract_strided_slice %357 {offsets = [6, 0], sizes = [1, 8], strides = [1, 1]} : vector<8x8xf32> to vector<1x8xf32>
    %419 = vector.broadcast %418 : vector<1x8xf32> to vector<16x8xf32>
    %420 = arith.addf %417, %419 : vector<16x8xf32>
    %c1440 = arith.constant 1440 : index
    %c0_172 = arith.constant 0 : index
    %421 = vector.load %arg1[%c1440, %c0_172] : memref<2160x128xf32, #tpu.memory_space<vmem>>, vector<32x8xf32>
    %cst_173 = arith.constant dense<0.000000e+00> : vector<16x8xf32>
    %422 = tpu.matmul %356, %421, %cst_173 {dimension_numbers = #tpu.dot_dimension_numbers<[1], [0], [0], [1], [0, 0, 1, 1], [], []>} : vector<16x32xf32>, vector<32x8xf32>, vector<16x8xf32> -> vector<16x8xf32>
    %cst_174 = arith.constant dense<0.000000e+00> : vector<16x16xf32>
    %423 = tpu.matmul %415, %420, %cst_174 {dimension_numbers = #tpu.dot_dimension_numbers<[1], [1], [0], [0], [0, 0, 1, 0], [], []>} : vector<16x8xf32>, vector<16x8xf32>, vector<16x16xf32> -> vector<16x16xf32>
    %424 = arith.addf %423, %6 : vector<16x16xf32>
    %cst_175 = arith.constant dense<0xFF800000> : vector<16xf32>
    %425 = vector.multi_reduction <maximumf>, %424, %cst_175 [1] : vector<16x16xf32> to vector<16xf32>
    %426 = vector.shape_cast %425 : vector<16xf32> to vector<16x1xf32>
    %427 = vector.broadcast %426 : vector<16x1xf32> to vector<16x16xf32>
    %428 = arith.subf %424, %427 : vector<16x16xf32>
    %429 = math.exp %428 : vector<16x16xf32>
    %cst_176 = arith.constant dense<0.000000e+00> : vector<16xf32>
    %430 = vector.multi_reduction <add>, %429, %cst_176 [1] : vector<16x16xf32> to vector<16xf32>
    %431 = vector.shape_cast %430 : vector<16xf32> to vector<16x1xf32>
    %432 = vector.broadcast %431 : vector<16x1xf32> to vector<16x16xf32>
    %433 = arith.divf %429, %432 : vector<16x16xf32>
    %cst_177 = arith.constant dense<0.000000e+00> : vector<16x8xf32>
    %434 = tpu.matmul %433, %422, %cst_177 {dimension_numbers = #tpu.dot_dimension_numbers<[1], [0], [0], [1], [0, 0, 1, 1], [], []>} : vector<16x16xf32>, vector<16x8xf32>, vector<16x8xf32> -> vector<16x8xf32>
    %c1472 = arith.constant 1472 : index
    %c0_178 = arith.constant 0 : index
    %435 = vector.load %arg1[%c1472, %c0_178] : memref<2160x128xf32, #tpu.memory_space<vmem>>, vector<8x32xf32>
    %cst_179 = arith.constant dense<0.000000e+00> : vector<16x32xf32>
    %436 = tpu.matmul %434, %435, %cst_179 {dimension_numbers = #tpu.dot_dimension_numbers<[1], [0], [0], [1], [0, 0, 1, 1], [], []>} : vector<16x8xf32>, vector<8x32xf32>, vector<16x32xf32> -> vector<16x32xf32>
    %437 = arith.addf %410, %436 : vector<16x32xf32>
    %c1480 = arith.constant 1480 : index
    %c0_180 = arith.constant 0 : index
    %438 = vector.load %arg1[%c1480, %c0_180] : memref<2160x128xf32, #tpu.memory_space<vmem>>, vector<32x8xf32>
    %cst_181 = arith.constant dense<0.000000e+00> : vector<16x8xf32>
    %439 = tpu.matmul %356, %438, %cst_181 {dimension_numbers = #tpu.dot_dimension_numbers<[1], [0], [0], [1], [0, 0, 1, 1], [], []>} : vector<16x32xf32>, vector<32x8xf32>, vector<16x8xf32> -> vector<16x8xf32>
    %440 = vector.extract_strided_slice %357 {offsets = [3, 0], sizes = [1, 8], strides = [1, 1]} : vector<8x8xf32> to vector<1x8xf32>
    %441 = vector.broadcast %440 : vector<1x8xf32> to vector<16x8xf32>
    %442 = arith.addf %439, %441 : vector<16x8xf32>
    %c1512 = arith.constant 1512 : index
    %c0_182 = arith.constant 0 : index
    %443 = vector.load %arg1[%c1512, %c0_182] : memref<2160x128xf32, #tpu.memory_space<vmem>>, vector<32x8xf32>
    %cst_183 = arith.constant dense<0.000000e+00> : vector<16x8xf32>
    %444 = tpu.matmul %356, %443, %cst_183 {dimension_numbers = #tpu.dot_dimension_numbers<[1], [0], [0], [1], [0, 0, 1, 1], [], []>} : vector<16x32xf32>, vector<32x8xf32>, vector<16x8xf32> -> vector<16x8xf32>
    %445 = vector.extract_strided_slice %357 {offsets = [7, 0], sizes = [1, 8], strides = [1, 1]} : vector<8x8xf32> to vector<1x8xf32>
    %446 = vector.broadcast %445 : vector<1x8xf32> to vector<16x8xf32>
    %447 = arith.addf %444, %446 : vector<16x8xf32>
    %c1544 = arith.constant 1544 : index
    %c0_184 = arith.constant 0 : index
    %448 = vector.load %arg1[%c1544, %c0_184] : memref<2160x128xf32, #tpu.memory_space<vmem>>, vector<32x8xf32>
    %cst_185 = arith.constant dense<0.000000e+00> : vector<16x8xf32>
    %449 = tpu.matmul %356, %448, %cst_185 {dimension_numbers = #tpu.dot_dimension_numbers<[1], [0], [0], [1], [0, 0, 1, 1], [], []>} : vector<16x32xf32>, vector<32x8xf32>, vector<16x8xf32> -> vector<16x8xf32>
    %cst_186 = arith.constant dense<0.000000e+00> : vector<16x16xf32>
    %450 = tpu.matmul %442, %447, %cst_186 {dimension_numbers = #tpu.dot_dimension_numbers<[1], [1], [0], [0], [0, 0, 1, 0], [], []>} : vector<16x8xf32>, vector<16x8xf32>, vector<16x16xf32> -> vector<16x16xf32>
    %451 = arith.addf %450, %7 : vector<16x16xf32>
    %cst_187 = arith.constant dense<0xFF800000> : vector<16xf32>
    %452 = vector.multi_reduction <maximumf>, %451, %cst_187 [1] : vector<16x16xf32> to vector<16xf32>
    %453 = vector.shape_cast %452 : vector<16xf32> to vector<16x1xf32>
    %454 = vector.broadcast %453 : vector<16x1xf32> to vector<16x16xf32>
    %455 = arith.subf %451, %454 : vector<16x16xf32>
    %456 = math.exp %455 : vector<16x16xf32>
    %cst_188 = arith.constant dense<0.000000e+00> : vector<16xf32>
    %457 = vector.multi_reduction <add>, %456, %cst_188 [1] : vector<16x16xf32> to vector<16xf32>
    %458 = vector.shape_cast %457 : vector<16xf32> to vector<16x1xf32>
    %459 = vector.broadcast %458 : vector<16x1xf32> to vector<16x16xf32>
    %460 = arith.divf %456, %459 : vector<16x16xf32>
    %cst_189 = arith.constant dense<0.000000e+00> : vector<16x8xf32>
    %461 = tpu.matmul %460, %449, %cst_189 {dimension_numbers = #tpu.dot_dimension_numbers<[1], [0], [0], [1], [0, 0, 1, 1], [], []>} : vector<16x16xf32>, vector<16x8xf32>, vector<16x8xf32> -> vector<16x8xf32>
    %c1576 = arith.constant 1576 : index
    %c0_190 = arith.constant 0 : index
    %462 = vector.load %arg1[%c1576, %c0_190] : memref<2160x128xf32, #tpu.memory_space<vmem>>, vector<8x32xf32>
    %cst_191 = arith.constant dense<0.000000e+00> : vector<16x32xf32>
    %463 = tpu.matmul %461, %462, %cst_191 {dimension_numbers = #tpu.dot_dimension_numbers<[1], [0], [0], [1], [0, 0, 1, 1], [], []>} : vector<16x8xf32>, vector<8x32xf32>, vector<16x32xf32> -> vector<16x32xf32>
    %464 = arith.addf %437, %463 : vector<16x32xf32>
    %c1592 = arith.constant 1592 : index
    %c0_192 = arith.constant 0 : index
    %465 = vector.load %arg1[%c1592, %c0_192] : memref<2160x128xf32, #tpu.memory_space<vmem>>, vector<1x32xf32>
    %466 = vector.broadcast %465 : vector<1x32xf32> to vector<16x32xf32>
    %467 = arith.addf %464, %466 : vector<16x32xf32>
    %468 = arith.addf %331, %467 : vector<16x32xf32>
    %c1600 = arith.constant 1600 : index
    %c0_193 = arith.constant 0 : index
    %469 = vector.load %arg1[%c1600, %c0_193] : memref<2160x128xf32, #tpu.memory_space<vmem>>, vector<2x32xf32>
    %cst_194 = arith.constant dense<0.000000e+00> : vector<16xf32>
    %470 = vector.multi_reduction <add>, %468, %cst_194 [1] : vector<16x32xf32> to vector<16xf32>
    %471 = vector.shape_cast %470 : vector<16xf32> to vector<16x1xf32>
    %cst_195 = arith.constant 3.200000e+01 : f32
    %472 = vector.broadcast %cst_195 : f32 to vector<16x1xf32>
    %473 = arith.divf %471, %472 : vector<16x1xf32>
    %474 = vector.broadcast %473 : vector<16x1xf32> to vector<16x32xf32>
    %475 = arith.subf %468, %474 : vector<16x32xf32>
    %476 = arith.mulf %475, %475 : vector<16x32xf32>
    %cst_196 = arith.constant dense<0.000000e+00> : vector<16xf32>
    %477 = vector.multi_reduction <add>, %476, %cst_196 [1] : vector<16x32xf32> to vector<16xf32>
    %478 = vector.shape_cast %477 : vector<16xf32> to vector<16x1xf32>
    %cst_197 = arith.constant 3.200000e+01 : f32
    %479 = vector.broadcast %cst_197 : f32 to vector<16x1xf32>
    %480 = arith.divf %478, %479 : vector<16x1xf32>
    %481 = vector.broadcast %473 : vector<16x1xf32> to vector<16x32xf32>
    %482 = arith.subf %468, %481 : vector<16x32xf32>
    %cst_198 = arith.constant 9.99999974E-6 : f32
    %483 = vector.broadcast %cst_198 : f32 to vector<16x1xf32>
    %484 = arith.addf %480, %483 : vector<16x1xf32>
    %485 = math.rsqrt %484 : vector<16x1xf32>
    %486 = vector.broadcast %485 : vector<16x1xf32> to vector<16x32xf32>
    %487 = arith.mulf %482, %486 : vector<16x32xf32>
    %488 = vector.extract_strided_slice %469 {offsets = [0, 0], sizes = [1, 32], strides = [1, 1]} : vector<2x32xf32> to vector<1x32xf32>
    %489 = vector.broadcast %488 : vector<1x32xf32> to vector<16x32xf32>
    %490 = arith.mulf %487, %489 : vector<16x32xf32>
    %491 = vector.extract_strided_slice %469 {offsets = [1, 0], sizes = [1, 32], strides = [1, 1]} : vector<2x32xf32> to vector<1x32xf32>
    %492 = vector.broadcast %491 : vector<1x32xf32> to vector<16x32xf32>
    %493 = arith.addf %490, %492 : vector<16x32xf32>
    %c1608 = arith.constant 1608 : index
    %c0_199 = arith.constant 0 : index
    %494 = vector.load %arg1[%c1608, %c0_199] : memref<2160x128xf32, #tpu.memory_space<vmem>>, vector<32x96xf32>
    %cst_200 = arith.constant dense<0.000000e+00> : vector<16x96xf32>
    %495 = tpu.matmul %493, %494, %cst_200 {dimension_numbers = #tpu.dot_dimension_numbers<[1], [0], [0], [1], [0, 0, 1, 1], [], []>} : vector<16x32xf32>, vector<32x96xf32>, vector<16x96xf32> -> vector<16x96xf32>
    %c1640 = arith.constant 1640 : index
    %c0_201 = arith.constant 0 : index
    %496 = vector.load %arg1[%c1640, %c0_201] : memref<2160x128xf32, #tpu.memory_space<vmem>>, vector<1x96xf32>
    %497 = vector.broadcast %496 : vector<1x96xf32> to vector<16x96xf32>
    %498 = arith.addf %495, %497 : vector<16x96xf32>
    %cst_202 = arith.constant 5.000000e-01 : f32
    %499 = vector.broadcast %cst_202 : f32 to vector<16x96xf32>
    %500 = arith.mulf %499, %498 : vector<16x96xf32>
    %cst_203 = arith.constant 4.471500e-02 : f32
    %501 = vector.broadcast %cst_203 : f32 to vector<16x96xf32>
    %502 = arith.mulf %501, %498 : vector<16x96xf32>
    %503 = arith.mulf %502, %498 : vector<16x96xf32>
    %504 = arith.mulf %503, %498 : vector<16x96xf32>
    %505 = arith.addf %498, %504 : vector<16x96xf32>
    %cst_204 = arith.constant 0.797884583 : f32
    %506 = vector.broadcast %cst_204 : f32 to vector<16x96xf32>
    %507 = arith.mulf %506, %505 : vector<16x96xf32>
    %508 = math.tanh %507 : vector<16x96xf32>
    %cst_205 = arith.constant 1.000000e+00 : f32
    %509 = vector.broadcast %cst_205 : f32 to vector<16x96xf32>
    %510 = arith.addf %509, %508 : vector<16x96xf32>
    %511 = arith.mulf %500, %510 : vector<16x96xf32>
    %c1648 = arith.constant 1648 : index
    %c0_206 = arith.constant 0 : index
    %512 = vector.load %arg1[%c1648, %c0_206] : memref<2160x128xf32, #tpu.memory_space<vmem>>, vector<96x32xf32>
    %cst_207 = arith.constant dense<0.000000e+00> : vector<16x32xf32>
    %513 = tpu.matmul %511, %512, %cst_207 {dimension_numbers = #tpu.dot_dimension_numbers<[1], [0], [0], [1], [0, 0, 1, 1], [], []>} : vector<16x96xf32>, vector<96x32xf32>, vector<16x32xf32> -> vector<16x32xf32>
    %c1744 = arith.constant 1744 : index
    %c0_208 = arith.constant 0 : index
    %514 = vector.load %arg1[%c1744, %c0_208] : memref<2160x128xf32, #tpu.memory_space<vmem>>, vector<1x32xf32>
    %515 = vector.broadcast %514 : vector<1x32xf32> to vector<16x32xf32>
    %516 = arith.addf %513, %515 : vector<16x32xf32>
    %517 = arith.addf %468, %516 : vector<16x32xf32>
    %518 = vector.extract_strided_slice %517 {offsets = [0, 0], sizes = [8, 32], strides = [1, 1]} : vector<16x32xf32> to vector<8x32xf32>
    %c1752 = arith.constant 1752 : index
    %c0_209 = arith.constant 0 : index
    %519 = vector.load %arg1[%c1752, %c0_209] : memref<2160x128xf32, #tpu.memory_space<vmem>>, vector<32x32xf32>
    %cst_210 = arith.constant dense<0.000000e+00> : vector<8x32xf32>
    %520 = tpu.matmul %518, %519, %cst_210 {dimension_numbers = #tpu.dot_dimension_numbers<[1], [0], [0], [1], [0, 0, 1, 1], [], []>} : vector<8x32xf32>, vector<32x32xf32>, vector<8x32xf32> -> vector<8x32xf32>
    %521 = vector.extract_strided_slice %517 {offsets = [8, 0], sizes = [8, 32], strides = [1, 1]} : vector<16x32xf32> to vector<8x32xf32>
    %c1784 = arith.constant 1784 : index
    %c0_211 = arith.constant 0 : index
    %522 = vector.load %arg1[%c1784, %c0_211] : memref<2160x128xf32, #tpu.memory_space<vmem>>, vector<32x32xf32>
    %cst_212 = arith.constant dense<0.000000e+00> : vector<8x32xf32>
    %523 = tpu.matmul %521, %522, %cst_212 {dimension_numbers = #tpu.dot_dimension_numbers<[1], [0], [0], [1], [0, 0, 1, 1], [], []>} : vector<8x32xf32>, vector<32x32xf32>, vector<8x32xf32> -> vector<8x32xf32>
    %524 = arith.addf %520, %523 : vector<8x32xf32>
    %c1816 = arith.constant 1816 : index
    %c0_213 = arith.constant 0 : index
    %525 = vector.load %arg1[%c1816, %c0_213] : memref<2160x128xf32, #tpu.memory_space<vmem>>, vector<1x32xf32>
    %526 = vector.broadcast %525 : vector<1x32xf32> to vector<8x32xf32>
    %527 = arith.addf %524, %526 : vector<8x32xf32>
    %cst_214 = arith.constant 5.000000e-01 : f32
    %528 = vector.broadcast %cst_214 : f32 to vector<8x32xf32>
    %529 = arith.mulf %528, %527 : vector<8x32xf32>
    %cst_215 = arith.constant 4.471500e-02 : f32
    %530 = vector.broadcast %cst_215 : f32 to vector<8x32xf32>
    %531 = arith.mulf %530, %527 : vector<8x32xf32>
    %532 = arith.mulf %531, %527 : vector<8x32xf32>
    %533 = arith.mulf %532, %527 : vector<8x32xf32>
    %534 = arith.addf %527, %533 : vector<8x32xf32>
    %cst_216 = arith.constant 0.797884583 : f32
    %535 = vector.broadcast %cst_216 : f32 to vector<8x32xf32>
    %536 = arith.mulf %535, %534 : vector<8x32xf32>
    %537 = math.tanh %536 : vector<8x32xf32>
    %cst_217 = arith.constant 1.000000e+00 : f32
    %538 = vector.broadcast %cst_217 : f32 to vector<8x32xf32>
    %539 = arith.addf %538, %537 : vector<8x32xf32>
    %540 = arith.mulf %529, %539 : vector<8x32xf32>
    %c1824 = arith.constant 1824 : index
    %c0_218 = arith.constant 0 : index
    %541 = vector.load %arg1[%c1824, %c0_218] : memref<2160x128xf32, #tpu.memory_space<vmem>>, vector<2x32xf32>
    %542 = vector.extract_strided_slice %541 {offsets = [0, 0], sizes = [1, 32], strides = [1, 1]} : vector<2x32xf32> to vector<1x32xf32>
    %543 = vector.broadcast %542 : vector<1x32xf32> to vector<16x32xf32>
    %544 = arith.mulf %194, %543 : vector<16x32xf32>
    %cst_219 = arith.constant dense<0.000000e+00> : vector<16xf32>
    %545 = vector.multi_reduction <add>, %544, %cst_219 [1] : vector<16x32xf32> to vector<16xf32>
    %546 = vector.shape_cast %545 : vector<16xf32> to vector<16x1xf32>
    %547 = vector.extract_strided_slice %541 {offsets = [1, 0], sizes = [1, 1], strides = [1, 1]} : vector<2x32xf32> to vector<1x1xf32>
    %548 = vector.broadcast %547 : vector<1x1xf32> to vector<16x1xf32>
    %549 = arith.addf %546, %548 : vector<16x1xf32>
    %cst_220 = arith.constant 0.000000e+00 : f32
    %550 = vector.broadcast %cst_220 : f32 to vector<16x1xf32>
    %551 = arith.subf %550, %549 : vector<16x1xf32>
    %552 = math.exp %551 : vector<16x1xf32>
    %cst_221 = arith.constant 1.000000e+00 : f32
    %553 = vector.broadcast %cst_221 : f32 to vector<16x1xf32>
    %554 = arith.addf %553, %552 : vector<16x1xf32>
    %cst_222 = arith.constant 1.000000e+00 : f32
    %555 = vector.broadcast %cst_222 : f32 to vector<16x1xf32>
    %556 = arith.divf %555, %554 : vector<16x1xf32>
    %c1896 = arith.constant 1896 : index
    %c0_223 = arith.constant 0 : index
    %557 = vector.load %arg1[%c1896, %c0_223] : memref<2160x128xf32, #tpu.memory_space<vmem>>, vector<2x128xf32>
    %c1832 = arith.constant 1832 : index
    %c0_224 = arith.constant 0 : index
    %558 = vector.load %arg1[%c1832, %c0_224] : memref<2160x128xf32, #tpu.memory_space<vmem>>, vector<32x128xf32>
    %cst_225 = arith.constant dense<0.000000e+00> : vector<8x128xf32>
    %559 = tpu.matmul %540, %558, %cst_225 {dimension_numbers = #tpu.dot_dimension_numbers<[1], [0], [0], [1], [0, 0, 1, 1], [], []>} : vector<8x32xf32>, vector<32x128xf32>, vector<8x128xf32> -> vector<8x128xf32>
    %560 = vector.extract_strided_slice %557 {offsets = [0, 0], sizes = [1, 128], strides = [1, 1]} : vector<2x128xf32> to vector<1x128xf32>
    %561 = vector.broadcast %560 : vector<1x128xf32> to vector<8x128xf32>
    %562 = arith.addf %559, %561 : vector<8x128xf32>
    %c1864 = arith.constant 1864 : index
    %c0_226 = arith.constant 0 : index
    %563 = vector.load %arg1[%c1864, %c0_226] : memref<2160x128xf32, #tpu.memory_space<vmem>>, vector<32x128xf32>
    %cst_227 = arith.constant dense<0.000000e+00> : vector<8x128xf32>
    %564 = tpu.matmul %540, %563, %cst_227 {dimension_numbers = #tpu.dot_dimension_numbers<[1], [0], [0], [1], [0, 0, 1, 1], [], []>} : vector<8x32xf32>, vector<32x128xf32>, vector<8x128xf32> -> vector<8x128xf32>
    %565 = vector.extract_strided_slice %557 {offsets = [1, 0], sizes = [1, 128], strides = [1, 1]} : vector<2x128xf32> to vector<1x128xf32>
    %566 = vector.broadcast %565 : vector<1x128xf32> to vector<8x128xf32>
    %567 = arith.addf %564, %566 : vector<8x128xf32>
    %cst_228 = arith.constant dense<0xFF800000> : vector<8xf32>
    %568 = vector.multi_reduction <maximumf>, %562, %cst_228 [1] : vector<8x128xf32> to vector<8xf32>
    %569 = vector.shape_cast %568 : vector<8xf32> to vector<8x1xf32>
    %cst_229 = arith.constant dense<0xFF800000> : vector<8xf32>
    %570 = vector.multi_reduction <maximumf>, %567, %cst_229 [1] : vector<8x128xf32> to vector<8xf32>
    %571 = vector.shape_cast %570 : vector<8xf32> to vector<8x1xf32>
    %572 = arith.maximumf %569, %571 : vector<8x1xf32>
    %573 = vector.broadcast %572 : vector<8x1xf32> to vector<8x128xf32>
    %574 = arith.subf %562, %573 : vector<8x128xf32>
    %575 = math.exp %574 : vector<8x128xf32>
    %576 = vector.broadcast %572 : vector<8x1xf32> to vector<8x128xf32>
    %577 = arith.subf %567, %576 : vector<8x128xf32>
    %578 = math.exp %577 : vector<8x128xf32>
    %cst_230 = arith.constant dense<0.000000e+00> : vector<8xf32>
    %579 = vector.multi_reduction <add>, %575, %cst_230 [1] : vector<8x128xf32> to vector<8xf32>
    %580 = vector.shape_cast %579 : vector<8xf32> to vector<8x1xf32>
    %cst_231 = arith.constant dense<0.000000e+00> : vector<8xf32>
    %581 = vector.multi_reduction <add>, %578, %cst_231 [1] : vector<8x128xf32> to vector<8xf32>
    %582 = vector.shape_cast %581 : vector<8xf32> to vector<8x1xf32>
    %583 = arith.addf %580, %582 : vector<8x1xf32>
    %cst_232 = arith.constant 1.000000e+00 : f32
    %584 = vector.broadcast %cst_232 : f32 to vector<8x1xf32>
    %585 = arith.divf %584, %583 : vector<8x1xf32>
    %586 = vector.broadcast %585 : vector<8x1xf32> to vector<8x128xf32>
    %587 = arith.mulf %575, %586 : vector<8x128xf32>
    %588 = vector.broadcast %585 : vector<8x1xf32> to vector<8x128xf32>
    %589 = arith.mulf %578, %588 : vector<8x128xf32>
    %c1904 = arith.constant 1904 : index
    %c0_233 = arith.constant 0 : index
    %590 = vector.load %arg1[%c1904, %c0_233] : memref<2160x128xf32, #tpu.memory_space<vmem>>, vector<128x4xf32>
    %cst_234 = arith.constant dense<0.000000e+00> : vector<8x4xf32>
    %591 = tpu.matmul %587, %590, %cst_234 {dimension_numbers = #tpu.dot_dimension_numbers<[1], [0], [0], [1], [0, 0, 1, 1], [], []>} : vector<8x128xf32>, vector<128x4xf32>, vector<8x4xf32> -> vector<8x4xf32>
    %c2032 = arith.constant 2032 : index
    %c0_235 = arith.constant 0 : index
    %592 = vector.load %arg1[%c2032, %c0_235] : memref<2160x128xf32, #tpu.memory_space<vmem>>, vector<128x4xf32>
    %cst_236 = arith.constant dense<0.000000e+00> : vector<8x4xf32>
    %593 = tpu.matmul %589, %592, %cst_236 {dimension_numbers = #tpu.dot_dimension_numbers<[1], [0], [0], [1], [0, 0, 1, 1], [], []>} : vector<8x128xf32>, vector<128x4xf32>, vector<8x4xf32> -> vector<8x4xf32>
    %594 = arith.addf %591, %593 : vector<8x4xf32>
    %595 = vector.extract_strided_slice %594 {offsets = [0, 0], sizes = [8, 2], strides = [1, 1]} : vector<8x4xf32> to vector<8x2xf32>
    %596 = vector.extract_strided_slice %594 {offsets = [0, 2], sizes = [8, 2], strides = [1, 1]} : vector<8x4xf32> to vector<8x2xf32>
    %cst_237 = arith.constant dense<0.000000e+00> : vector<8xf32>
    %597 = vector.multi_reduction <add>, %595, %cst_237 [1] : vector<8x2xf32> to vector<8xf32>
    %598 = vector.shape_cast %597 : vector<8xf32> to vector<8x1xf32>
    %cst_238 = arith.constant 9.99999974E-6 : f32
    %599 = vector.broadcast %cst_238 : f32 to vector<8x1xf32>
    %600 = arith.addf %598, %599 : vector<8x1xf32>
    %601 = vector.broadcast %600 : vector<8x1xf32> to vector<8x2xf32>
    %602 = arith.divf %595, %601 : vector<8x2xf32>
    %cst_239 = arith.constant dense<0.000000e+00> : vector<8xf32>
    %603 = vector.multi_reduction <add>, %596, %cst_239 [1] : vector<8x2xf32> to vector<8xf32>
    %604 = vector.shape_cast %603 : vector<8xf32> to vector<8x1xf32>
    %cst_240 = arith.constant 9.99999974E-6 : f32
    %605 = vector.broadcast %cst_240 : f32 to vector<8x1xf32>
    %606 = arith.addf %604, %605 : vector<8x1xf32>
    %607 = vector.broadcast %606 : vector<8x1xf32> to vector<8x2xf32>
    %608 = arith.divf %596, %607 : vector<8x2xf32>
    %cst_241 = arith.constant 0.000000e+00 : f32
    %609 = vector.broadcast %cst_241 : f32 to vector<8x128xf32>
    %c0_242 = arith.constant 0 : index
    %c0_243 = arith.constant 0 : index
    %610 = vector.load %arg2[%c0_242, %c0_243] : memref<8x128xf32, #tpu.memory_space<vmem>>, vector<8x128xf32>
    tpu.vector_store %arg2[%c0_242, %c0_243], %609 {strides = array<i32>} : memref<8x128xf32, #tpu.memory_space<vmem>>, vector<8x128xf32>,
    %c0_244 = arith.constant 0 : index
    %c0_245 = arith.constant 0 : index
    %611 = vector.load %arg2[%c0_244, %c0_245] : memref<8x128xf32, #tpu.memory_space<vmem>>, vector<8x2xf32>
    tpu.vector_store %arg2[%c0_244, %c0_245], %602 {strides = array<i32>} : memref<8x128xf32, #tpu.memory_space<vmem>>, vector<8x2xf32>,
    %c0_246 = arith.constant 0 : index
    %c2 = arith.constant 2 : index
    %612 = vector.load %arg2[%c0_246, %c2] : memref<8x128xf32, #tpu.memory_space<vmem>>, vector<8x2xf32>
    tpu.vector_store %arg2[%c0_246, %c2], %608 {strides = array<i32>} : memref<8x128xf32, #tpu.memory_space<vmem>>, vector<8x2xf32>,
    %613 = vector.extract_strided_slice %556 {offsets = [0, 0], sizes = [8, 1], strides = [1, 1]} : vector<16x1xf32> to vector<8x1xf32>
    %c0_247 = arith.constant 0 : index
    %c4 = arith.constant 4 : index
    %614 = vector.load %arg2[%c0_247, %c4] : memref<8x128xf32, #tpu.memory_space<vmem>>, vector<8x1xf32>
    tpu.vector_store %arg2[%c0_247, %c4], %613 {strides = array<i32>} : memref<8x128xf32, #tpu.memory_space<vmem>>, vector<8x1xf32>,
    %615 = vector.extract_strided_slice %556 {offsets = [8, 0], sizes = [8, 1], strides = [1, 1]} : vector<16x1xf32> to vector<8x1xf32>
    %c0_248 = arith.constant 0 : index
    %c5 = arith.constant 5 : index
    %616 = vector.load %arg2[%c0_248, %c5] : memref<8x128xf32, #tpu.memory_space<vmem>>, vector<8x1xf32>
    tpu.vector_store %arg2[%c0_248, %c5], %615 {strides = array<i32>} : memref<8x128xf32, #tpu.memory_space<vmem>>, vector<8x1xf32>,
    return
  }
}

</mosaic_0001>

<bundles_post_ra>
// kernel: vap_gpt_forward.1
= control target key start
LH: loop header
LB: loop body
LE: loop exit
PB: predicated region body
PF: predicated region fallthrough
CT: control target
= control target key end

     0   :  { %7 = vsyncpa [#allocation3], 0  ;;  %s9705_s9 = smov [#allocation2]   ;;  %s10330_s0 = inlined_call_operand.vmem [shape: f32[16,32], index: 0, kind: input, shape index: {}]   ;;  %s10331_s1 = inlined_call_operand.hbm [shape: f32[2160,128], index: 1, kind: input, shape index: {}]   ;;  %s10332_s2 = inlined_call_operand.vmem [shape: f32[8,128], index: 2, kind: output, shape index: {}]  }
   0x1   :  { %s15_s10 = sshll.u32 %s9705_s9, 4  ;;  %s9681_s13 = scalar_lea.hbm %s10331_s1, 34560  ;;  %s16_s10 = int_to_ptr.vmem [resolvable:$true] %s15_s10 }
   0x2   :  { %p9682_p0 = scmp.ne.s32.totalorder %s10331_s1, %s9681_s13  ;;  %p9685_p1 = scmp.lt.u32.totalorder %s9681_s13, %s10331_s1 }
   0x4   :  { %p9687_p2 = pnand %p9685_p1, %p9682_p0 }
   0x6   :  { %9690 = shalt.err (!%p9687_p2)
}
   0x7   :  { %s9691_s18 = scalar_lea.vmem %s16_s10, 34560  ;;  %p9696_p4 = scmp.lt.s32.totalorder %s16_s10, %s16_s10 }
   0x8   :  { %p9692_p3 = scmp.ne.s32.totalorder %s16_s10, %s9691_s18  ;;  %p9697_p5 = scmp.lt.s32.totalorder %s9691_s18, %s9691_s18 }
   0xa   :  { %p9698_p6 = por %p9697_p5, %p9696_p4 }
   0xc   :  { %p9699_p7 = pnand %p9698_p6, %p9692_p3 }
   0xe   :  { %9702 = shalt.err (!%p9699_p7)
}
   0xf   :  { %s9706_s19 = smov 128   ;;  %s9707_s20 = smov 8  }
  0x10   :  { %21 = dma.hbm_to_vmem [thread:$0]  %s10331_s1, 34560, %s16_s10, [#allocation3], %s9706_s19, %s9706_s19, %s9707_s20  }
  0x11   :  { %9703 = dma.done.wait [#allocation3], 34560  }
  0x12   :  { %9704 = vsyncadd [#allocation3], 4294932736  ;;  %vm44_vm0 = vcmask 261120   ;;  %v9744_v0 = vld [vmem:[%s10330_s0] sm:$0xff]  ;;  %v9749_v1 = vld [vmem:[%s10330_s0 + $0x8] sm:$0xff]  ;;  %v72_v31 = vlaneseq  ;;  %vm336_vm1 = vcmask 64512  }
  0x13   :  { %v45_v2 = vsel %vm44_vm0, %v9744_v0, 0.0  ;;  %v48_v3 = vsel %vm44_vm0, %v9749_v1, 0.0  ;;  %v85_v14 = vld [vmem:[#allocation2 + $0x88] sm:$0xff]  ;;  %v86_v15 = vld [vmem:[#allocation2 + $0x90] sm:$0xff]  ;;  %v87_v20 = vld [vmem:[#allocation2 + $0x98] sm:$0xff]  ;;  %vm424_vm3 = vcmask 130048  }
  0x14   :  { %46 = vadd.xlane.f32.xlu0 %v45_v2  ;;  %v8957_v16 = vpack.c.bf16 %v86_v15, %v85_v14  ;;  %v174_v17 = vld [vmem:[#allocation2 + $0xa8] sm:$0xff]  ;;  %v175_v18 = vld [vmem:[#allocation2 + $0xb0] sm:$0xff]  ;;  %v88_v21 = vld [vmem:[#allocation2 + $0xa0] sm:$0xff]  ;;  %v9759_v35 = vshrl.u32 %v72_v31, 7  ;;  %vm2338_vm4 = vcmask 785408   ;;  %vm9709_vm5 = vmmov 0  }
  0x15   :  { %v8965_v19 = vpack.c.bf16 %v175_v18, %v174_v17  ;;  %v8961_v22 = vpack.c.bf16 %v88_v21, %v87_v20  ;;  %v176_v23 = vld [vmem:[#allocation2 + $0xb8] sm:$0xff]  ;;  %v177_v24 = vld [vmem:[#allocation2 + $0xc0] sm:$0xff]  ;;  %v257_v26 = vld [vmem:[#allocation2 + $0xc8] sm:$0xff]  ;;  %vm7475_vm6 = vcmask 15360   ;;  %s9711_s27 = smov 126   ;;  %s9712_s28 = smov 5  }
  0x16   :  { %8958 = vmatprep.subr.bf16.mxu0 %v8957_v16  ;;  %v8969_v25 = vpack.c.bf16 %v177_v24, %v176_v23  ;;  %v258_v27 = vld [vmem:[#allocation2 + $0xd0] sm:$0xff]  ;;  %v9762_v37 = vsub.s32 0, %v9759_v35  ;;  %v43_v38 = vld [vmem:[#allocation2 + $0x80] sm:$0x3]  ;;  %v9765_v39 = vsub.s32 1, %v9759_v35  ;;  %v259_v48 = vld [vmem:[#allocation2 + $0xd8] sm:$0xff] }
  0x17   :  { %8960 = vmatpush3.bf16.msra.mxu0 %v8957_v16  ;;  %8966 = vmatprep.subr.bf16.mxu1 %v8965_v19  ;;  %v8973_v28 = vpack.c.bf16 %v258_v27, %v257_v26  ;;  %v260_v49 = vld [vmem:[#allocation2 + $0xe0] sm:$0xff]  ;;  %v612_v53 = vld [vmem:[#allocation2 + $0x110] sm:$0xff]  ;;  %v613_v54 = vld [vmem:[#allocation2 + $0x118] sm:$0xff]  ;;  %v9790_v59 = vsub.s32 4, %v9759_v35  ;;  %s9713_s29 = smov 4   ;;  %vm7494_vm7 = vcmask 31760  }
  0x18   :  { %49 = vadd.xlane.f32.xlu0 %v48_v3  ;;  %8968 = vmatpush3.bf16.msra.mxu1 %v8965_v19  ;;  %v75_v40 = vrot.slane %v43_v38, %v9762_v37  ;;  %v81_v42 = vrot.slane %v43_v38, %v9765_v39  ;;  %v8977_v52 = vpack.c.bf16 %v260_v49, %v259_v48  ;;  %v614_v56 = vld [vmem:[#allocation2 + $0x120] sm:$0xff]  ;;  %v615_v57 = vld [vmem:[#allocation2 + $0x128] sm:$0xff]  ;;  %vm9800_vm2 = vmpackc.low %vm336_vm1, %vm336_vm1  ;;  %vm7500_vm8 = vcmask 39968  }
  0x19   :  { %8962 = vmatprep.subr.bf16.mxu0 %v8961_v22  ;;  %8970 = vmatprep.subr.bf16.mxu1 %v8969_v25  ;;  %v8999_v55 = vpack.c.bf16 %v613_v54, %v612_v53  ;;  %v9003_v58 = vpack.c.bf16 %v615_v57, %v614_v56  ;;  %v9792_v60 = vld [vmem:[#allocation2 + $0x228] sm:$0xff]  ;;  %v531_v49 = vld [vmem:[#allocation2 + $0x100] sm:$0xff]  ;;  %v695_v56 = vld [vmem:[#allocation2 + $0x130] sm:$0xff]  ;;  %vm7506_vm9 = vcmask 48168  }
  0x1a   :  { %v181_v61 = vrot.slane %v9792_v60, %v9790_v59  ;;  %v92_v62 = vrot.slane %v9792_v60, %v9762_v37  ;;  %v26_v21 = vld [vmem:[#allocation2 + $0x8] sm:$0xff]  ;;  %v696_v57 = vld [vmem:[#allocation2 + $0x138] sm:$0xff] }
  0x1b   :  { %8964 = vmatpush3.bf16.msra.mxu0 %v8961_v22  ;;  %v25_v22 = vld [vmem:[#allocation2] sm:$0xff] }
  0x1c   :  { %8972 = vmatpush3.bf16.msra.mxu1 %v8969_v25  ;;  %8974 = vmatprep.subr.bf16.mxu0 %v8973_v28 }
  0xa1   :  { %v47_v4 = vpop.xlane.xlu0 %46 }
  0xa2   :  { %v52_v5 = vmul.f32 0.03125, %v47_v4 }
  0xa4   :  { %v54_v6 = vsub.f32 %v9744_v0, %v52_v5 }
  0xa5   :  { %v50_v7 = vpop.xlane.xlu0 %49 }
  0xa6   :  { %v53_v8 = vmul.f32 0.03125, %v50_v7  ;;  %v56_v9 = vmul.f32 %v54_v6, %v54_v6 }
  0xa8   :  { %v55_v10 = vsub.f32 %v9749_v1, %v53_v8  ;;  %v58_v11 = vsel %vm44_vm0, %v56_v9, 0.0 }
  0xa9   :  { %59 = vadd.xlane.f32.xlu1 %v58_v11 }
  0xaa   :  { %v57_v12 = vmul.f32 %v55_v10, %v55_v10 }
  0xac   :  { %v61_v13 = vsel %vm44_vm0, %v57_v12, 0.0  ;;  %v9810_v12 = vsub.s32 5, %v9759_v35 }
  0xad   :  { %62 = vadd.xlane.f32.xlu1 %v61_v13 }
  0xae   :  { %v619_v15 = vrot.slane %v9792_v60, %v9810_v12 }
 0x136   :  { %v60_v29 = vpop.xlane.xlu1 %59 }
 0x137   :  { %v64_v30 = vmul.f32 0.03125, %v60_v29 }
 0x139   :  { %v66_v32 = vadd.f32 1e-05, %v64_v30 }
 0x13a   :  { %v63_v33 = vpop.xlane.xlu1 %62 }
 0x13b   :  { %9529 = vrsqrt.f32 %v66_v32  ;;  %v65_v34 = vmul.f32 0.03125, %v63_v33 }
 0x13d   :  { %v67_v36 = vadd.f32 1e-05, %v65_v34 }
 0x13f   :  { %9531 = vrsqrt.f32 %v67_v36 }
 0x145   :  { %v9530_v41 = vpop.eup %9529 }
 0x146   :  { %v70_v43 = vmul.f32 %v9530_v41, %v54_v6 }
 0x148   :  { %v76_v44 = vmul.f32 %v75_v40, %v70_v43  ;;  %v530_v43 = vld [vmem:[#allocation2 + $0xf8] sm:$0xff] }
 0x149   :  { %v9532_v45 = vpop.eup %9531 }
 0x14a   :  { %v9769_v46 = vadd.f32 %v81_v42, %v76_v44  ;;  %v71_v47 = vmul.f32 %v9532_v45, %v55_v10 }
 0x14c   :  { %v77_v50 = vmul.f32 %v75_v40, %v71_v47  ;;  %8151 = vmatprep.mubr.msk.f32.mxu0 %vm44_vm0, %v9769_v46  ;;  %8162 = vmatprep.mubr.msk.f32.mxu1 %vm44_vm0, %v9769_v46 }
 0x14e   :  { %v9775_v51 = vadd.f32 %v81_v42, %v77_v50  ;;  %v529_v42 = vld [vmem:[#allocation2 + $0xf0] sm:$0xff]  ;;  %v532_v50 = vld [vmem:[#allocation2 + $0x108] sm:$0xff] }
 0x14f   :  { %v8991_v44 = vpack.c.bf16 %v530_v43, %v529_v42  ;;  %v1129_v42 = vld [vmem:[#allocation2 + $0x168] sm:$0xff]  ;;  %v1130_v43 = vld [vmem:[#allocation2 + $0x170] sm:$0xff] }
 0x150   :  { %8152 = vmatmul.mubr.msk.f32.vlgmr.msra.gmra.mrb[0].mxu0 %vm44_vm0, %v9775_v51  ;;  %8163 = vmatmul.mubr.msk.f32.vlgmr.msra.gmra.mrb[0].mxu1 %vm44_vm0, %v9775_v51 }
 0x151   :  { %8976 = vmatpush3.bf16.msra.mxu0 %v8973_v28  ;;  %8173 = vmatprep.mubr.msk.f32.mxu0 %vm44_vm0, %v9769_v46 }
 0x152   :  { %8978 = vmatprep.subr.bf16.mxu0 %v8977_v52 }
 0x155   :  { %8980 = vmatpush3.bf16.msra.mxu0 %v8977_v52 }
 0x156   :  { %9000 = vmatprep.subr.bf16.mxu0 %v8999_v55 }
 0x158   :  { %8174 = vmatmul.mubr.msk.f32.vlgmr.msra.gmra.mrb[2].mxu0 %vm44_vm0, %v9775_v51 }
 0x159   :  { %9002 = vmatpush3.bf16.msra.mxu0 %v8999_v55  ;;  %8209 = vmatprep.mubr.msk.f32.mxu0 %vm44_vm0, %v9769_v46  ;;  %v8995_v55 = vpack.c.bf16 %v532_v50, %v531_v49  ;;  %v1293_v49 = vld [vmem:[#allocation2 + $0x198] sm:$0xff]  ;;  %v1294_v50 = vld [vmem:[#allocation2 + $0x1a0] sm:$0xff] }
 0x15a   :  { %9004 = vmatprep.subr.bf16.mxu0 %v9003_v58 }
 0x15d   :  { %9006 = vmatpush3.bf16.msra.mxu0 %v9003_v58  ;;  %v9007_v58 = vpack.c.bf16 %v696_v57, %v695_v56  ;;  %v528_v56 = vld [vmem:[#allocation2 + $0xe8] sm:$0xff]  ;;  %v1210_v57 = vld [vmem:[#allocation2 + $0x178] sm:$0xff] }
 0x160   :  { %8210 = vmatmul.mubr.msk.f32.vlgmr.msra.gmra.mrb[4].mxu0 %vm44_vm0, %v9775_v51 }
 0x223   :  { %v8153_v63 = vpop.f32.mrb[0].mxu0  ;;  %v8164_v2 = vpop.f32.mrb[0].mxu1 }
 0x224   :  { %v254_v3 = vadd.f32 %v8164_v2, %v181_v61  ;;  %v165_v4 = vpop.f32.mrb[1].mxu0  ;;  %v248_v5 = vpop.f32.mrb[1].mxu1  ;;  %v171_v14 = vadd.f32 %v8153_v63, %v92_v62 }
 0x225   :  { %v166_v6 = vadd.f32 %v165_v4, %v92_v62  ;;  %v249_v7 = vadd.f32 %v248_v5, %v181_v61  ;;  %v697_v61 = vld [vmem:[#allocation2 + $0x140] sm:$0xff]  ;;  %v698_v62 = vld [vmem:[#allocation2 + $0x148] sm:$0xff]  ;;  %v536_v4 = vrot.slane %v9792_v60, %v9765_v39 }
 0x226   :  { %v9011_v63 = vpack.c.bf16 %v698_v62, %v697_v61 }
 0x227   :  { %v8981_v9 = vpack.c.bf16 %v254_v3, %v249_v7  ;;  %8180 = vmatprep.mubr.msk.f32.mxu1 %vm336_vm1, %v166_v6 }
 0x229   :  { %8983 = vmatprep.subr.msk.bf16.mxu1 %vm9800_vm2, %v8981_v9 }
 0x22a   :  { %8986 = vmatpush3.bf16.xpose.msk.msra.mxu1 %vm9800_vm2, %v8981_v9 }
 0x22b   :  { %v8175_v10 = vpop.f32.mrb[2].mxu0 }
 0x22c   :  { %v327_v11 = vpop.f32.mrb[3].mxu0 }
 0x22d   :  { %v8987_v13 = vpack.c.bf16 %v8175_v10, %v327_v11 }
 0x22f   :  { %8988 = vmatprep.subr.bf16.mxu1 %v8987_v13 }
 0x231   :  { %8181 = vmatmul.mubr.msk.f32.vlgmr.msra.gmra.mrb[2].mxu1 %vm336_vm1, %v171_v14  ;;  %v28_v14 = vld [vmem:[#allocation2 + $0x18] sm:$0xff] }
 0x232   :  { %8990 = vmatpush3.bf16.msra.mxu1 %v8987_v13 }
 0x233   :  { %v8211_v16 = vpop.f32.mrb[4].mxu0  ;;  %8992 = vmatprep.subr.bf16.mxu1 %v8991_v44 }
 0x234   :  { %v692_v17 = vadd.f32 %v8211_v16, %v619_v15  ;;  %v686_v18 = vpop.f32.mrb[5].mxu0 }
 0x235   :  { %v687_v19 = vadd.f32 %v686_v18, %v619_v15  ;;  %v27_v15 = vld [vmem:[#allocation2 + $0x10] sm:$0xff] }
 0x237   :  { %v9015_v20 = vpack.c.bf16 %v692_v17, %v687_v19 }
 0x239   :  { %9017 = vmatprep.subr.msk.bf16.mxu0 %vm9800_vm2, %v9015_v20 }
 0x23a   :  { %9020 = vmatpush3.bf16.xpose.msk.msra.mxu0 %vm9800_vm2, %v9015_v20 }
 0x304   :  { %v8182_v23 = vpop.f32.mrb[2].mxu1 }
 0x305   :  { %v421_v24 = vadd.f32 %v8182_v23, %v26_v21  ;;  %v415_v25 = vpop.f32.mrb[3].mxu1 }
 0x306   :  { %v416_v26 = vadd.f32 %v415_v25, %v25_v22 }
 0x307   :  { %v428_v27 = vsel %vm424_vm3, %v421_v24, -inf }
 0x308   :  { %429 = vmax.xlane.f32.xlu1 %v428_v27  ;;  %v425_v28 = vsel %vm424_vm3, %v416_v26, -inf }
 0x309   :  { %426 = vmax.xlane.f32.xlu0 %v425_v28 }
 0x395   :  { %v430_v29 = vpop.xlane.xlu1 %429 }
 0x396   :  { %v432_v30 = vsub.f32 %v421_v24, %v430_v29  ;;  %v427_v31 = vpop.xlane.xlu0 %426 }
 0x397   :  { %v431_v32 = vsub.f32 %v416_v26, %v427_v31 }
 0x398   :  { %v435_v33 = vmul.f32 1.442695, %v432_v30 }
 0x399   :  { %v433_v34 = vmul.f32 1.442695, %v431_v32  ;;  %v1127_v32 = vld [vmem:[#allocation2 + $0x158] sm:$0xff] }
 0x39a   :  { %9533 = vpow2.f32 %v435_v33  ;;  %v1128_v33 = vld [vmem:[#allocation2 + $0x160] sm:$0xff] }
 0x39b   :  { %9535 = vpow2.f32 %v433_v34  ;;  %v9025_v34 = vpack.c.bf16 %v1128_v33, %v1127_v32 }
 0x3a4   :  { %v9534_v36 = vpop.eup %9533 }
 0x3a5   :  { %v9536_v38 = vpop.eup %9535  ;;  %v440_v40 = vsel %vm424_vm3, %v9534_v36, 0.0 }
 0x3a6   :  { %441 = vadd.xlane.f32.xlu1 %v440_v40  ;;  %v437_v41 = vsel %vm424_vm3, %v9536_v38, 0.0 }
 0x3a7   :  { %438 = vadd.xlane.f32.xlu0 %v437_v41 }
 0x433   :  { %v442_v45 = vpop.xlane.xlu1 %441 }
 0x434   :  { %9537 = vrcp.f32 %v442_v45  ;;  %v439_v47 = vpop.xlane.xlu0 %438 }
 0x435   :  { %9539 = vrcp.f32 %v439_v47 }
 0x43e   :  { %v9538_v48 = vpop.eup %9537 }
 0x43f   :  { %v9540_v52 = vpop.eup %9539  ;;  %v446_v54 = vmul.f32 %v9538_v48, %v9534_v36  ;;  %v964_v36 = vld [vmem:[#allocation2 + $0x150] sm:$0xff]  ;;  %v9029_v48 = vpack.c.bf16 %v1130_v43, %v1129_v42 }
 0x440   :  { %v444_v53 = vmul.f32 %v9540_v52, %v9536_v38  ;;  %8237 = vmatprep.subr.mxu0 %v964_v36  ;;  %v9041_v52 = vpack.c.bf16 %v1294_v50, %v1293_v49 }
 0x442   :  { %8187 = vmatprep.mubr.msk.f32.mxu1 %vm424_vm3, %v444_v53  ;;  %v1295_v53 = vld [vmem:[#allocation2 + $0x1a8] sm:$0xff] }
 0x443   :  { %8188 = vmatmul.mubr.msk.f32.vlgmr.msra.gmra.mrb[4].mxu1 %vm424_vm3, %v446_v54  ;;  %v1296_v54 = vld [vmem:[#allocation2 + $0x1b0] sm:$0xff] }
 0x444   :  { %8994 = vmatpush3.bf16.msra.mxu1 %v8991_v44  ;;  %8198 = vmatprep.mubr.msk.f32.mxu1 %vm44_vm0, %v9769_v46 }
 0x445   :  { %8996 = vmatprep.subr.bf16.mxu1 %v8995_v55 }
 0x448   :  { %8998 = vmatpush3.bf16.msra.mxu1 %v8995_v55  ;;  %v9045_v55 = vpack.c.bf16 %v1296_v54, %v1295_v53  ;;  %v1648_v53 = vld [vmem:[#allocation2 + $0x1d0] sm:$0xff]  ;;  %v1649_v54 = vld [vmem:[#allocation2 + $0x1d8] sm:$0xff] }
 0x449   :  { %9008 = vmatprep.subr.bf16.mxu1 %v9007_v58 }
 0x44b   :  { %8199 = vmatmul.mubr.msk.f32.vlgmr.msra.gmra.mrb[6].mxu1 %vm44_vm0, %v9775_v51 }
 0x44c   :  { %9010 = vmatpush3.bf16.msra.mxu1 %v9007_v58  ;;  %8220 = vmatprep.mubr.msk.f32.mxu1 %vm44_vm0, %v9769_v46  ;;  %v1211_v58 = vld [vmem:[#allocation2 + $0x180] sm:$0xff] }
 0x44d   :  { %9012 = vmatprep.subr.bf16.mxu1 %v9011_v63 }
 0x450   :  { %9014 = vmatpush3.bf16.msra.mxu1 %v9011_v63  ;;  %v9856_v63 = vsub.s32 2, %v9759_v35 }
 0x453   :  { %8221 = vmatmul.mubr.msk.f32.vlgmr.msra.gmra.mrb[8].mxu1 %vm44_vm0, %v9775_v51 }
 0x516   :  { %v9833_v2 = vpop.f32.mrb[4].mxu1 }
 0x517   :  { %v9835_v3 = vpop.f32.mrb[5].mxu1 }
 0x51e   :  { %v8200_v5 = vpop.f32.mrb[6].mxu1 }
 0x51f   :  { %v603_v6 = vpop.f32.mrb[7].mxu1  ;;  %v609_v9 = vadd.f32 %v8200_v5, %v536_v4  ;;  %v1134_v5 = vrot.slane %v9792_v60, %v9856_v63 }
 0x520   :  { %v604_v7 = vadd.f32 %v603_v6, %v536_v4  ;;  %v9033_v4 = vpack.c.bf16 %v1211_v58, %v1210_v57  ;;  %v1212_v6 = vld [vmem:[#allocation2 + $0x188] sm:$0xff]  ;;  %v9063_v58 = vpack.c.bf16 %v1649_v54, %v1648_v53 }
 0x522   :  { %8227 = vmatprep.mubr.msk.f32.mxu0 %vm336_vm1, %v604_v7  ;;  %v1213_v7 = vld [vmem:[#allocation2 + $0x190] sm:$0xff] }
 0x523   :  { %8228 = vmatmul.mubr.msk.f32.vlgmr.msra.gmra.mrb[6].mxu0 %vm336_vm1, %v609_v9 }
 0x524   :  { %8238 = vmatpush3.msra.mxu0 %v964_v36 }
 0x525   :  { %8242 = vmatprep.subr.mxu0 %v528_v56 }
 0x526   :  { %v8222_v10 = vpop.f32.mrb[8].mxu1 }
 0x527   :  { %v765_v11 = vpop.f32.mrb[9].mxu1 }
 0x528   :  { %v9021_v13 = vpack.c.bf16 %v8222_v10, %v765_v11 }
 0x52a   :  { %9022 = vmatprep.subr.bf16.mxu1 %v9021_v13 }
 0x52b   :  { %9024 = vmatpush3.bf16.msra.mxu1 %v9021_v13  ;;  %v9037_v13 = vpack.c.bf16 %v1213_v7, %v1212_v6  ;;  %v1815_v6 = vld [vmem:[#allocation2 + $0x218] sm:$0xff] }
 0x52c   :  { %9026 = vmatprep.subr.bf16.mxu1 %v9025_v34 }
 0x5f6   :  { %v8229_v16 = vpop.f32.mrb[6].mxu0 }
 0x5f7   :  { %v858_v17 = vadd.f32 %v8229_v16, %v28_v14  ;;  %v852_v18 = vpop.f32.mrb[7].mxu0 }
 0x5f8   :  { %v853_v19 = vadd.f32 %v852_v18, %v27_v15 }
 0x5f9   :  { %v864_v20 = vsel %vm424_vm3, %v858_v17, -inf }
 0x5fa   :  { %865 = vmax.xlane.f32.xlu1 %v864_v20  ;;  %v861_v21 = vsel %vm424_vm3, %v853_v19, -inf }
 0x5fb   :  { %862 = vmax.xlane.f32.xlu0 %v861_v21 }
 0x687   :  { %v866_v22 = vpop.xlane.xlu1 %865 }
 0x688   :  { %v868_v23 = vsub.f32 %v858_v17, %v866_v22  ;;  %v863_v24 = vpop.xlane.xlu0 %862  ;;  %v9872_v17 = vsub.s32 6, %v9759_v35 }
 0x689   :  { %v867_v25 = vsub.f32 %v853_v19, %v863_v24  ;;  %v29_v24 = vld [vmem:[#allocation2 + $0x20] sm:$0xff] }
 0x68a   :  { %v871_v26 = vmul.f32 1.442695, %v868_v23  ;;  %v30_v23 = vld [vmem:[#allocation2 + $0x28] sm:$0xff] }
 0x68b   :  { %v869_v27 = vmul.f32 1.442695, %v867_v25 }
 0x68c   :  { %9541 = vpow2.f32 %v871_v26 }
 0x68d   :  { %9543 = vpow2.f32 %v869_v27 }
 0x696   :  { %v9542_v28 = vpop.eup %9541 }
 0x697   :  { %v9544_v29 = vpop.eup %9543  ;;  %v876_v30 = vsel %vm424_vm3, %v9542_v28, 0.0 }
 0x698   :  { %877 = vadd.xlane.f32.xlu1 %v876_v30  ;;  %v873_v31 = vsel %vm424_vm3, %v9544_v29, 0.0 }
 0x699   :  { %874 = vadd.xlane.f32.xlu0 %v873_v31 }
 0x725   :  { %v878_v38 = vpop.xlane.xlu1 %877 }
 0x726   :  { %9545 = vrcp.f32 %v878_v38  ;;  %v875_v40 = vpop.xlane.xlu0 %874 }
 0x727   :  { %9547 = vrcp.f32 %v875_v40 }
 0x730   :  { %v9546_v41 = vpop.eup %9545 }
 0x731   :  { %v9548_v44 = vpop.eup %9547  ;;  %v882_v47 = vmul.f32 %v9546_v41, %v9542_v28 }
 0x732   :  { %v880_v45 = vmul.f32 %v9548_v44, %v9544_v29  ;;  %v1646_v44 = vld [vmem:[#allocation2 + $0x1c0] sm:$0xff] }
 0x734   :  { %8234 = vmatprep.mubr.msk.f32.mxu1 %vm424_vm3, %v880_v45  ;;  %v1647_v45 = vld [vmem:[#allocation2 + $0x1c8] sm:$0xff] }
 0x735   :  { %8235 = vmatmul.mubr.msk.f32.vlgmr.msra.gmra.mrb[10].mxu1 %vm424_vm3, %v882_v47  ;;  %v9059_v47 = vpack.c.bf16 %v1647_v45, %v1646_v44 }
 0x736   :  { %9028 = vmatpush3.bf16.msra.mxu1 %v9025_v34  ;;  %8255 = vmatprep.mubr.msk.f32.mxu1 %vm44_vm0, %v9769_v46 }
 0x737   :  { %9030 = vmatprep.subr.bf16.mxu1 %v9029_v48 }
 0x73a   :  { %9032 = vmatpush3.bf16.msra.mxu1 %v9029_v48  ;;  %v1562_v48 = vld [vmem:[#allocation2 + $0x1b8] sm:$0xff] }
 0x73b   :  { %9042 = vmatprep.subr.bf16.mxu1 %v9041_v52 }
 0x73d   :  { %8256 = vmatmul.mubr.msk.f32.vlgmr.msra.gmra.mrb[12].mxu1 %vm44_vm0, %v9775_v51 }
 0x73e   :  { %9044 = vmatpush3.bf16.msra.mxu1 %v9041_v52  ;;  %8277 = vmatprep.mubr.msk.f32.mxu1 %vm44_vm0, %v9769_v46 }
 0x73f   :  { %9046 = vmatprep.subr.bf16.mxu1 %v9045_v55 }
 0x742   :  { %9048 = vmatpush3.bf16.msra.mxu1 %v9045_v55 }
 0x745   :  { %8278 = vmatmul.mubr.msk.f32.vlgmr.msra.gmra.mrb[14].mxu1 %vm44_vm0, %v9775_v51 }
 0x808   :  { %v8236_v61 = vpop.f32.mrb[10].mxu1 }
 0x809   :  { %v955_v62 = vpop.f32.mrb[11].mxu1 }
 0x80a   :  { %8239 = vmatprep.mubr.msk.f32.mxu0 %vm336_vm1, %v955_v62  ;;  %v1813_v62 = vld [vmem:[#allocation2 + $0x208] sm:$0xff] }
 0x80b   :  { %8240 = vmatmul.mubr.msk.f32.vlgmr.msra.gmra.mrb[8].mxu0 %vm336_vm1, %v8236_v61  ;;  %v1812_v61 = vld [vmem:[#allocation2 + $0x200] sm:$0xff] }
 0x80c   :  { %8243 = vmatpush3.msra.mxu0 %v528_v56  ;;  %8244 = vmatprep.mubr.msk.f32.mxu0 %vm336_vm1, %v9835_v3 }
 0x80d   :  { %9034 = vmatprep.subr.bf16.mxu0 %v9033_v4 }
 0x810   :  { %v8257_v9 = vpop.f32.mrb[12].mxu1 }
 0x811   :  { %v1207_v10 = vadd.f32 %v8257_v9, %v1134_v5  ;;  %v1201_v11 = vpop.f32.mrb[13].mxu1  ;;  %v1729_v9 = vld [vmem:[#allocation2 + $0x1e0] sm:$0xff] }
 0x812   :  { %v1202_v15 = vadd.f32 %v1201_v11, %v1134_v5  ;;  %v1814_v5 = vld [vmem:[#allocation2 + $0x210] sm:$0xff] }
 0x813   :  { %8245 = vmatmul.mubr.msk.f32.vlgmr.msra.gmra.mrb[8].mxu0 %vm336_vm1, %v9833_v2  ;;  %v1217_v2 = vrot.slane %v9792_v60, %v9872_v17  ;;  %v9079_v7 = vpack.c.bf16 %v1815_v6, %v1814_v5 }
 0x814   :  { %9036 = vmatpush3.bf16.msra.mxu0 %v9033_v4  ;;  %8266 = vmatprep.mubr.msk.f32.mxu0 %vm44_vm0, %v9769_v46  ;;  %v9075_v4 = vpack.c.bf16 %v1813_v62, %v1812_v61 }
 0x815   :  { %9038 = vmatprep.subr.bf16.mxu0 %v9037_v13 }
 0x818   :  { %9040 = vmatpush3.bf16.msra.mxu0 %v9037_v13  ;;  %v8279_v3 = vpop.f32.mrb[14].mxu1  ;;  %v1731_v13 = vld [vmem:[#allocation2 + $0x1f0] sm:$0xff] }
 0x819   :  { %v1363_v14 = vpop.f32.mrb[15].mxu1 }
 0x81a   :  { %v9055_v16 = vpack.c.bf16 %v8279_v3, %v1363_v14  ;;  %v1732_v3 = vld [vmem:[#allocation2 + $0x1f8] sm:$0xff] }
 0x81b   :  { %8267 = vmatmul.mubr.msk.f32.vlgmr.msra.gmra.mrb[10].mxu0 %vm44_vm0, %v9775_v51 }
 0x81c   :  { %8284 = vmatprep.mubr.msk.f32.mxu0 %vm336_vm1, %v1202_v15  ;;  %9056 = vmatprep.subr.bf16.mxu1 %v9055_v16 }
 0x81d   :  { %9058 = vmatpush3.bf16.msra.mxu1 %v9055_v16  ;;  %v9071_v16 = vpack.c.bf16 %v1732_v3, %v1731_v13 }
 0x81e   :  { %9060 = vmatprep.subr.bf16.mxu1 %v9059_v47 }
 0x8ee   :  { %v8268_v18 = vpop.f32.mrb[10].mxu0 }
 0x8ef   :  { %v1290_v19 = vadd.f32 %v8268_v18, %v1217_v2  ;;  %v1284_v20 = vpop.f32.mrb[11].mxu0 }
 0x8f0   :  { %v1285_v21 = vadd.f32 %v1284_v20, %v1217_v2  ;;  %v9896_v2 = vsub.s32 3, %v9759_v35 }
 0x8f2   :  { %v9049_v22 = vpack.c.bf16 %v1290_v19, %v1285_v21  ;;  %v1653_v18 = vrot.slane %v9792_v60, %v9896_v2 }
 0x8f4   :  { %9051 = vmatprep.subr.msk.bf16.mxu0 %vm9800_vm2, %v9049_v22 }
 0x8f5   :  { %9054 = vmatpush3.bf16.xpose.msk.msra.mxu0 %vm9800_vm2, %v9049_v22 }
 0x8f6   :  { %8294 = vmatprep.subr.mxu0 %v1562_v48 }
 0x8fc   :  { %8285 = vmatmul.mubr.msk.f32.vlgmr.msra.gmra.mrb[12].mxu0 %vm336_vm1, %v1207_v10  ;;  %v1730_v10 = vld [vmem:[#allocation2 + $0x1e8] sm:$0xff] }
 0x8fd   :  { %8295 = vmatpush3.msra.mxu0 %v1562_v48  ;;  %v9067_v11 = vpack.c.bf16 %v1730_v10, %v1729_v9 }
 0x8ff   :  { %9068 = vmatprep.subr.bf16.mxu0 %v9067_v11 }
 0x9cf   :  { %v8286_v25 = vpop.f32.mrb[12].mxu0 }
 0x9d0   :  { %v1456_v26 = vadd.f32 %v8286_v25, %v30_v23  ;;  %v1450_v27 = vpop.f32.mrb[13].mxu0 }
 0x9d1   :  { %v1451_v28 = vadd.f32 %v1450_v27, %v29_v24 }
 0x9d2   :  { %v1462_v29 = vsel %vm424_vm3, %v1456_v26, -inf }
 0x9d3   :  { %1463 = vmax.xlane.f32.xlu1 %v1462_v29  ;;  %v1459_v30 = vsel %vm424_vm3, %v1451_v28, -inf }
 0x9d4   :  { %1460 = vmax.xlane.f32.xlu0 %v1459_v30 }
 0xa60   :  { %v1464_v31 = vpop.xlane.xlu1 %1463 }
 0xa61   :  { %v1466_v32 = vsub.f32 %v1456_v26, %v1464_v31  ;;  %v1461_v33 = vpop.xlane.xlu0 %1460 }
 0xa62   :  { %v1465_v34 = vsub.f32 %v1451_v28, %v1461_v33 }
 0xa63   :  { %v1469_v36 = vmul.f32 1.442695, %v1466_v32  ;;  %v31_v32 = vld [vmem:[#allocation2 + $0x30] sm:$0xff] }
 0xa64   :  { %v1467_v38 = vmul.f32 1.442695, %v1465_v34 }
 0xa65   :  { %9549 = vpow2.f32 %v1469_v36 }
 0xa66   :  { %9551 = vpow2.f32 %v1467_v38 }
 0xa6f   :  { %v9550_v40 = vpop.eup %9549 }
 0xa70   :  { %v9552_v41 = vpop.eup %9551  ;;  %v1474_v42 = vsel %vm424_vm3, %v9550_v40, 0.0 }
 0xa71   :  { %1475 = vadd.xlane.f32.xlu1 %v1474_v42  ;;  %v1471_v43 = vsel %vm424_vm3, %v9552_v41, 0.0 }
 0xa72   :  { %1472 = vadd.xlane.f32.xlu0 %v1471_v43 }
 0xafe   :  { %v1476_v49 = vpop.xlane.xlu1 %1475 }
 0xaff   :  { %9553 = vrcp.f32 %v1476_v49  ;;  %v1473_v50 = vpop.xlane.xlu0 %1472 }
 0xb00   :  { %9555 = vrcp.f32 %v1473_v50 }
 0xb09   :  { %v9554_v52 = vpop.eup %9553 }
 0xb0a   :  { %v9556_v55 = vpop.eup %9555  ;;  %v1480_v57 = vmul.f32 %v9554_v52, %v9550_v40  ;;  %v2081_v52 = vld [vmem:[#allocation2 + $0x220] sm:$0xff] }
 0xb0b   :  { %v1478_v56 = vmul.f32 %v9556_v55, %v9552_v41 }
 0xb0d   :  { %8291 = vmatprep.mubr.msk.f32.mxu1 %vm424_vm3, %v1478_v56 }
 0xb0e   :  { %8292 = vmatmul.mubr.msk.f32.vlgmr.msra.gmra.mrb[16].mxu1 %vm424_vm3, %v1480_v57 }
 0xb0f   :  { %9062 = vmatpush3.bf16.msra.mxu1 %v9059_v47  ;;  %8307 = vmatprep.mubr.msk.f32.mxu1 %vm44_vm0, %v9769_v46 }
 0xb10   :  { %9064 = vmatprep.subr.bf16.mxu1 %v9063_v58 }
 0xb13   :  { %9066 = vmatpush3.bf16.msra.mxu1 %v9063_v58 }
 0xb14   :  { %9076 = vmatprep.subr.bf16.mxu1 %v9075_v4 }
 0xb16   :  { %8308 = vmatmul.mubr.msk.f32.vlgmr.msra.gmra.mrb[18].mxu1 %vm44_vm0, %v9775_v51 }
 0xb17   :  { %9078 = vmatpush3.bf16.msra.mxu1 %v9075_v4  ;;  %8329 = vmatprep.mubr.msk.f32.mxu1 %vm44_vm0, %v9769_v46  ;;  %v7569_v4 = vld [vmem:[#allocation2 + $0x230] ss:$0 sm:$0xff] }
 0xb18   :  { %9080 = vmatprep.subr.bf16.mxu1 %v9079_v7 }
 0xb1b   :  { %9082 = vmatpush3.bf16.msra.mxu1 %v9079_v7 }
 0xb1e   :  { %8330 = vmatmul.mubr.msk.f32.vlgmr.msra.gmra.mrb[20].mxu1 %vm44_vm0, %v9775_v51 }
 0xbe1   :  { %v8293_v14 = vpop.f32.mrb[16].mxu1 }
 0xbe2   :  { %v1553_v15 = vpop.f32.mrb[17].mxu1 }
 0xbe3   :  { %8296 = vmatprep.mubr.msk.f32.mxu0 %vm336_vm1, %v1553_v15 }
 0xbe4   :  { %8297 = vmatmul.mubr.msk.f32.vlgmr.msra.gmra.mrb[8].mxu0 %vm336_vm1, %v8293_v14 }
 0xbe5   :  { %9070 = vmatpush3.bf16.msra.mxu0 %v9067_v11  ;;  %8318 = vmatprep.mubr.msk.f32.mxu0 %vm44_vm0, %v9769_v46  ;;  %v9908_v46 = vsub.s32 7, %v9759_v35 }
 0xbe6   :  { %9072 = vmatprep.subr.bf16.mxu0 %v9071_v16 }
 0xbe7   :  { %v1736_v26 = vrot.slane %v9792_v60, %v9908_v46 }
 0xbe9   :  { %v8309_v19 = vpop.f32.mrb[18].mxu1  ;;  %9074 = vmatpush3.bf16.msra.mxu0 %v9071_v16 }
 0xbea   :  { %v1726_v20 = vadd.f32 %v8309_v19, %v1653_v18  ;;  %v1720_v21 = vpop.f32.mrb[19].mxu1 }
 0xbeb   :  { %v1721_v22 = vadd.f32 %v1720_v21, %v1653_v18 }
 0xbec   :  { %8319 = vmatmul.mubr.msk.f32.vlgmr.msra.gmra.mrb[14].mxu0 %vm44_vm0, %v9775_v51  ;;  %v32_v51 = vld [vmem:[#allocation2 + $0x38] sm:$0xff] }
 0xbed   :  { %8336 = vmatprep.mubr.msk.f32.mxu0 %vm336_vm1, %v1721_v22 }
 0xbf1   :  { %v8331_v23 = vpop.f32.mrb[20].mxu1 }
 0xbf2   :  { %v1882_v24 = vpop.f32.mrb[21].mxu1 }
 0xbf3   :  { %v9089_v25 = vpack.c.bf16 %v8331_v23, %v1882_v24  ;;  %v2213_v23 = vld [vmem:[#allocation2 + $0x240] sm:$0xff]  ;;  %v2214_v24 = vld [vmem:[#allocation2 + $0x248] sm:$0xff] }
 0xbf5   :  { %9090 = vmatprep.subr.bf16.mxu1 %v9089_v25 }
 0xbf6   :  { %9092 = vmatpush3.bf16.msra.mxu1 %v9089_v25  ;;  %v9093_v25 = vpack.c.bf16 %v2214_v24, %v2213_v23 }
 0xbf8   :  { %9094 = vmatprep.subr.bf16.mxu1 %v9093_v25 }
 0xcbf   :  { %v8320_v27 = vpop.f32.mrb[14].mxu0 }
 0xcc0   :  { %v1809_v28 = vadd.f32 %v8320_v27, %v1736_v26  ;;  %v1803_v29 = vpop.f32.mrb[15].mxu0  ;;  %v2216_v27 = vld [vmem:[#allocation2 + $0x258] sm:$0xff] }
 0xcc1   :  { %v1804_v30 = vadd.f32 %v1803_v29, %v1736_v26  ;;  %v2215_v26 = vld [vmem:[#allocation2 + $0x250] sm:$0xff] }
 0xcc3   :  { %v9083_v31 = vpack.c.bf16 %v1809_v28, %v1804_v30  ;;  %v9097_v28 = vpack.c.bf16 %v2216_v27, %v2215_v26 }
 0xcc5   :  { %9085 = vmatprep.subr.msk.bf16.mxu0 %vm9800_vm2, %v9083_v31 }
 0xcc6   :  { %9088 = vmatpush3.bf16.xpose.msk.msra.mxu0 %vm9800_vm2, %v9083_v31 }
 0xcc7   :  { %8346 = vmatprep.subr.mxu0 %v2081_v52 }
 0xccd   :  { %8337 = vmatmul.mubr.msk.f32.vlgmr.msra.gmra.mrb[16].mxu0 %vm336_vm1, %v1726_v20 }
 0xcce   :  { %8347 = vmatpush3.msra.mxu0 %v2081_v52  ;;  %v2324_v52 = vld [vmem:[#allocation2 + $0x280] sm:$0xff] }
 0xda0   :  { %v8338_v35 = vpop.f32.mrb[16].mxu0 }
 0xda1   :  { %v1975_v33 = vadd.f32 %v8338_v35, %v32_v51  ;;  %v1969_v34 = vpop.f32.mrb[17].mxu0 }
 0xda2   :  { %v1970_v36 = vadd.f32 %v1969_v34, %v31_v32 }
 0xda3   :  { %v1981_v60 = vsel %vm424_vm3, %v1975_v33, -inf }
 0xda4   :  { %1982 = vmax.xlane.f32.xlu1 %v1981_v60  ;;  %v1978_v38 = vsel %vm424_vm3, %v1970_v36, -inf }
 0xda5   :  { %1979 = vmax.xlane.f32.xlu0 %v1978_v38 }
 0xe31   :  { %v1983_v40 = vpop.xlane.xlu1 %1982 }
 0xe32   :  { %v1985_v41 = vsub.f32 %v1975_v33, %v1983_v40  ;;  %v1980_v42 = vpop.xlane.xlu0 %1979  ;;  %v2174_v33 = vld [vmem:[#allocation2 + $0x238] sm:$0x3] }
 0xe33   :  { %v1984_v43 = vsub.f32 %v1970_v36, %v1980_v42  ;;  %v2204_v34 = vrot.slane %v2174_v33, %v9762_v37 }
 0xe34   :  { %v1988_v44 = vmul.f32 1.442695, %v1985_v41  ;;  %v2210_v41 = vrot.slane %v2174_v33, %v9765_v39 }
 0xe35   :  { %v1986_v45 = vmul.f32 1.442695, %v1984_v43 }
 0xe36   :  { %9557 = vpow2.f32 %v1988_v44 }
 0xe37   :  { %9559 = vpow2.f32 %v1986_v45 }
 0xe40   :  { %v9558_v47 = vpop.eup %9557 }
 0xe41   :  { %v9560_v48 = vpop.eup %9559  ;;  %v1993_v49 = vsel %vm424_vm3, %v9558_v47, 0.0 }
 0xe42   :  { %1994 = vadd.xlane.f32.xlu1 %v1993_v49  ;;  %v1990_v50 = vsel %vm424_vm3, %v9560_v48, 0.0 }
 0xe43   :  { %1991 = vadd.xlane.f32.xlu0 %v1990_v50  ;;  %v2323_v50 = vld [vmem:[#allocation2 + $0x278] sm:$0xff] }
 0xecf   :  { %v1995_v53 = vpop.xlane.xlu1 %1994 }
 0xed0   :  { %9561 = vrcp.f32 %v1995_v53  ;;  %v1992_v54 = vpop.xlane.xlu0 %1991  ;;  %v9105_v53 = vpack.c.bf16 %v2324_v52, %v2323_v50 }
 0xed1   :  { %9563 = vrcp.f32 %v1992_v54  ;;  %v2325_v54 = vld [vmem:[#allocation2 + $0x288] sm:$0xff] }
 0xeda   :  { %v9562_v55 = vpop.eup %9561 }
 0xedb   :  { %v9564_v56 = vpop.eup %9563  ;;  %v1999_v58 = vmul.f32 %v9562_v55, %v9558_v47  ;;  %v2321_v47 = vld [vmem:[#allocation2 + $0x268] sm:$0xff]  ;;  %v2326_v55 = vld [vmem:[#allocation2 + $0x290] sm:$0xff] }
 0xedc   :  { %v1997_v57 = vmul.f32 %v9564_v56, %v9560_v48  ;;  %v2322_v48 = vld [vmem:[#allocation2 + $0x270] sm:$0xff]  ;;  %v9109_v56 = vpack.c.bf16 %v2326_v55, %v2325_v54  ;;  %v2463_v54 = vld [vmem:[#allocation2 + $0x2e0] sm:$0xff] }
 0xedd   :  { %v9101_v49 = vpack.c.bf16 %v2322_v48, %v2321_v47 }
 0xede   :  { %8343 = vmatprep.mubr.msk.f32.mxu1 %vm424_vm3, %v1997_v57  ;;  %v2327_v57 = vld [vmem:[#allocation2 + $0x298] sm:$0xff] }
 0xedf   :  { %8344 = vmatmul.mubr.msk.f32.vlgmr.msra.gmra.mrb[22].mxu1 %vm424_vm3, %v1999_v58  ;;  %9102 = vmatprep.subr.bf16.mxu0 %v9101_v49  ;;  %v2328_v58 = vld [vmem:[#allocation2 + $0x2a0] sm:$0xff] }
 0xee0   :  { %9096 = vmatpush3.bf16.msra.mxu1 %v9093_v25 }
 0xee1   :  { %9098 = vmatprep.subr.bf16.mxu1 %v9097_v28 }
 0xee4   :  { %9100 = vmatpush3.bf16.msra.mxu1 %v9097_v28 }
 0xfb2   :  { %v8345_v61 = vpop.f32.mrb[22].mxu1 }
 0xfb3   :  { %v2072_v62 = vpop.f32.mrb[23].mxu1 }
 0xfb4   :  { %8348 = vmatprep.mubr.msk.f32.mxu0 %vm336_vm1, %v2072_v62  ;;  %v9113_v62 = vpack.c.bf16 %v2328_v58, %v2327_v57  ;;  %v2465_v57 = vld [vmem:[#allocation2 + $0x2f0] sm:$0xff] }
 0xfb5   :  { %8349 = vmatmul.mubr.msk.f32.vlgmr.msra.gmra.mrb[8].mxu0 %vm336_vm1, %v8345_v61  ;;  %v2329_v61 = vld [vmem:[#allocation2 + $0x2a8] sm:$0xff] }
 0xfb6   :  { %9104 = vmatpush3.bf16.msra.mxu0 %v9101_v49 }
 0xfb7   :  { %9106 = vmatprep.subr.bf16.mxu0 %v9105_v53 }
 0xfba   :  { %9108 = vmatpush3.bf16.msra.mxu0 %v9105_v53  ;;  %v2462_v53 = vld [vmem:[#allocation2 + $0x2d8] sm:$0xff] }
 0xfbb   :  { %9110 = vmatprep.subr.bf16.mxu0 %v9109_v56  ;;  %v9125_v55 = vpack.c.bf16 %v2463_v54, %v2462_v53 }
 0xfbd   :  { %9126 = vmatprep.subr.bf16.mxu1 %v9125_v55 }
 0xfbe   :  { %9112 = vmatpush3.bf16.msra.mxu0 %v9109_v56  ;;  %v2464_v56 = vld [vmem:[#allocation2 + $0x2e8] sm:$0xff] }
 0xfbf   :  { %9114 = vmatprep.subr.bf16.mxu0 %v9113_v62  ;;  %v9129_v58 = vpack.c.bf16 %v2465_v57, %v2464_v56  ;;  %v9673_v57 = vld [vmem:[#allocation2 + $0x8] sm:$0xff] }
 0xfc2   :  { %9116 = vmatpush3.bf16.msra.mxu0 %v9113_v62  ;;  %v2552_v62 = vld [vmem:[#allocation2 + $0x300] sm:$0xff] }
0x1088   :  { %v8350_v5 = vpop.f32.mrb[8].mxu0 }
0x1089   :  { %v2171_v6 = vadd.f32 %v8350_v5, %v7569_v4  ;;  %v2154_v7 = vpop.f32.mrb[9].mxu0 }
0x108a   :  { %v2170_v9 = vadd.f32 %v7569_v4, %v2154_v7  ;;  %v2330_v4 = vld [vmem:[#allocation2 + $0x2b0] sm:$0xff]  ;;  %v2332_v7 = vld [vmem:[#allocation2 + $0x2c0] sm:$0xff] }
0x108b   :  { %v9926_v10 = vadd.f32 %v2171_v6, %v9749_v1  ;;  %v9117_v5 = vpack.c.bf16 %v2330_v4, %v2329_v61  ;;  %v2331_v6 = vld [vmem:[#allocation2 + $0x2b8] sm:$0xff] }
0x108c   :  { %v9929_v11 = vadd.f32 %v2170_v9, %v9744_v0  ;;  %v9121_v9 = vpack.c.bf16 %v2332_v7, %v2331_v6  ;;  %v2551_v61 = vld [vmem:[#allocation2 + $0x2f8] sm:$0xff] }
0x108d   :  { %v2178_v13 = vsel %vm44_vm0, %v9926_v10, 0.0  ;;  %9118 = vmatprep.subr.bf16.mxu0 %v9117_v5  ;;  %v9133_v4 = vpack.c.bf16 %v2552_v62, %v2551_v61  ;;  %v9674_v62 = vld [vmem:[#allocation2] sm:$0xff] }
0x108e   :  { %2179 = vadd.xlane.f32.xlu1 %v2178_v13  ;;  %v2175_v3 = vsel %vm44_vm0, %v9929_v11, 0.0  ;;  %9120 = vmatpush3.bf16.msra.mxu0 %v9117_v5  ;;  %v7570_v13 = vld [vmem:[#allocation2 + $0x260] ss:$0 sm:$0xff] }
0x108f   :  { %2176 = vadd.xlane.f32.xlu0 %v2175_v3  ;;  %9122 = vmatprep.subr.bf16.mxu0 %v9121_v9 }
0x1092   :  { %9124 = vmatpush3.bf16.msra.mxu0 %v9121_v9 }
0x111b   :  { %v2180_v14 = vpop.xlane.xlu1 %2179 }
0x111c   :  { %v2182_v15 = vmul.f32 0.03125, %v2180_v14  ;;  %v2177_v16 = vpop.xlane.xlu0 %2176 }
0x111d   :  { %v2181_v18 = vmul.f32 0.03125, %v2177_v16 }
0x111e   :  { %v2184_v19 = vsub.f32 %v9926_v10, %v2182_v15 }
0x111f   :  { %v2183_v1 = vsub.f32 %v9929_v11, %v2181_v18 }
0x1120   :  { %v2186_v20 = vmul.f32 %v2184_v19, %v2184_v19 }
0x1121   :  { %v2185_v21 = vmul.f32 %v2183_v1, %v2183_v1 }
0x1122   :  { %v2190_v0 = vsel %vm44_vm0, %v2186_v20, 0.0 }
0x1123   :  { %2191 = vadd.xlane.f32.xlu1 %v2190_v0  ;;  %v2187_v22 = vsel %vm44_vm0, %v2185_v21, 0.0 }
0x1124   :  { %2188 = vadd.xlane.f32.xlu0 %v2187_v22 }
0x11b0   :  { %v2192_v29 = vpop.xlane.xlu1 %2191 }
0x11b1   :  { %v2194_v30 = vmul.f32 0.03125, %v2192_v29  ;;  %v2189_v31 = vpop.xlane.xlu0 %2188 }
0x11b2   :  { %v2193_v51 = vmul.f32 0.03125, %v2189_v31 }
0x11b3   :  { %v2196_v32 = vadd.f32 1e-05, %v2194_v30 }
0x11b4   :  { %v2195_v35 = vadd.f32 1e-05, %v2193_v51 }
0x11b5   :  { %9565 = vrsqrt.f32 %v2196_v32 }
0x11b6   :  { %9567 = vrsqrt.f32 %v2195_v35  ;;  %v7573_v35 = vld [vmem:[#allocation2 + $0x2c8] ss:$0 sm:$0xff] }
0x11bf   :  { %v9566_v36 = vpop.eup %9565 }
0x11c0   :  { %v9568_v60 = vpop.eup %9567  ;;  %v2200_v38 = vmul.f32 %v9566_v36, %v2184_v19 }
0x11c1   :  { %v2199_v40 = vmul.f32 %v9568_v60, %v2183_v1 }
0x11c2   :  { %v2206_v42 = vmul.f32 %v2204_v34, %v2200_v38 }
0x11c3   :  { %v2205_v43 = vmul.f32 %v2204_v34, %v2199_v40 }
0x11c4   :  { %v2212_v45 = vadd.f32 %v2210_v41, %v2206_v42 }
0x11c5   :  { %v2211_v44 = vadd.f32 %v2210_v41, %v2205_v43 }
0x11c7   :  { %8359 = vmatprep.mubr.msk.f32.mxu1 %vm44_vm0, %v2211_v44 }
0x11c8   :  { %8360 = vmatmul.mubr.msk.f32.vlgmr.msra.gmra.mrb[24].mxu1 %vm44_vm0, %v2212_v45 }
0x11c9   :  { %9128 = vmatpush3.bf16.msra.mxu1 %v9125_v55 }
0x11ca   :  { %9130 = vmatprep.subr.bf16.mxu1 %v9129_v58 }
0x11cd   :  { %9132 = vmatpush3.bf16.msra.mxu1 %v9129_v58 }
0x11ce   :  { %9134 = vmatprep.subr.bf16.mxu1 %v9133_v4 }
0x129b   :  { %v8361_v3 = vpop.f32.mrb[24].mxu1 }
0x129c   :  { %v2300_v14 = vadd.f32 %v8361_v3, %v7570_v13  ;;  %v2294_v15 = vpop.f32.mrb[25].mxu1 }
0x129d   :  { %v2295_v16 = vadd.f32 %v7570_v13, %v2294_v15 }
0x129e   :  { %v2306_v18 = vmul.f32 0.044715, %v2300_v14  ;;  %v2304_v31 = vmul.f32 0.5, %v2300_v14 }
0x129f   :  { %v2305_v19 = vmul.f32 0.044715, %v2295_v16  ;;  %v2303_v29 = vmul.f32 0.5, %v2295_v16 }
0x12a0   :  { %v2308_v1 = vmul.f32 %v2306_v18, %v2300_v14 }
0x12a1   :  { %v2307_v20 = vmul.f32 %v2305_v19, %v2295_v16 }
0x12a2   :  { %v2310_v21 = vmul.f32 %v2308_v1, %v2300_v14 }
0x12a3   :  { %v2309_v0 = vmul.f32 %v2307_v20, %v2295_v16 }
0x12a4   :  { %v2312_v22 = vadd.f32 %v2310_v21, %v2300_v14  ;;  %v2422_v14 = vld [vmem:[#allocation2 + $0x2d0] sm:$0x3] }
0x12a5   :  { %v2311_v23 = vadd.f32 %v2309_v0, %v2295_v16  ;;  %v2452_v15 = vrot.slane %v2422_v14, %v9762_v37  ;;  %v2458_v1 = vrot.slane %v2422_v14, %v9765_v39 }
0x12a6   :  { %v2314_v24 = vmul.f32 0.7978846, %v2312_v22  ;;  %v2553_v22 = vld [vmem:[#allocation2 + $0x308] sm:$0xff] }
0x12a7   :  { %v2313_v25 = vmul.f32 0.7978846, %v2311_v23  ;;  %v2554_v23 = vld [vmem:[#allocation2 + $0x310] sm:$0xff] }
0x12a8   :  { %9569 = vtanh.f32 %v2314_v24 }
0x12a9   :  { %9571 = vtanh.f32 %v2313_v25 }
0x12b2   :  { %v9570_v26 = vpop.eup %9569 }
0x12b3   :  { %v9572_v27 = vpop.eup %9571  ;;  %v2318_v28 = vadd.f32 1.0, %v9570_v26  ;;  %v9137_v26 = vpack.c.bf16 %v2554_v23, %v2553_v22 }
0x12b4   :  { %v2317_v30 = vadd.f32 1.0, %v9572_v27  ;;  %v2634_v27 = vld [vmem:[#allocation2 + $0x318] sm:$0xff] }
0x12b5   :  { %v2320_v32 = vmul.f32 %v2318_v28, %v2304_v31  ;;  %v2635_v28 = vld [vmem:[#allocation2 + $0x320] sm:$0xff]  ;;  %v2637_v31 = vld [vmem:[#allocation2 + $0x330] sm:$0xff] }
0x12b6   :  { %v2319_v51 = vmul.f32 %v2317_v30, %v2303_v29  ;;  %v9141_v29 = vpack.c.bf16 %v2635_v28, %v2634_v27  ;;  %v2636_v30 = vld [vmem:[#allocation2 + $0x328] sm:$0xff]  ;;  %v2904_v27 = vld [vmem:[#allocation2 + $0x340] sm:$0xff] }
0x12b7   :  { %v2905_v28 = vld [vmem:[#allocation2 + $0x348] sm:$0xff] }
0x12b8   :  { %8386 = vmatprep.mubr.msk.f32.mxu0 %vm2338_vm4, %v2319_v51  ;;  %v9145_v51 = vpack.c.bf16 %v2637_v31, %v2636_v30 }
0x12b9   :  { %8387 = vmatmul.mubr.msk.f32.vlgmr.msra.gmra.mrb[18].mxu0 %vm2338_vm4, %v2320_v32  ;;  %v9977_v32 = vld [vmem:[#allocation2 + $0x478] sm:$0xff] }
0x138c   :  { %v8388_v33 = vpop.f32.mrb[18].mxu0 }
0x138d   :  { %v2417_v34 = vadd.f32 %v8388_v33, %v7573_v35  ;;  %v2411_v36 = vpop.f32.mrb[19].mxu0 }
0x138e   :  { %v2412_v60 = vadd.f32 %v7573_v35, %v2411_v36  ;;  %v2469_v35 = vrot.slane %v9977_v32, %v9762_v37 }
0x138f   :  { %v9946_v38 = vadd.f32 %v2417_v34, %v9926_v10 }
0x1390   :  { %v9949_v40 = vadd.f32 %v2412_v60, %v9929_v11  ;;  %v2558_v60 = vrot.slane %v9977_v32, %v9790_v59 }
0x1391   :  { %v2426_v41 = vsel %vm44_vm0, %v9946_v38, 0.0 }
0x1392   :  { %2427 = vadd.xlane.f32.xlu1 %v2426_v41  ;;  %v2423_v42 = vsel %vm44_vm0, %v9949_v40, 0.0 }
0x1393   :  { %2424 = vadd.xlane.f32.xlu0 %v2423_v42 }
0x141f   :  { %v2428_v43 = vpop.xlane.xlu1 %2427 }
0x1420   :  { %v2430_v44 = vmul.f32 0.03125, %v2428_v43  ;;  %v2425_v45 = vpop.xlane.xlu0 %2424 }
0x1421   :  { %v2429_v47 = vmul.f32 0.03125, %v2425_v45  ;;  %v2988_v45 = vld [vmem:[#allocation2 + $0x368] sm:$0xff] }
0x1422   :  { %v2432_v48 = vsub.f32 %v9946_v38, %v2430_v44  ;;  %v2987_v44 = vld [vmem:[#allocation2 + $0x360] sm:$0xff] }
0x1423   :  { %v2431_v10 = vsub.f32 %v9949_v40, %v2429_v47 }
0x1424   :  { %v2434_v49 = vmul.f32 %v2432_v48, %v2432_v48 }
0x1425   :  { %v2433_v50 = vmul.f32 %v2431_v10, %v2431_v10 }
0x1426   :  { %v2438_v11 = vsel %vm44_vm0, %v2434_v49, 0.0 }
0x1427   :  { %2439 = vadd.xlane.f32.xlu1 %v2438_v11  ;;  %v2435_v52 = vsel %vm44_vm0, %v2433_v50, 0.0  ;;  %v2989_v11 = vld [vmem:[#allocation2 + $0x370] sm:$0xff] }
0x1428   :  { %2436 = vadd.xlane.f32.xlu0 %v2435_v52  ;;  %v2990_v52 = vld [vmem:[#allocation2 + $0x378] sm:$0xff] }
0x1429   :  { %v9171_v55 = vpack.c.bf16 %v2990_v52, %v2989_v11 }
0x14b4   :  { %v2440_v5 = vpop.xlane.xlu1 %2439 }
0x14b5   :  { %v2442_v6 = vmul.f32 0.03125, %v2440_v5  ;;  %v2437_v7 = vpop.xlane.xlu0 %2436 }
0x14b6   :  { %v2441_v9 = vmul.f32 0.03125, %v2437_v7  ;;  %v2994_v7 = vrot.slane %v9977_v32, %v9810_v12 }
0x14b7   :  { %v2444_v13 = vadd.f32 1e-05, %v2442_v6 }
0x14b8   :  { %v2443_v3 = vadd.f32 1e-05, %v2441_v9 }
0x14b9   :  { %9573 = vrsqrt.f32 %v2444_v13 }
0x14ba   :  { %9575 = vrsqrt.f32 %v2443_v3 }
0x14c3   :  { %v9574_v16 = vpop.eup %9573 }
0x14c4   :  { %v9576_v18 = vpop.eup %9575  ;;  %v2448_v19 = vmul.f32 %v9574_v16, %v2432_v48 }
0x14c5   :  { %v2447_v20 = vmul.f32 %v9576_v18, %v2431_v10  ;;  %v9167_v10 = vpack.c.bf16 %v2988_v45, %v2987_v44  ;;  %v3072_v45 = vld [vmem:[#allocation2 + $0x390] sm:$0xff] }
0x14c6   :  { %v2454_v21 = vmul.f32 %v2452_v15, %v2448_v19 }
0x14c7   :  { %v2453_v0 = vmul.f32 %v2452_v15, %v2447_v20 }
0x14c8   :  { %v9963_v25 = vadd.f32 %v2458_v1, %v2454_v21 }
0x14c9   :  { %v9961_v24 = vadd.f32 %v2458_v1, %v2453_v0 }
0x14cb   :  { %8397 = vmatprep.mubr.msk.f32.mxu1 %vm44_vm0, %v9961_v24 }
0x14cc   :  { %8398 = vmatmul.mubr.msk.f32.vlgmr.msra.gmra.mrb[26].mxu1 %vm44_vm0, %v9963_v25 }
0x14cd   :  { %9136 = vmatpush3.bf16.msra.mxu1 %v9133_v4  ;;  %8408 = vmatprep.mubr.msk.f32.mxu1 %vm44_vm0, %v9961_v24 }
0x14ce   :  { %9138 = vmatprep.subr.bf16.mxu1 %v9137_v26 }
0x14d1   :  { %9140 = vmatpush3.bf16.msra.mxu1 %v9137_v26 }
0x14d2   :  { %9142 = vmatprep.subr.bf16.mxu1 %v9141_v29 }
0x14d4   :  { %8409 = vmatmul.mubr.msk.f32.vlgmr.msra.gmra.mrb[28].mxu1 %vm44_vm0, %v9963_v25 }
0x14d5   :  { %9144 = vmatpush3.bf16.msra.mxu1 %v9141_v29  ;;  %8419 = vmatprep.mubr.msk.f32.mxu1 %vm44_vm0, %v9961_v24  ;;  %v9159_v29 = vpack.c.bf16 %v2905_v28, %v2904_v27 }
0x14d6   :  { %9146 = vmatprep.subr.bf16.mxu1 %v9145_v51 }
0x14d9   :  { %9148 = vmatpush3.bf16.msra.mxu1 %v9145_v51 }
0x14dc   :  { %8420 = vmatmul.mubr.msk.f32.vlgmr.msra.gmra.mrb[30].mxu1 %vm44_vm0, %v9963_v25 }
0x159f   :  { %v8399_v33 = vpop.f32.mrb[26].mxu1 }
0x15a0   :  { %v2542_v34 = vpop.f32.mrb[27].mxu1  ;;  %v2548_v54 = vadd.f32 %v8399_v33, %v2469_v35  ;;  %v2907_v33 = vld [vmem:[#allocation2 + $0x358] sm:$0xff] }
0x15a1   :  { %v2543_v36 = vadd.f32 %v2542_v34, %v2469_v35  ;;  %v2906_v35 = vld [vmem:[#allocation2 + $0x350] sm:$0xff] }
0x15a3   :  { %8426 = vmatprep.mubr.msk.f32.mxu0 %vm336_vm1, %v2543_v36 }
0x15a7   :  { %v8410_v41 = vpop.f32.mrb[28].mxu1 }
0x15a8   :  { %v2631_v42 = vadd.f32 %v8410_v41, %v2558_v60  ;;  %v2625_v43 = vpop.f32.mrb[29].mxu1  ;;  %v9163_v41 = vpack.c.bf16 %v2907_v33, %v2906_v35 }
0x15a9   :  { %v2626_v47 = vadd.f32 %v2625_v43, %v2558_v60  ;;  %v3071_v43 = vld [vmem:[#allocation2 + $0x388] sm:$0xff] }
0x15ab   :  { %v9149_v48 = vpack.c.bf16 %v2631_v42, %v2626_v47  ;;  %v3070_v42 = vld [vmem:[#allocation2 + $0x380] sm:$0xff]  ;;  %v3073_v47 = vld [vmem:[#allocation2 + $0x398] sm:$0xff] }
0x15ac   :  { %v9175_v44 = vpack.c.bf16 %v3071_v43, %v3070_v42  ;;  %v3670_v42 = vld [vmem:[#allocation2 + $0x3f8] sm:$0xff]  ;;  %v3671_v43 = vld [vmem:[#allocation2 + $0x400] sm:$0xff] }
0x15ad   :  { %9151 = vmatprep.subr.msk.bf16.mxu0 %vm9800_vm2, %v9149_v48 }
0x15ae   :  { %9154 = vmatpush3.bf16.xpose.msk.msra.mxu0 %vm9800_vm2, %v9149_v48  ;;  %v9179_v48 = vpack.c.bf16 %v3073_v47, %v3072_v45  ;;  %v2903_v45 = vld [vmem:[#allocation2 + $0x338] sm:$0xff]  ;;  %v3585_v47 = vld [vmem:[#allocation2 + $0x3c8] sm:$0xff] }
0x15af   :  { %v8421_v49 = vpop.f32.mrb[30].mxu1  ;;  %9168 = vmatprep.subr.bf16.mxu0 %v9167_v10 }
0x15b0   :  { %v2704_v50 = vpop.f32.mrb[31].mxu1 }
0x15b1   :  { %v9155_v53 = vpack.c.bf16 %v8421_v49, %v2704_v50  ;;  %v2911_v50 = vrot.slane %v9977_v32, %v9765_v39 }
0x15b3   :  { %9156 = vmatprep.subr.bf16.mxu1 %v9155_v53 }
0x15b4   :  { %9158 = vmatpush3.bf16.msra.mxu1 %v9155_v53 }
0x15b5   :  { %8427 = vmatmul.mubr.msk.f32.vlgmr.msra.gmra.mrb[20].mxu0 %vm336_vm1, %v2548_v54  ;;  %9160 = vmatprep.subr.bf16.mxu1 %v9159_v29 }
0x15b6   :  { %9170 = vmatpush3.bf16.msra.mxu0 %v9167_v10  ;;  %8455 = vmatprep.mubr.msk.f32.mxu0 %vm44_vm0, %v9961_v24 }
0x15b7   :  { %9172 = vmatprep.subr.bf16.mxu0 %v9171_v55 }
0x15ba   :  { %9174 = vmatpush3.bf16.msra.mxu0 %v9171_v55 }
0x15bd   :  { %8456 = vmatmul.mubr.msk.f32.vlgmr.msra.gmra.mrb[22].mxu0 %vm44_vm0, %v9963_v25 }
0x1688   :  { %v8428_v56 = vpop.f32.mrb[20].mxu0 }
0x1689   :  { %v2797_v58 = vadd.f32 %v9673_v57, %v8428_v56  ;;  %v2791_v61 = vpop.f32.mrb[21].mxu0 }
0x168a   :  { %v2792_v4 = vadd.f32 %v9674_v62, %v2791_v61  ;;  %v9675_v61 = vld [vmem:[#allocation2 + $0x18] sm:$0xff] }
0x168b   :  { %v2803_v5 = vsel %vm424_vm3, %v2797_v58, -inf }
0x168c   :  { %2804 = vmax.xlane.f32.xlu1 %v2803_v5  ;;  %v2800_v6 = vsel %vm424_vm3, %v2792_v4, -inf  ;;  %v9676_v5 = vld [vmem:[#allocation2 + $0x10] sm:$0xff] }
0x168d   :  { %2801 = vmax.xlane.f32.xlu0 %v2800_v6 }
0x1690   :  { %v8457_v9 = vpop.f32.mrb[22].mxu0 }
0x1691   :  { %v3067_v13 = vadd.f32 %v8457_v9, %v2994_v7  ;;  %v3061_v3 = vpop.f32.mrb[23].mxu0 }
0x1692   :  { %v3062_v14 = vadd.f32 %v3061_v3, %v2994_v7 }
0x1694   :  { %v9183_v15 = vpack.c.bf16 %v3067_v13, %v3062_v14 }
0x1696   :  { %9185 = vmatprep.subr.msk.bf16.mxu0 %vm9800_vm2, %v9183_v15 }
0x1697   :  { %9188 = vmatpush3.bf16.xpose.msk.msra.mxu0 %vm9800_vm2, %v9183_v15 }
0x1719   :  { %v2805_v16 = vpop.xlane.xlu1 %2804 }
0x171a   :  { %v2807_v18 = vsub.f32 %v2797_v58, %v2805_v16  ;;  %v2802_v19 = vpop.xlane.xlu0 %2801 }
0x171b   :  { %v2806_v1 = vsub.f32 %v2792_v4, %v2802_v19 }
0x171c   :  { %v2810_v20 = vmul.f32 1.442695, %v2807_v18 }
0x171d   :  { %v2808_v21 = vmul.f32 1.442695, %v2806_v1 }
0x171e   :  { %9577 = vpow2.f32 %v2810_v20 }
0x171f   :  { %9579 = vpow2.f32 %v2808_v21 }
0x1728   :  { %v9578_v0 = vpop.eup %9577 }
0x1729   :  { %v9580_v22 = vpop.eup %9579  ;;  %v2815_v23 = vsel %vm424_vm3, %v9578_v0, 0.0 }
0x172a   :  { %2816 = vadd.xlane.f32.xlu1 %v2815_v23  ;;  %v2812_v26 = vsel %vm424_vm3, %v9580_v22, 0.0 }
0x172b   :  { %2813 = vadd.xlane.f32.xlu0 %v2812_v26  ;;  %v3339_v26 = vld [vmem:[#allocation2 + $0x3a0] sm:$0xff] }
0x172c   :  { %8483 = vmatprep.subr.mxu0 %v3339_v26 }
0x17b7   :  { %v2817_v30 = vpop.xlane.xlu1 %2816 }
0x17b8   :  { %9581 = vrcp.f32 %v2817_v30  ;;  %v2814_v31 = vpop.xlane.xlu0 %2813  ;;  %v3504_v30 = vld [vmem:[#allocation2 + $0x3b8] sm:$0xff] }
0x17b9   :  { %9583 = vrcp.f32 %v2814_v31  ;;  %v3505_v31 = vld [vmem:[#allocation2 + $0x3c0] sm:$0xff] }
0x17c2   :  { %v9582_v51 = vpop.eup %9581 }
0x17c3   :  { %v9584_v34 = vpop.eup %9583  ;;  %v2821_v60 = vmul.f32 %v9582_v51, %v9578_v0  ;;  %v3502_v0 = vld [vmem:[#allocation2 + $0x3a8] sm:$0xff] }
0x17c4   :  { %v2819_v36 = vmul.f32 %v9584_v34, %v9580_v22  ;;  %v3503_v22 = vld [vmem:[#allocation2 + $0x3b0] sm:$0xff]  ;;  %v9197_v34 = vpack.c.bf16 %v3505_v31, %v3504_v30 }
0x17c5   :  { %v9193_v23 = vpack.c.bf16 %v3503_v22, %v3502_v0 }
0x17c6   :  { %8433 = vmatprep.mubr.msk.f32.mxu1 %vm424_vm3, %v2819_v36  ;;  %v3668_v36 = vld [vmem:[#allocation2 + $0x3e8] sm:$0xff] }
0x17c7   :  { %8434 = vmatmul.mubr.msk.f32.vlgmr.msra.gmra.mrb[32].mxu1 %vm424_vm3, %v2821_v60  ;;  %v3669_v60 = vld [vmem:[#allocation2 + $0x3f0] sm:$0xff] }
0x17c8   :  { %9162 = vmatpush3.bf16.msra.mxu1 %v9159_v29  ;;  %8444 = vmatprep.mubr.msk.f32.mxu1 %vm44_vm0, %v9961_v24 }
0x17c9   :  { %9164 = vmatprep.subr.bf16.mxu1 %v9163_v41 }
0x17cc   :  { %9166 = vmatpush3.bf16.msra.mxu1 %v9163_v41  ;;  %v9209_v41 = vpack.c.bf16 %v3669_v60, %v3668_v36  ;;  %v3937_v36 = vld [vmem:[#allocation2 + $0x408] sm:$0xff] }
0x17cd   :  { %9176 = vmatprep.subr.bf16.mxu1 %v9175_v44 }
0x17cf   :  { %8445 = vmatmul.mubr.msk.f32.vlgmr.msra.gmra.mrb[34].mxu1 %vm44_vm0, %v9963_v25 }
0x17d0   :  { %9178 = vmatpush3.bf16.msra.mxu1 %v9175_v44  ;;  %8466 = vmatprep.mubr.msk.f32.mxu1 %vm44_vm0, %v9961_v24  ;;  %v9213_v44 = vpack.c.bf16 %v3671_v43, %v3670_v42  ;;  %v4023_v43 = vld [vmem:[#allocation2 + $0x420] sm:$0xff] }
0x17d1   :  { %9180 = vmatprep.subr.bf16.mxu1 %v9179_v48 }
0x17d4   :  { %9182 = vmatpush3.bf16.msra.mxu1 %v9179_v48  ;;  %v3586_v48 = vld [vmem:[#allocation2 + $0x3d0] sm:$0xff] }
0x17d7   :  { %8467 = vmatmul.mubr.msk.f32.vlgmr.msra.gmra.mrb[36].mxu1 %vm44_vm0, %v9963_v25 }
0x189a   :  { %v10013_v10 = vpop.f32.mrb[32].mxu1 }
0x189b   :  { %v10015_v49 = vpop.f32.mrb[33].mxu1 }
0x18a2   :  { %v8446_v11 = vpop.f32.mrb[34].mxu1 }
0x18a3   :  { %v2978_v52 = vpop.f32.mrb[35].mxu1  ;;  %v2984_v54 = vadd.f32 %v8446_v11, %v2911_v50 }
0x18a4   :  { %v2979_v53 = vadd.f32 %v2978_v52, %v2911_v50  ;;  %v9201_v52 = vpack.c.bf16 %v3586_v48, %v3585_v47 }
0x18a6   :  { %8473 = vmatprep.mubr.msk.f32.mxu0 %vm336_vm1, %v2979_v53  ;;  %v3509_v53 = vrot.slane %v9977_v32, %v9856_v63 }
0x18a7   :  { %8474 = vmatmul.mubr.msk.f32.vlgmr.msra.gmra.mrb[24].mxu0 %vm336_vm1, %v2984_v54  ;;  %v3587_v54 = vld [vmem:[#allocation2 + $0x3d8] sm:$0xff] }
0x18a8   :  { %8484 = vmatpush3.msra.mxu0 %v3339_v26 }
0x18a9   :  { %8488 = vmatprep.subr.mxu0 %v2903_v45 }
0x18aa   :  { %v8468_v55 = vpop.f32.mrb[36].mxu1 }
0x18ab   :  { %v3140_v56 = vpop.f32.mrb[37].mxu1 }
0x18ac   :  { %v9189_v57 = vpack.c.bf16 %v8468_v55, %v3140_v56  ;;  %v3588_v55 = vld [vmem:[#allocation2 + $0x3e0] sm:$0xff] }
0x18ae   :  { %9190 = vmatprep.subr.bf16.mxu1 %v9189_v57 }
0x18af   :  { %9192 = vmatpush3.bf16.msra.mxu1 %v9189_v57 }
0x18b0   :  { %9194 = vmatprep.subr.bf16.mxu1 %v9193_v23 }
0x197a   :  { %v8475_v58 = vpop.f32.mrb[24].mxu0 }
0x197b   :  { %v3233_v62 = vadd.f32 %v9675_v61, %v8475_v58  ;;  %v3227_v4 = vpop.f32.mrb[25].mxu0  ;;  %v9205_v61 = vpack.c.bf16 %v3588_v55, %v3587_v54  ;;  %v4189_v54 = vld [vmem:[#allocation2 + $0x460] sm:$0xff]  ;;  %v4190_v55 = vld [vmem:[#allocation2 + $0x468] sm:$0xff] }
0x197c   :  { %v3228_v6 = vadd.f32 %v9676_v5, %v3227_v4 }
0x197d   :  { %v3239_v7 = vsel %vm424_vm3, %v3233_v62, -inf }
0x197e   :  { %3240 = vmax.xlane.f32.xlu1 %v3239_v7  ;;  %v3236_v9 = vsel %vm424_vm3, %v3228_v6, -inf }
0x197f   :  { %3237 = vmax.xlane.f32.xlu0 %v3236_v9 }
0x1a0b   :  { %v3241_v13 = vpop.xlane.xlu1 %3240 }
0x1a0c   :  { %v3243_v3 = vsub.f32 %v3233_v62, %v3241_v13  ;;  %v3238_v14 = vpop.xlane.xlu0 %3237 }
0x1a0d   :  { %v3242_v15 = vsub.f32 %v3228_v6, %v3238_v14 }
0x1a0e   :  { %v3246_v16 = vmul.f32 1.442695, %v3243_v3 }
0x1a0f   :  { %v3244_v18 = vmul.f32 1.442695, %v3242_v15  ;;  %v9677_v15 = vld [vmem:[#allocation2 + $0x28] sm:$0xff] }
0x1a10   :  { %9585 = vpow2.f32 %v3246_v16 }
0x1a11   :  { %9587 = vpow2.f32 %v3244_v18 }
0x1a1a   :  { %v9586_v19 = vpop.eup %9585 }
0x1a1b   :  { %v9588_v1 = vpop.eup %9587  ;;  %v3251_v20 = vsel %vm424_vm3, %v9586_v19, 0.0 }
0x1a1c   :  { %3252 = vadd.xlane.f32.xlu1 %v3251_v20  ;;  %v3248_v21 = vsel %vm424_vm3, %v9588_v1, 0.0 }
0x1a1d   :  { %3249 = vadd.xlane.f32.xlu0 %v3248_v21 }
0x1aa9   :  { %v3253_v27 = vpop.xlane.xlu1 %3252 }
0x1aaa   :  { %9589 = vrcp.f32 %v3253_v27  ;;  %v3250_v28 = vpop.xlane.xlu0 %3249 }
0x1aab   :  { %9591 = vrcp.f32 %v3250_v28 }
0x1ab4   :  { %v9590_v29 = vpop.eup %9589 }
0x1ab5   :  { %v9592_v51 = vpop.eup %9591  ;;  %v3257_v33 = vmul.f32 %v9590_v29, %v9586_v19  ;;  %v9678_v19 = vld [vmem:[#allocation2 + $0x20] sm:$0xff] }
0x1ab6   :  { %v3255_v35 = vmul.f32 %v9592_v51, %v9588_v1 }
0x1ab8   :  { %8480 = vmatprep.mubr.msk.f32.mxu1 %vm424_vm3, %v3255_v35  ;;  %v4021_v35 = vld [vmem:[#allocation2 + $0x410] sm:$0xff] }
0x1ab9   :  { %8481 = vmatmul.mubr.msk.f32.vlgmr.msra.gmra.mrb[38].mxu1 %vm424_vm3, %v3257_v33  ;;  %v4022_v33 = vld [vmem:[#allocation2 + $0x418] sm:$0xff] }
0x1aba   :  { %9196 = vmatpush3.bf16.msra.mxu1 %v9193_v23  ;;  %8501 = vmatprep.mubr.msk.f32.mxu1 %vm44_vm0, %v9961_v24 }
0x1abb   :  { %9198 = vmatprep.subr.bf16.mxu1 %v9197_v34 }
0x1abe   :  { %9200 = vmatpush3.bf16.msra.mxu1 %v9197_v34  ;;  %v9227_v34 = vpack.c.bf16 %v4022_v33, %v4021_v35 }
0x1abf   :  { %9210 = vmatprep.subr.bf16.mxu1 %v9209_v41 }
0x1ac1   :  { %8502 = vmatmul.mubr.msk.f32.vlgmr.msra.gmra.mrb[40].mxu1 %vm44_vm0, %v9963_v25 }
0x1ac2   :  { %9212 = vmatpush3.bf16.msra.mxu1 %v9209_v41  ;;  %8523 = vmatprep.mubr.msk.f32.mxu1 %vm44_vm0, %v9961_v24 }
0x1ac3   :  { %9214 = vmatprep.subr.bf16.mxu1 %v9213_v44 }
0x1ac6   :  { %9216 = vmatpush3.bf16.msra.mxu1 %v9213_v44  ;;  %v4024_v44 = vld [vmem:[#allocation2 + $0x428] sm:$0xff] }
0x1ac9   :  { %8524 = vmatmul.mubr.msk.f32.vlgmr.msra.gmra.mrb[42].mxu1 %vm44_vm0, %v9963_v25 }
0x1b8c   :  { %v8482_v50 = vpop.f32.mrb[38].mxu1 }
0x1b8d   :  { %v3330_v11 = vpop.f32.mrb[39].mxu1 }
0x1b8e   :  { %8485 = vmatprep.mubr.msk.f32.mxu0 %vm336_vm1, %v3330_v11  ;;  %v4187_v11 = vld [vmem:[#allocation2 + $0x450] sm:$0xff] }
0x1b8f   :  { %8486 = vmatmul.mubr.msk.f32.vlgmr.msra.gmra.mrb[26].mxu0 %vm336_vm1, %v8482_v50  ;;  %v9231_v50 = vpack.c.bf16 %v4024_v44, %v4023_v43 }
0x1b90   :  { %8489 = vmatpush3.msra.mxu0 %v2903_v45  ;;  %8490 = vmatprep.mubr.msk.f32.mxu0 %vm336_vm1, %v10015_v49 }
0x1b91   :  { %9202 = vmatprep.subr.bf16.mxu0 %v9201_v52 }
0x1b94   :  { %v8503_v56 = vpop.f32.mrb[40].mxu1 }
0x1b95   :  { %v3582_v57 = vadd.f32 %v8503_v56, %v3509_v53  ;;  %v3576_v58 = vpop.f32.mrb[41].mxu1  ;;  %v9247_v56 = vpack.c.bf16 %v4190_v55, %v4189_v54 }
0x1b96   :  { %v3577_v4 = vadd.f32 %v3576_v58, %v3509_v53  ;;  %v4105_v58 = vld [vmem:[#allocation2 + $0x438] sm:$0xff] }
0x1b97   :  { %8491 = vmatmul.mubr.msk.f32.vlgmr.msra.gmra.mrb[26].mxu0 %vm336_vm1, %v10013_v10  ;;  %v3592_v10 = vrot.slane %v9977_v32, %v9872_v17 }
0x1b98   :  { %9204 = vmatpush3.bf16.msra.mxu0 %v9201_v52  ;;  %8512 = vmatprep.mubr.msk.f32.mxu0 %vm44_vm0, %v9961_v24  ;;  %v4188_v52 = vld [vmem:[#allocation2 + $0x458] sm:$0xff] }
0x1b99   :  { %9206 = vmatprep.subr.bf16.mxu0 %v9205_v61  ;;  %v9243_v53 = vpack.c.bf16 %v4188_v52, %v4187_v11 }
0x1b9c   :  { %9208 = vmatpush3.bf16.msra.mxu0 %v9205_v61  ;;  %v8525_v49 = vpop.f32.mrb[42].mxu1 }
0x1b9d   :  { %v3738_v62 = vpop.f32.mrb[43].mxu1 }
0x1b9e   :  { %v9223_v5 = vpack.c.bf16 %v8525_v49, %v3738_v62  ;;  %v4106_v49 = vld [vmem:[#allocation2 + $0x440] sm:$0xff]  ;;  %v4107_v62 = vld [vmem:[#allocation2 + $0x448] sm:$0xff] }
0x1b9f   :  { %8513 = vmatmul.mubr.msk.f32.vlgmr.msra.gmra.mrb[28].mxu0 %vm44_vm0, %v9963_v25 }
0x1ba0   :  { %8530 = vmatprep.mubr.msk.f32.mxu0 %vm336_vm1, %v3577_v4  ;;  %9224 = vmatprep.subr.bf16.mxu1 %v9223_v5 }
0x1ba1   :  { %9226 = vmatpush3.bf16.msra.mxu1 %v9223_v5 }
0x1ba2   :  { %9228 = vmatprep.subr.bf16.mxu1 %v9227_v34 }
0x1c72   :  { %v8514_v6 = vpop.f32.mrb[28].mxu0 }
0x1c73   :  { %v3665_v7 = vadd.f32 %v8514_v6, %v3592_v10  ;;  %v3659_v9 = vpop.f32.mrb[29].mxu0  ;;  %v4028_v6 = vrot.slane %v9977_v32, %v9896_v2 }
0x1c74   :  { %v3660_v13 = vadd.f32 %v3659_v9, %v3592_v10  ;;  %v9239_v10 = vpack.c.bf16 %v4107_v62, %v4106_v49 }
0x1c76   :  { %v9217_v3 = vpack.c.bf16 %v3665_v7, %v3660_v13 }
0x1c78   :  { %9219 = vmatprep.subr.msk.bf16.mxu0 %vm9800_vm2, %v9217_v3 }
0x1c79   :  { %9222 = vmatpush3.bf16.xpose.msk.msra.mxu0 %vm9800_vm2, %v9217_v3 }
0x1c7a   :  { %8540 = vmatprep.subr.mxu0 %v3937_v36 }
0x1c80   :  { %8531 = vmatmul.mubr.msk.f32.vlgmr.msra.gmra.mrb[30].mxu0 %vm336_vm1, %v3582_v57  ;;  %v4104_v57 = vld [vmem:[#allocation2 + $0x430] sm:$0xff] }
0x1c81   :  { %8541 = vmatpush3.msra.mxu0 %v3937_v36  ;;  %v9235_v61 = vpack.c.bf16 %v4105_v58, %v4104_v57 }
0x1c83   :  { %9236 = vmatprep.subr.bf16.mxu0 %v9235_v61 }
0x1d53   :  { %v8532_v14 = vpop.f32.mrb[30].mxu0 }
0x1d54   :  { %v3831_v16 = vadd.f32 %v9677_v15, %v8532_v14  ;;  %v3825_v18 = vpop.f32.mrb[31].mxu0 }
0x1d55   :  { %v3826_v1 = vadd.f32 %v9678_v19, %v3825_v18 }
0x1d56   :  { %v3837_v20 = vsel %vm424_vm3, %v3831_v16, -inf }
0x1d57   :  { %3838 = vmax.xlane.f32.xlu1 %v3837_v20  ;;  %v3834_v21 = vsel %vm424_vm3, %v3826_v1, -inf }
0x1d58   :  { %3835 = vmax.xlane.f32.xlu0 %v3834_v21 }
0x1de4   :  { %v3839_v0 = vpop.xlane.xlu1 %3838 }
0x1de5   :  { %v3841_v22 = vsub.f32 %v3831_v16, %v3839_v0  ;;  %v3836_v23 = vpop.xlane.xlu0 %3835  ;;  %v9679_v0 = vld [vmem:[#allocation2 + $0x38] sm:$0xff] }
0x1de6   :  { %v3840_v26 = vsub.f32 %v3826_v1, %v3836_v23 }
0x1de7   :  { %v3844_v27 = vmul.f32 1.442695, %v3841_v22 }
0x1de8   :  { %v3842_v28 = vmul.f32 1.442695, %v3840_v26  ;;  %v9680_v26 = vld [vmem:[#allocation2 + $0x30] sm:$0xff] }
0x1de9   :  { %9593 = vpow2.f32 %v3844_v27 }
0x1dea   :  { %9595 = vpow2.f32 %v3842_v28 }
0x1df3   :  { %v9594_v29 = vpop.eup %9593 }
0x1df4   :  { %v9596_v30 = vpop.eup %9595  ;;  %v3849_v31 = vsel %vm424_vm3, %v9594_v29, 0.0 }
0x1df5   :  { %3850 = vadd.xlane.f32.xlu1 %v3849_v31  ;;  %v3846_v51 = vsel %vm424_vm3, %v9596_v30, 0.0 }
0x1df6   :  { %3847 = vadd.xlane.f32.xlu0 %v3846_v51 }
0x1e82   :  { %v3851_v60 = vpop.xlane.xlu1 %3850 }
0x1e83   :  { %9597 = vrcp.f32 %v3851_v60  ;;  %v3848_v41 = vpop.xlane.xlu0 %3847 }
0x1e84   :  { %9599 = vrcp.f32 %v3848_v41 }
0x1e8d   :  { %v9598_v42 = vpop.eup %9597 }
0x1e8e   :  { %v9600_v45 = vpop.eup %9599  ;;  %v3855_v48 = vmul.f32 %v9598_v42, %v9594_v29  ;;  %v4456_v42 = vld [vmem:[#allocation2 + $0x470] sm:$0xff] }
0x1e8f   :  { %v3853_v47 = vmul.f32 %v9600_v45, %v9596_v30 }
0x1e91   :  { %8537 = vmatprep.mubr.msk.f32.mxu1 %vm424_vm3, %v3853_v47 }
0x1e92   :  { %8538 = vmatmul.mubr.msk.f32.vlgmr.msra.gmra.mrb[44].mxu1 %vm424_vm3, %v3855_v48 }
0x1e93   :  { %9230 = vmatpush3.bf16.msra.mxu1 %v9227_v34  ;;  %8553 = vmatprep.mubr.msk.f32.mxu1 %vm44_vm0, %v9961_v24 }
0x1e94   :  { %9232 = vmatprep.subr.bf16.mxu1 %v9231_v50 }
0x1e97   :  { %9234 = vmatpush3.bf16.msra.mxu1 %v9231_v50 }
0x1e98   :  { %9244 = vmatprep.subr.bf16.mxu1 %v9243_v53 }
0x1e9a   :  { %8554 = vmatmul.mubr.msk.f32.vlgmr.msra.gmra.mrb[46].mxu1 %vm44_vm0, %v9963_v25 }
0x1e9b   :  { %9246 = vmatpush3.bf16.msra.mxu1 %v9243_v53  ;;  %8575 = vmatprep.mubr.msk.f32.mxu1 %vm44_vm0, %v9961_v24  ;;  %v7632_v53 = vld [vmem:[#allocation2 + $0x480] ss:$0 sm:$0xff] }
0x1e9c   :  { %9248 = vmatprep.subr.bf16.mxu1 %v9247_v56 }
0x1e9f   :  { %9250 = vmatpush3.bf16.msra.mxu1 %v9247_v56 }
0x1ea2   :  { %8576 = vmatmul.mubr.msk.f32.vlgmr.msra.gmra.mrb[48].mxu1 %vm44_vm0, %v9963_v25 }
0x1f65   :  { %v8539_v4 = vpop.f32.mrb[44].mxu1 }
0x1f66   :  { %v3928_v5 = vpop.f32.mrb[45].mxu1 }
0x1f67   :  { %8542 = vmatprep.mubr.msk.f32.mxu0 %vm336_vm1, %v3928_v5 }
0x1f68   :  { %8543 = vmatmul.mubr.msk.f32.vlgmr.msra.gmra.mrb[26].mxu0 %vm336_vm1, %v8539_v4 }
0x1f69   :  { %9238 = vmatpush3.bf16.msra.mxu0 %v9235_v61  ;;  %8564 = vmatprep.mubr.msk.f32.mxu0 %vm44_vm0, %v9961_v24  ;;  %v4111_v24 = vrot.slane %v9977_v32, %v9908_v46 }
0x1f6a   :  { %9240 = vmatprep.subr.bf16.mxu0 %v9239_v10 }
0x1f6d   :  { %v8555_v7 = vpop.f32.mrb[46].mxu1  ;;  %9242 = vmatpush3.bf16.msra.mxu0 %v9239_v10 }
0x1f6e   :  { %v4101_v9 = vadd.f32 %v8555_v7, %v4028_v6  ;;  %v4095_v13 = vpop.f32.mrb[47].mxu1 }
0x1f6f   :  { %v4096_v3 = vadd.f32 %v4095_v13, %v4028_v6 }
0x1f70   :  { %8565 = vmatmul.mubr.msk.f32.vlgmr.msra.gmra.mrb[32].mxu0 %vm44_vm0, %v9963_v25 }
0x1f71   :  { %8582 = vmatprep.mubr.msk.f32.mxu0 %vm336_vm1, %v4096_v3 }
0x1f75   :  { %v8577_v14 = vpop.f32.mrb[48].mxu1 }
0x1f76   :  { %v4257_v15 = vpop.f32.mrb[49].mxu1 }
0x1f77   :  { %v9257_v16 = vpack.c.bf16 %v8577_v14, %v4257_v15 }
0x1f79   :  { %9258 = vmatprep.subr.bf16.mxu1 %v9257_v16 }
0x1f7a   :  { %9260 = vmatpush3.bf16.msra.mxu1 %v9257_v16  ;;  %v4589_v16 = vld [vmem:[#allocation2 + $0x490] sm:$0xff] }
0x2043   :  { %v8566_v18 = vpop.f32.mrb[32].mxu0 }
0x2044   :  { %v4184_v19 = vadd.f32 %v8566_v18, %v4111_v24  ;;  %v4178_v1 = vpop.f32.mrb[33].mxu0 }
0x2045   :  { %v4179_v20 = vadd.f32 %v4178_v1, %v4111_v24  ;;  %v4590_v24 = vld [vmem:[#allocation2 + $0x498] sm:$0xff] }
0x2046   :  { %v9261_v18 = vpack.c.bf16 %v4590_v24, %v4589_v16  ;;  %v4679_v1 = vld [vmem:[#allocation2 + $0x4b8] sm:$0xff]  ;;  %v5117_v16 = vld [vmem:[#allocation2 + $0x530] sm:$0xff] }
0x2047   :  { %v9251_v21 = vpack.c.bf16 %v4184_v19, %v4179_v20  ;;  %v4678_v19 = vld [vmem:[#allocation2 + $0x4b0] sm:$0xff] }
0x2048   :  { %v9269_v20 = vpack.c.bf16 %v4679_v1, %v4678_v19  ;;  %9262 = vmatprep.subr.bf16.mxu1 %v9261_v18  ;;  %v34_v1 = vld [vmem:[#allocation2 + $0x48] sm:$0xff] }
0x2049   :  { %9253 = vmatprep.subr.msk.bf16.mxu0 %vm9800_vm2, %v9251_v21 }
0x204a   :  { %9256 = vmatpush3.bf16.xpose.msk.msra.mxu0 %vm9800_vm2, %v9251_v21  ;;  %v4591_v21 = vld [vmem:[#allocation2 + $0x4a0] sm:$0xff] }
0x204b   :  { %8592 = vmatprep.subr.mxu0 %v4456_v42 }
0x2051   :  { %8583 = vmatmul.mubr.msk.f32.vlgmr.msra.gmra.mrb[34].mxu0 %vm336_vm1, %v4101_v9 }
0x2052   :  { %8593 = vmatpush3.msra.mxu0 %v4456_v42 }
0x2053   :  { %9270 = vmatprep.subr.bf16.mxu0 %v9269_v20 }
0x2124   :  { %v8584_v25 = vpop.f32.mrb[34].mxu0 }
0x2125   :  { %v4350_v22 = vadd.f32 %v9679_v0, %v8584_v25  ;;  %v4344_v23 = vpop.f32.mrb[35].mxu0  ;;  %v4592_v25 = vld [vmem:[#allocation2 + $0x4a8] sm:$0xff] }
0x2126   :  { %v4345_v27 = vadd.f32 %v9680_v26, %v4344_v23  ;;  %v9265_v0 = vpack.c.bf16 %v4592_v25, %v4591_v21  ;;  %v4681_v23 = vld [vmem:[#allocation2 + $0x4c8] sm:$0xff] }
0x2127   :  { %v4356_v32 = vsel %vm424_vm3, %v4350_v22, -inf }
0x2128   :  { %4357 = vmax.xlane.f32.xlu1 %v4356_v32  ;;  %v4353_v28 = vsel %vm424_vm3, %v4345_v27, -inf  ;;  %v4762_v32 = vld [vmem:[#allocation2 + $0x4d8] sm:$0xff] }
0x2129   :  { %4354 = vmax.xlane.f32.xlu0 %v4353_v28 }
0x21b5   :  { %v4358_v29 = vpop.xlane.xlu1 %4357 }
0x21b6   :  { %v4360_v30 = vsub.f32 %v4350_v22, %v4358_v29  ;;  %v4355_v31 = vpop.xlane.xlu0 %4354  ;;  %v4680_v22 = vld [vmem:[#allocation2 + $0x4c0] sm:$0xff] }
0x21b7   :  { %v4359_v51 = vsub.f32 %v4345_v27, %v4355_v31  ;;  %v9273_v26 = vpack.c.bf16 %v4681_v23, %v4680_v22  ;;  %v4761_v27 = vld [vmem:[#allocation2 + $0x4d0] sm:$0xff] }
0x21b8   :  { %v4363_v35 = vmul.f32 1.442695, %v4360_v30  ;;  %v9277_v28 = vpack.c.bf16 %v4762_v32, %v4761_v27 }
0x21b9   :  { %v4361_v33 = vmul.f32 1.442695, %v4359_v51 }
0x21ba   :  { %9601 = vpow2.f32 %v4363_v35 }
0x21bb   :  { %9603 = vpow2.f32 %v4361_v33 }
0x21c4   :  { %v9602_v34 = vpop.eup %9601 }
0x21c5   :  { %v9604_v36 = vpop.eup %9603  ;;  %v4368_v60 = vsel %vm424_vm3, %v9602_v34, 0.0 }
0x21c6   :  { %4369 = vadd.xlane.f32.xlu1 %v4368_v60  ;;  %v4365_v41 = vsel %vm424_vm3, %v9604_v36, 0.0 }
0x21c7   :  { %4366 = vadd.xlane.f32.xlu0 %v4365_v41 }
0x2253   :  { %v4370_v43 = vpop.xlane.xlu1 %4369 }
0x2254   :  { %9605 = vrcp.f32 %v4370_v43  ;;  %v4367_v44 = vpop.xlane.xlu0 %4366 }
0x2255   :  { %9607 = vrcp.f32 %v4367_v44 }
0x225e   :  { %v9606_v45 = vpop.eup %9605 }
0x225f   :  { %v9608_v47 = vpop.eup %9607  ;;  %v4374_v50 = vmul.f32 %v9606_v45, %v9602_v34  ;;  %v4549_v34 = vld [vmem:[#allocation2 + $0x488] sm:$0x3] }
0x2260   :  { %v4372_v48 = vmul.f32 %v9608_v47, %v9604_v36  ;;  %v4579_v36 = vrot.slane %v4549_v34, %v9762_v37  ;;  %v4585_v43 = vrot.slane %v4549_v34, %v9765_v39 }
0x2262   :  { %8589 = vmatprep.mubr.msk.f32.mxu1 %vm424_vm3, %v4372_v48  ;;  %v4763_v48 = vld [vmem:[#allocation2 + $0x4e0] sm:$0xff] }
0x2263   :  { %8590 = vmatmul.mubr.msk.f32.vlgmr.msra.gmra.mrb[50].mxu1 %vm424_vm3, %v4374_v50  ;;  %v4764_v50 = vld [vmem:[#allocation2 + $0x4e8] sm:$0xff] }
0x2264   :  { %9264 = vmatpush3.bf16.msra.mxu1 %v9261_v18 }
0x2265   :  { %9266 = vmatprep.subr.bf16.mxu1 %v9265_v0 }
0x2268   :  { %9268 = vmatpush3.bf16.msra.mxu1 %v9265_v0 }
0x2269   :  { %9278 = vmatprep.subr.bf16.mxu1 %v9277_v28 }
0x2336   :  { %v8591_v11 = vpop.f32.mrb[50].mxu1 }
0x2337   :  { %v4447_v52 = vpop.f32.mrb[51].mxu1 }
0x2338   :  { %8594 = vmatprep.mubr.msk.f32.mxu0 %vm336_vm1, %v4447_v52 }
0x2339   :  { %8595 = vmatmul.mubr.msk.f32.vlgmr.msra.gmra.mrb[26].mxu0 %vm336_vm1, %v8591_v11 }
0x233a   :  { %9272 = vmatpush3.bf16.msra.mxu0 %v9269_v20  ;;  %v33_v20 = vld [vmem:[#allocation2 + $0x40] sm:$0xff] }
0x233b   :  { %9274 = vmatprep.subr.bf16.mxu0 %v9273_v26 }
0x233e   :  { %9276 = vmatpush3.bf16.msra.mxu0 %v9273_v26 }
0x240c   :  { %v8596_v54 = vpop.f32.mrb[26].mxu0 }
0x240d   :  { %v4546_v55 = vadd.f32 %v8596_v54, %v7632_v53  ;;  %v4529_v56 = vpop.f32.mrb[27].mxu0  ;;  %v10125_v54 = vld [vmem:[#allocation2 + $0x630] sm:$0xff] }
0x240e   :  { %v4545_v57 = vadd.f32 %v7632_v53, %v4529_v56  ;;  %v9281_v53 = vpack.c.bf16 %v4764_v50, %v4763_v48  ;;  %v4596_v56 = vrot.slane %v10125_v54, %v9762_v37  ;;  %v5121_v27 = vrot.slane %v10125_v54, %v9810_v12 }
0x240f   :  { %v10094_v58 = vadd.f32 %v4546_v55, %v9946_v38  ;;  %v4685_v55 = vrot.slane %v10125_v54, %v9790_v59 }
0x2410   :  { %v10097_v61 = vadd.f32 %v4545_v57, %v9949_v40 }
0x2411   :  { %v4553_v49 = vsel %vm44_vm0, %v10094_v58, 0.0 }
0x2412   :  { %4554 = vadd.xlane.f32.xlu1 %v4553_v49  ;;  %v4550_v62 = vsel %vm44_vm0, %v10097_v61, 0.0 }
0x2413   :  { %4551 = vadd.xlane.f32.xlu0 %v4550_v62 }
0x249f   :  { %v4555_v4 = vpop.xlane.xlu1 %4554 }
0x24a0   :  { %v4557_v5 = vmul.f32 0.03125, %v4555_v4  ;;  %v4552_v10 = vpop.xlane.xlu0 %4551 }
0x24a1   :  { %v4556_v6 = vmul.f32 0.03125, %v4552_v10  ;;  %v5114_v10 = vld [vmem:[#allocation2 + $0x518] sm:$0xff] }
0x24a2   :  { %v4559_v7 = vsub.f32 %v10094_v58, %v4557_v5 }
0x24a3   :  { %v4558_v9 = vsub.f32 %v10097_v61, %v4556_v6  ;;  %v5115_v6 = vld [vmem:[#allocation2 + $0x520] sm:$0xff] }
0x24a4   :  { %v4561_v13 = vmul.f32 %v4559_v7, %v4559_v7 }
0x24a5   :  { %v4560_v3 = vmul.f32 %v4558_v9, %v4558_v9 }
0x24a6   :  { %v4565_v14 = vsel %vm44_vm0, %v4561_v13, 0.0 }
0x24a7   :  { %4566 = vadd.xlane.f32.xlu1 %v4565_v14  ;;  %v4562_v15 = vsel %vm44_vm0, %v4560_v3, 0.0  ;;  %v9303_v3 = vpack.c.bf16 %v5115_v6, %v5114_v10  ;;  %v5198_v10 = vld [vmem:[#allocation2 + $0x540] sm:$0xff] }
0x24a8   :  { %4563 = vadd.xlane.f32.xlu0 %v4562_v15  ;;  %v5116_v15 = vld [vmem:[#allocation2 + $0x528] sm:$0xff] }
0x24a9   :  { %v9307_v19 = vpack.c.bf16 %v5117_v16, %v5116_v15 }
0x2534   :  { %v4567_v29 = vpop.xlane.xlu1 %4566 }
0x2535   :  { %v4569_v30 = vmul.f32 0.03125, %v4567_v29  ;;  %v4564_v31 = vpop.xlane.xlu0 %4563 }
0x2536   :  { %v4568_v51 = vmul.f32 0.03125, %v4564_v31 }
0x2537   :  { %v4571_v35 = vadd.f32 1e-05, %v4569_v30 }
0x2538   :  { %v4570_v33 = vadd.f32 1e-05, %v4568_v51 }
0x2539   :  { %9609 = vrsqrt.f32 %v4571_v35 }
0x253a   :  { %9611 = vrsqrt.f32 %v4570_v33 }
0x2543   :  { %v9610_v60 = vpop.eup %9609 }
0x2544   :  { %v9612_v41 = vpop.eup %9611  ;;  %v4575_v42 = vmul.f32 %v9610_v60, %v4559_v7 }
0x2545   :  { %v4574_v44 = vmul.f32 %v9612_v41, %v4558_v9 }
0x2546   :  { %v4581_v45 = vmul.f32 %v4579_v36, %v4575_v42 }
0x2547   :  { %v4580_v47 = vmul.f32 %v4579_v36, %v4574_v44  ;;  %v5031_v44 = vld [vmem:[#allocation2 + $0x4f8] sm:$0xff] }
0x2548   :  { %v10111_v52 = vadd.f32 %v4585_v43, %v4581_v45  ;;  %v5032_v45 = vld [vmem:[#allocation2 + $0x500] sm:$0xff] }
0x2549   :  { %v10109_v11 = vadd.f32 %v4585_v43, %v4580_v47  ;;  %v9295_v47 = vpack.c.bf16 %v5032_v45, %v5031_v44 }
0x254b   :  { %8605 = vmatprep.mubr.msk.f32.mxu1 %vm44_vm0, %v10109_v11  ;;  %8616 = vmatprep.mubr.msk.f32.mxu0 %vm44_vm0, %v10109_v11 }
0x254c   :  { %8606 = vmatmul.mubr.msk.f32.vlgmr.msra.gmra.mrb[52].mxu1 %vm44_vm0, %v10111_v52  ;;  %8617 = vmatmul.mubr.msk.f32.vlgmr.msra.gmra.mrb[36].mxu0 %vm44_vm0, %v10111_v52 }
0x254d   :  { %9280 = vmatpush3.bf16.msra.mxu1 %v9277_v28  ;;  %8627 = vmatprep.mubr.msk.f32.mxu1 %vm44_vm0, %v10109_v11 }
0x254e   :  { %9282 = vmatprep.subr.bf16.mxu1 %v9281_v53 }
0x2551   :  { %9284 = vmatpush3.bf16.msra.mxu1 %v9281_v53 }
0x2554   :  { %8628 = vmatmul.mubr.msk.f32.vlgmr.msra.gmra.mrb[54].mxu1 %vm44_vm0, %v10111_v52 }
0x261f   :  { %v8607_v57 = vpop.f32.mrb[52].mxu1  ;;  %v8618_v49 = vpop.f32.mrb[36].mxu0 }
0x2620   :  { %v4758_v62 = vadd.f32 %v8618_v49, %v4685_v55  ;;  %v4669_v4 = vpop.f32.mrb[53].mxu1  ;;  %v4752_v5 = vpop.f32.mrb[37].mxu0  ;;  %v4675_v18 = vadd.f32 %v8607_v57, %v4596_v56 }
0x2621   :  { %v4670_v7 = vadd.f32 %v4669_v4, %v4596_v56  ;;  %v4753_v9 = vadd.f32 %v4752_v5, %v4685_v55  ;;  %v5033_v55 = vld [vmem:[#allocation2 + $0x508] sm:$0xff]  ;;  %v5034_v56 = vld [vmem:[#allocation2 + $0x510] sm:$0xff]  ;;  %v5197_v5 = vld [vmem:[#allocation2 + $0x538] sm:$0xff] }
0x2622   :  { %v9299_v4 = vpack.c.bf16 %v5034_v56, %v5033_v55  ;;  %v9311_v6 = vpack.c.bf16 %v5198_v10, %v5197_v5  ;;  %v5797_v5 = vld [vmem:[#allocation2 + $0x5b0] sm:$0xff]  ;;  %v5798_v10 = vld [vmem:[#allocation2 + $0x5b8] sm:$0xff] }
0x2623   :  { %v9285_v13 = vpack.c.bf16 %v4758_v62, %v4753_v9  ;;  %8634 = vmatprep.mubr.msk.f32.mxu0 %vm336_vm1, %v4670_v7  ;;  %v5199_v7 = vld [vmem:[#allocation2 + $0x548] sm:$0xff]  ;;  %v5200_v9 = vld [vmem:[#allocation2 + $0x550] sm:$0xff] }
0x2625   :  { %9287 = vmatprep.subr.msk.bf16.mxu0 %vm9800_vm2, %v9285_v13 }
0x2626   :  { %9290 = vmatpush3.bf16.xpose.msk.msra.mxu0 %vm9800_vm2, %v9285_v13  ;;  %v9315_v13 = vpack.c.bf16 %v5200_v9, %v5199_v7  ;;  %v5030_v7 = vld [vmem:[#allocation2 + $0x4f0] sm:$0xff]  ;;  %v5712_v9 = vld [vmem:[#allocation2 + $0x580] sm:$0xff] }
0x2627   :  { %v8629_v59 = vpop.f32.mrb[54].mxu1  ;;  %9304 = vmatprep.subr.bf16.mxu0 %v9303_v3 }
0x2628   :  { %v4831_v14 = vpop.f32.mrb[55].mxu1 }
0x2629   :  { %v9291_v24 = vpack.c.bf16 %v8629_v59, %v4831_v14  ;;  %v5038_v14 = vrot.slane %v10125_v54, %v9765_v39 }
0x262b   :  { %9292 = vmatprep.subr.bf16.mxu1 %v9291_v24 }
0x262c   :  { %9294 = vmatpush3.bf16.msra.mxu1 %v9291_v24 }
0x262d   :  { %8635 = vmatmul.mubr.msk.f32.vlgmr.msra.gmra.mrb[38].mxu0 %vm336_vm1, %v4675_v18  ;;  %9296 = vmatprep.subr.bf16.mxu1 %v9295_v47 }
0x262e   :  { %9306 = vmatpush3.bf16.msra.mxu0 %v9303_v3  ;;  %8663 = vmatprep.mubr.msk.f32.mxu0 %vm44_vm0, %v10109_v11 }
0x262f   :  { %9308 = vmatprep.subr.bf16.mxu0 %v9307_v19 }
0x2632   :  { %9310 = vmatpush3.bf16.msra.mxu0 %v9307_v19 }
0x2635   :  { %8664 = vmatmul.mubr.msk.f32.vlgmr.msra.gmra.mrb[40].mxu0 %vm44_vm0, %v10111_v52 }
0x2700   :  { %v8636_v21 = vpop.f32.mrb[38].mxu0 }
0x2701   :  { %v4924_v25 = vadd.f32 %v8636_v21, %v34_v1  ;;  %v4918_v0 = vpop.f32.mrb[39].mxu0  ;;  %v36_v21 = vld [vmem:[#allocation2 + $0x58] sm:$0xff] }
0x2702   :  { %v4919_v22 = vadd.f32 %v4918_v0, %v33_v20 }
0x2703   :  { %v4930_v23 = vsel %vm424_vm3, %v4924_v25, -inf }
0x2704   :  { %4931 = vmax.xlane.f32.xlu1 %v4930_v23  ;;  %v4927_v26 = vsel %vm424_vm3, %v4919_v22, -inf }
0x2705   :  { %4928 = vmax.xlane.f32.xlu0 %v4927_v26 }
0x2708   :  { %v8665_v32 = vpop.f32.mrb[40].mxu0 }
0x2709   :  { %v5194_v28 = vadd.f32 %v8665_v32, %v5121_v27  ;;  %v5188_v29 = vpop.f32.mrb[41].mxu0 }
0x270a   :  { %v5189_v30 = vadd.f32 %v5188_v29, %v5121_v27 }
0x270c   :  { %v9319_v31 = vpack.c.bf16 %v5194_v28, %v5189_v30 }
0x270e   :  { %9321 = vmatprep.subr.msk.bf16.mxu0 %vm9800_vm2, %v9319_v31 }
0x270f   :  { %9324 = vmatpush3.bf16.xpose.msk.msra.mxu0 %vm9800_vm2, %v9319_v31 }
0x2791   :  { %v4932_v51 = vpop.xlane.xlu1 %4931 }
0x2792   :  { %v4934_v35 = vsub.f32 %v4924_v25, %v4932_v51  ;;  %v4929_v33 = vpop.xlane.xlu0 %4928  ;;  %v35_v25 = vld [vmem:[#allocation2 + $0x50] sm:$0xff] }
0x2793   :  { %v4933_v34 = vsub.f32 %v4919_v22, %v4929_v33 }
0x2794   :  { %v4937_v36 = vmul.f32 1.442695, %v4934_v35 }
0x2795   :  { %v4935_v60 = vmul.f32 1.442695, %v4933_v34 }
0x2796   :  { %9613 = vpow2.f32 %v4937_v36 }
0x2797   :  { %9615 = vpow2.f32 %v4935_v60 }
0x27a0   :  { %v9614_v12 = vpop.eup %9613 }
0x27a1   :  { %v9616_v41 = vpop.eup %9615  ;;  %v4942_v42 = vsel %vm424_vm3, %v9614_v12, 0.0 }
0x27a2   :  { %4943 = vadd.xlane.f32.xlu1 %v4942_v42  ;;  %v4939_v43 = vsel %vm424_vm3, %v9616_v41, 0.0 }
0x27a3   :  { %4940 = vadd.xlane.f32.xlu0 %v4939_v43  ;;  %v5466_v43 = vld [vmem:[#allocation2 + $0x558] sm:$0xff] }
0x27a4   :  { %8691 = vmatprep.subr.mxu0 %v5466_v43 }
0x282f   :  { %v4944_v48 = vpop.xlane.xlu1 %4943 }
0x2830   :  { %9617 = vrcp.f32 %v4944_v48  ;;  %v4941_v50 = vpop.xlane.xlu0 %4940  ;;  %v5631_v48 = vld [vmem:[#allocation2 + $0x570] sm:$0xff] }
0x2831   :  { %9619 = vrcp.f32 %v4941_v50  ;;  %v5632_v50 = vld [vmem:[#allocation2 + $0x578] sm:$0xff] }
0x283a   :  { %v9618_v53 = vpop.eup %9617 }
0x283b   :  { %v9620_v57 = vpop.eup %9619  ;;  %v4948_v62 = vmul.f32 %v9618_v53, %v9614_v12  ;;  %v5629_v12 = vld [vmem:[#allocation2 + $0x560] sm:$0xff] }
0x283c   :  { %v4946_v49 = vmul.f32 %v9620_v57, %v9616_v41  ;;  %v5630_v41 = vld [vmem:[#allocation2 + $0x568] sm:$0xff]  ;;  %v9333_v57 = vpack.c.bf16 %v5632_v50, %v5631_v48 }
0x283d   :  { %v9329_v42 = vpack.c.bf16 %v5630_v41, %v5629_v12  ;;  %v6148_v50 = vld [vmem:[#allocation2 + $0x5c8] sm:$0xff] }
0x283e   :  { %8641 = vmatprep.mubr.msk.f32.mxu1 %vm424_vm3, %v4946_v49  ;;  %v5795_v49 = vld [vmem:[#allocation2 + $0x5a0] sm:$0xff] }
0x283f   :  { %8642 = vmatmul.mubr.msk.f32.vlgmr.msra.gmra.mrb[56].mxu1 %vm424_vm3, %v4948_v62  ;;  %v5796_v62 = vld [vmem:[#allocation2 + $0x5a8] sm:$0xff] }
0x2840   :  { %9298 = vmatpush3.bf16.msra.mxu1 %v9295_v47  ;;  %8652 = vmatprep.mubr.msk.f32.mxu1 %vm44_vm0, %v10109_v11 }
0x2841   :  { %9300 = vmatprep.subr.bf16.mxu1 %v9299_v4 }
0x2844   :  { %9302 = vmatpush3.bf16.msra.mxu1 %v9299_v4  ;;  %v9345_v4 = vpack.c.bf16 %v5796_v62, %v5795_v49 }
0x2845   :  { %9312 = vmatprep.subr.bf16.mxu1 %v9311_v6 }
0x2847   :  { %8653 = vmatmul.mubr.msk.f32.vlgmr.msra.gmra.mrb[58].mxu1 %vm44_vm0, %v10111_v52 }
0x2848   :  { %9314 = vmatpush3.bf16.msra.mxu1 %v9311_v6  ;;  %8674 = vmatprep.mubr.msk.f32.mxu1 %vm44_vm0, %v10109_v11  ;;  %v9349_v6 = vpack.c.bf16 %v5798_v10, %v5797_v5  ;;  %v6151_v5 = vld [vmem:[#allocation2 + $0x5e0] sm:$0xff] }
0x2849   :  { %9316 = vmatprep.subr.bf16.mxu1 %v9315_v13 }
0x284c   :  { %9318 = vmatpush3.bf16.msra.mxu1 %v9315_v13  ;;  %v5713_v13 = vld [vmem:[#allocation2 + $0x588] sm:$0xff] }
0x284f   :  { %8675 = vmatmul.mubr.msk.f32.vlgmr.msra.gmra.mrb[60].mxu1 %vm44_vm0, %v10111_v52 }
0x2912   :  { %v10161_v3 = vpop.f32.mrb[56].mxu1 }
0x2913   :  { %v10163_v59 = vpop.f32.mrb[57].mxu1 }
0x291a   :  { %v8654_v15 = vpop.f32.mrb[58].mxu1 }
0x291b   :  { %v5105_v16 = vpop.f32.mrb[59].mxu1  ;;  %v5111_v18 = vadd.f32 %v8654_v15, %v5038_v14 }
0x291c   :  { %v5106_v24 = vadd.f32 %v5105_v16, %v5038_v14  ;;  %v9337_v16 = vpack.c.bf16 %v5713_v13, %v5712_v9  ;;  %v6314_v13 = vld [vmem:[#allocation2 + $0x608] sm:$0xff] }
0x291e   :  { %8681 = vmatprep.mubr.msk.f32.mxu0 %vm336_vm1, %v5106_v24  ;;  %v5636_v24 = vrot.slane %v10125_v54, %v9856_v63 }
0x291f   :  { %8682 = vmatmul.mubr.msk.f32.vlgmr.msra.gmra.mrb[42].mxu0 %vm336_vm1, %v5111_v18  ;;  %v5714_v18 = vld [vmem:[#allocation2 + $0x590] sm:$0xff] }
0x2920   :  { %8692 = vmatpush3.msra.mxu0 %v5466_v43 }
0x2921   :  { %8696 = vmatprep.subr.mxu0 %v5030_v7 }
0x2922   :  { %v8676_v19 = vpop.f32.mrb[60].mxu1 }
0x2923   :  { %v5267_v1 = vpop.f32.mrb[61].mxu1 }
0x2924   :  { %v9325_v20 = vpack.c.bf16 %v8676_v19, %v5267_v1  ;;  %v5715_v19 = vld [vmem:[#allocation2 + $0x598] sm:$0xff] }
0x2926   :  { %9326 = vmatprep.subr.bf16.mxu1 %v9325_v20 }
0x2927   :  { %9328 = vmatpush3.bf16.msra.mxu1 %v9325_v20 }
0x2928   :  { %9330 = vmatprep.subr.bf16.mxu1 %v9329_v42 }
0x29f2   :  { %v8683_v0 = vpop.f32.mrb[42].mxu0 }
0x29f3   :  { %v5360_v22 = vadd.f32 %v8683_v0, %v36_v21  ;;  %v5354_v23 = vpop.f32.mrb[43].mxu0 }
0x29f4   :  { %v5355_v26 = vadd.f32 %v5354_v23, %v35_v25  ;;  %v9341_v25 = vpack.c.bf16 %v5715_v19, %v5714_v18  ;;  %v6231_v19 = vld [vmem:[#allocation2 + $0x5e8] sm:$0xff] }
0x29f5   :  { %v5366_v27 = vsel %vm424_vm3, %v5360_v22, -inf }
0x29f6   :  { %5367 = vmax.xlane.f32.xlu1 %v5366_v27  ;;  %v5363_v32 = vsel %vm424_vm3, %v5355_v26, -inf }
0x29f7   :  { %5364 = vmax.xlane.f32.xlu0 %v5363_v32 }
0x2a83   :  { %v5368_v28 = vpop.xlane.xlu1 %5367 }
0x2a84   :  { %v5370_v29 = vsub.f32 %v5360_v22, %v5368_v28  ;;  %v5365_v30 = vpop.xlane.xlu0 %5364 }
0x2a85   :  { %v5369_v31 = vsub.f32 %v5355_v26, %v5365_v30  ;;  %v37_v30 = vld [vmem:[#allocation2 + $0x60] sm:$0xff] }
0x2a86   :  { %v5373_v51 = vmul.f32 1.442695, %v5370_v29  ;;  %v38_v29 = vld [vmem:[#allocation2 + $0x68] sm:$0xff] }
0x2a87   :  { %v5371_v35 = vmul.f32 1.442695, %v5369_v31 }
0x2a88   :  { %9621 = vpow2.f32 %v5373_v51 }
0x2a89   :  { %9623 = vpow2.f32 %v5371_v35 }
0x2a92   :  { %v9622_v33 = vpop.eup %9621 }
0x2a93   :  { %v9624_v34 = vpop.eup %9623  ;;  %v5378_v36 = vsel %vm424_vm3, %v9622_v33, 0.0 }
0x2a94   :  { %5379 = vadd.xlane.f32.xlu1 %v5378_v36  ;;  %v5375_v60 = vsel %vm424_vm3, %v9624_v34, 0.0 }
0x2a95   :  { %5376 = vadd.xlane.f32.xlu0 %v5375_v60 }
0x2b21   :  { %v5380_v44 = vpop.xlane.xlu1 %5379 }
0x2b22   :  { %9625 = vrcp.f32 %v5380_v44  ;;  %v5377_v45 = vpop.xlane.xlu0 %5376 }
0x2b23   :  { %9627 = vrcp.f32 %v5377_v45 }
0x2b2c   :  { %v9626_v47 = vpop.eup %9625 }
0x2b2d   :  { %v9628_v53 = vpop.eup %9627  ;;  %v5384_v56 = vmul.f32 %v9626_v47, %v9622_v33 }
0x2b2e   :  { %v5382_v55 = vmul.f32 %v9628_v53, %v9624_v34  ;;  %v6149_v53 = vld [vmem:[#allocation2 + $0x5d0] sm:$0xff] }
0x2b30   :  { %8688 = vmatprep.mubr.msk.f32.mxu1 %vm424_vm3, %v5382_v55  ;;  %v9363_v55 = vpack.c.bf16 %v6149_v53, %v6148_v50  ;;  %v6583_v53 = vld [vmem:[#allocation2 + $0x628] sm:$0xff] }
0x2b31   :  { %8689 = vmatmul.mubr.msk.f32.vlgmr.msra.gmra.mrb[62].mxu1 %vm424_vm3, %v5384_v56  ;;  %v6064_v56 = vld [vmem:[#allocation2 + $0x5c0] sm:$0xff] }
0x2b32   :  { %9332 = vmatpush3.bf16.msra.mxu1 %v9329_v42  ;;  %8709 = vmatprep.mubr.msk.f32.mxu1 %vm44_vm0, %v10109_v11 }
0x2b33   :  { %9334 = vmatprep.subr.bf16.mxu1 %v9333_v57 }
0x2b36   :  { %9336 = vmatpush3.bf16.msra.mxu1 %v9333_v57 }
0x2b37   :  { %9346 = vmatprep.subr.bf16.mxu1 %v9345_v4 }
0x2b39   :  { %8710 = vmatmul.mubr.msk.f32.vlgmr.msra.gmra.mrb[64].mxu1 %vm44_vm0, %v10111_v52 }
0x2b3a   :  { %9348 = vmatpush3.bf16.msra.mxu1 %v9345_v4  ;;  %8731 = vmatprep.mubr.msk.f32.mxu1 %vm44_vm0, %v10109_v11  ;;  %v6150_v4 = vld [vmem:[#allocation2 + $0x5d8] sm:$0xff] }
0x2b3b   :  { %9350 = vmatprep.subr.bf16.mxu1 %v9349_v6  ;;  %v9367_v9 = vpack.c.bf16 %v6151_v5, %v6150_v4 }
0x2b3e   :  { %9352 = vmatpush3.bf16.msra.mxu1 %v9349_v6 }
0x2b41   :  { %8732 = vmatmul.mubr.msk.f32.vlgmr.msra.gmra.mrb[66].mxu1 %vm44_vm0, %v10111_v52 }
0x2c04   :  { %v8690_v14 = vpop.f32.mrb[62].mxu1 }
0x2c05   :  { %v5457_v15 = vpop.f32.mrb[63].mxu1 }
0x2c06   :  { %8693 = vmatprep.mubr.msk.f32.mxu0 %vm336_vm1, %v5457_v15 }
0x2c07   :  { %8694 = vmatmul.mubr.msk.f32.vlgmr.msra.gmra.mrb[44].mxu0 %vm336_vm1, %v8690_v14  ;;  %v6315_v14 = vld [vmem:[#allocation2 + $0x610] sm:$0xff] }
0x2c08   :  { %8697 = vmatpush3.msra.mxu0 %v5030_v7  ;;  %8698 = vmatprep.mubr.msk.f32.mxu0 %vm336_vm1, %v10163_v59  ;;  %v9379_v15 = vpack.c.bf16 %v6315_v14, %v6314_v13 }
0x2c09   :  { %9338 = vmatprep.subr.bf16.mxu0 %v9337_v16 }
0x2c0c   :  { %v8711_v1 = vpop.f32.mrb[64].mxu1 }
0x2c0d   :  { %v5709_v20 = vadd.f32 %v8711_v1, %v5636_v24  ;;  %v5703_v21 = vpop.f32.mrb[65].mxu1  ;;  %v6232_v1 = vld [vmem:[#allocation2 + $0x5f0] sm:$0xff] }
0x2c0e   :  { %v5704_v22 = vadd.f32 %v5703_v21, %v5636_v24  ;;  %v6317_v24 = vld [vmem:[#allocation2 + $0x620] sm:$0xff]  ;;  %v6233_v21 = vld [vmem:[#allocation2 + $0x5f8] sm:$0xff] }
0x2c0f   :  { %8699 = vmatmul.mubr.msk.f32.vlgmr.msra.gmra.mrb[44].mxu0 %vm336_vm1, %v10161_v3  ;;  %v5719_v3 = vrot.slane %v10125_v54, %v9872_v17 }
0x2c10   :  { %9340 = vmatpush3.bf16.msra.mxu0 %v9337_v16  ;;  %8720 = vmatprep.mubr.msk.f32.mxu0 %vm44_vm0, %v10109_v11  ;;  %v6316_v16 = vld [vmem:[#allocation2 + $0x618] sm:$0xff] }
0x2c11   :  { %9342 = vmatprep.subr.bf16.mxu0 %v9341_v25  ;;  %v9383_v18 = vpack.c.bf16 %v6317_v24, %v6316_v16 }
0x2c14   :  { %9344 = vmatpush3.bf16.msra.mxu0 %v9341_v25  ;;  %v8733_v59 = vpop.f32.mrb[66].mxu1  ;;  %v6234_v25 = vld [vmem:[#allocation2 + $0x600] sm:$0xff] }
0x2c15   :  { %v5865_v0 = vpop.f32.mrb[67].mxu1 }
0x2c16   :  { %v9359_v63 = vpack.c.bf16 %v8733_v59, %v5865_v0 }
0x2c17   :  { %8721 = vmatmul.mubr.msk.f32.vlgmr.msra.gmra.mrb[46].mxu0 %vm44_vm0, %v10111_v52 }
0x2c18   :  { %8738 = vmatprep.mubr.msk.f32.mxu0 %vm336_vm1, %v5704_v22  ;;  %9360 = vmatprep.subr.bf16.mxu1 %v9359_v63  ;;  %v9375_v22 = vpack.c.bf16 %v6234_v25, %v6233_v21 }
0x2c19   :  { %9362 = vmatpush3.bf16.msra.mxu1 %v9359_v63  ;;  %v6155_v63 = vrot.slane %v10125_v54, %v9896_v2 }
0x2c1a   :  { %9364 = vmatprep.subr.bf16.mxu1 %v9363_v55 }
0x2cea   :  { %v8722_v23 = vpop.f32.mrb[46].mxu0 }
0x2ceb   :  { %v5792_v26 = vadd.f32 %v8722_v23, %v5719_v3  ;;  %v5786_v27 = vpop.f32.mrb[47].mxu0 }
0x2cec   :  { %v5787_v32 = vadd.f32 %v5786_v27, %v5719_v3 }
0x2cee   :  { %v9353_v28 = vpack.c.bf16 %v5792_v26, %v5787_v32 }
0x2cf0   :  { %9355 = vmatprep.subr.msk.bf16.mxu0 %vm9800_vm2, %v9353_v28 }
0x2cf1   :  { %9358 = vmatpush3.bf16.xpose.msk.msra.mxu0 %vm9800_vm2, %v9353_v28 }
0x2cf2   :  { %8748 = vmatprep.subr.mxu0 %v6064_v56 }
0x2cf8   :  { %8739 = vmatmul.mubr.msk.f32.vlgmr.msra.gmra.mrb[48].mxu0 %vm336_vm1, %v5709_v20  ;;  %v9371_v20 = vpack.c.bf16 %v6232_v1, %v6231_v19 }
0x2cf9   :  { %8749 = vmatpush3.msra.mxu0 %v6064_v56 }
0x2cfa   :  { %9372 = vmatprep.subr.bf16.mxu0 %v9371_v20 }
0x2dcb   :  { %v8740_v31 = vpop.f32.mrb[48].mxu0 }
0x2dcc   :  { %v5958_v51 = vadd.f32 %v8740_v31, %v38_v29  ;;  %v5952_v35 = vpop.f32.mrb[49].mxu0 }
0x2dcd   :  { %v5953_v33 = vadd.f32 %v5952_v35, %v37_v30 }
0x2dce   :  { %v5964_v17 = vsel %vm424_vm3, %v5958_v51, -inf }
0x2dcf   :  { %5965 = vmax.xlane.f32.xlu1 %v5964_v17  ;;  %v5961_v34 = vsel %vm424_vm3, %v5953_v33, -inf }
0x2dd0   :  { %5962 = vmax.xlane.f32.xlu0 %v5961_v34 }
0x2e5c   :  { %v5966_v36 = vpop.xlane.xlu1 %5965 }
0x2e5d   :  { %v5968_v60 = vsub.f32 %v5958_v51, %v5966_v36  ;;  %v5963_v12 = vpop.xlane.xlu0 %5962 }
0x2e5e   :  { %v5967_v41 = vsub.f32 %v5953_v33, %v5963_v12  ;;  %v39_v33 = vld [vmem:[#allocation2 + $0x70] sm:$0xff] }
0x2e5f   :  { %v5971_v42 = vmul.f32 1.442695, %v5968_v60 }
0x2e60   :  { %v5969_v43 = vmul.f32 1.442695, %v5967_v41 }
0x2e61   :  { %9629 = vpow2.f32 %v5971_v42 }
0x2e62   :  { %9631 = vpow2.f32 %v5969_v43 }
0x2e6b   :  { %v9630_v44 = vpop.eup %9629 }
0x2e6c   :  { %v9632_v45 = vpop.eup %9631  ;;  %v5976_v47 = vsel %vm424_vm3, %v9630_v44, 0.0 }
0x2e6d   :  { %5977 = vadd.xlane.f32.xlu1 %v5976_v47  ;;  %v5973_v48 = vsel %vm424_vm3, %v9632_v45, 0.0 }
0x2e6e   :  { %5974 = vadd.xlane.f32.xlu0 %v5973_v48 }
0x2efa   :  { %v5978_v57 = vpop.xlane.xlu1 %5977 }
0x2efb   :  { %9633 = vrcp.f32 %v5978_v57  ;;  %v5975_v49 = vpop.xlane.xlu0 %5974 }
0x2efc   :  { %9635 = vrcp.f32 %v5975_v49 }
0x2f05   :  { %v9634_v62 = vpop.eup %9633 }
0x2f06   :  { %v9636_v10 = vpop.eup %9635  ;;  %v5982_v7 = vmul.f32 %v9634_v62, %v9630_v44 }
0x2f07   :  { %v5980_v6 = vmul.f32 %v9636_v10, %v9632_v45 }
0x2f09   :  { %8745 = vmatprep.mubr.msk.f32.mxu1 %vm424_vm3, %v5980_v6  ;;  %v7689_v6 = vld [vmem:[#allocation2 + $0x638] ss:$0 sm:$0xff] }
0x2f0a   :  { %8746 = vmatmul.mubr.msk.f32.vlgmr.msra.gmra.mrb[68].mxu1 %vm424_vm3, %v5982_v7 }
0x2f0b   :  { %9366 = vmatpush3.bf16.msra.mxu1 %v9363_v55  ;;  %8761 = vmatprep.mubr.msk.f32.mxu1 %vm44_vm0, %v10109_v11 }
0x2f0c   :  { %9368 = vmatprep.subr.bf16.mxu1 %v9367_v9 }
0x2f0f   :  { %9370 = vmatpush3.bf16.msra.mxu1 %v9367_v9 }
0x2f10   :  { %9380 = vmatprep.subr.bf16.mxu1 %v9379_v15 }
0x2f12   :  { %8762 = vmatmul.mubr.msk.f32.vlgmr.msra.gmra.mrb[70].mxu1 %vm44_vm0, %v10111_v52 }
0x2f13   :  { %9382 = vmatpush3.bf16.msra.mxu1 %v9379_v15  ;;  %8783 = vmatprep.mubr.msk.f32.mxu1 %vm44_vm0, %v10109_v11 }
0x2f14   :  { %9384 = vmatprep.subr.bf16.mxu1 %v9383_v18 }
0x2f17   :  { %9386 = vmatpush3.bf16.msra.mxu1 %v9383_v18 }
0x2f1a   :  { %8784 = vmatmul.mubr.msk.f32.vlgmr.msra.gmra.mrb[72].mxu1 %vm44_vm0, %v10111_v52 }
0x2fdd   :  { %v8747_v59 = vpop.f32.mrb[68].mxu1 }
0x2fde   :  { %v6055_v0 = vpop.f32.mrb[69].mxu1 }
0x2fdf   :  { %8750 = vmatprep.mubr.msk.f32.mxu0 %vm336_vm1, %v6055_v0 }
0x2fe0   :  { %8751 = vmatmul.mubr.msk.f32.vlgmr.msra.gmra.mrb[44].mxu0 %vm336_vm1, %v8747_v59 }
0x2fe1   :  { %9374 = vmatpush3.bf16.msra.mxu0 %v9371_v20  ;;  %8772 = vmatprep.mubr.msk.f32.mxu0 %vm44_vm0, %v10109_v11  ;;  %v6238_v11 = vrot.slane %v10125_v54, %v9908_v46 }
0x2fe2   :  { %9376 = vmatprep.subr.bf16.mxu0 %v9375_v22 }
0x2fe5   :  { %v8763_v3 = vpop.f32.mrb[70].mxu1  ;;  %9378 = vmatpush3.bf16.msra.mxu0 %v9375_v22 }
0x2fe6   :  { %v6228_v23 = vadd.f32 %v8763_v3, %v6155_v63  ;;  %v6222_v26 = vpop.f32.mrb[71].mxu1  ;;  %v6716_v3 = vld [vmem:[#allocation2 + $0x650] sm:$0xff] }
0x2fe7   :  { %v6223_v27 = vadd.f32 %v6222_v26, %v6155_v63  ;;  %v6715_v63 = vld [vmem:[#allocation2 + $0x648] sm:$0xff]  ;;  %v6717_v26 = vld [vmem:[#allocation2 + $0x658] sm:$0xff] }
0x2fe8   :  { %8773 = vmatmul.mubr.msk.f32.vlgmr.msra.gmra.mrb[50].mxu0 %vm44_vm0, %v10111_v52  ;;  %v40_v52 = vld [vmem:[#allocation2 + $0x78] sm:$0xff] }
0x2fe9   :  { %8790 = vmatprep.mubr.msk.f32.mxu0 %vm336_vm1, %v6223_v27  ;;  %v6718_v27 = vld [vmem:[#allocation2 + $0x660] sm:$0xff] }
0x2fed   :  { %v8785_v32 = vpop.f32.mrb[72].mxu1 }
0x2fee   :  { %v6384_v28 = vpop.f32.mrb[73].mxu1 }
0x2fef   :  { %v9393_v29 = vpack.c.bf16 %v8785_v32, %v6384_v28  ;;  %v9401_v32 = vpack.c.bf16 %v6718_v27, %v6717_v26 }
0x2ff1   :  { %9394 = vmatprep.subr.bf16.mxu1 %v9393_v29 }
0x2ff2   :  { %9396 = vmatpush3.bf16.msra.mxu1 %v9393_v29 }
0x30bb   :  { %v8774_v30 = vpop.f32.mrb[50].mxu0 }
0x30bc   :  { %v6311_v2 = vadd.f32 %v8774_v30, %v6238_v11  ;;  %v6305_v31 = vpop.f32.mrb[51].mxu0 }
0x30bd   :  { %v6306_v51 = vadd.f32 %v6305_v31, %v6238_v11 }
0x30bf   :  { %v9387_v35 = vpack.c.bf16 %v6311_v2, %v6306_v51  ;;  %v6676_v51 = vld [vmem:[#allocation2 + $0x640] sm:$0x3] }
0x30c1   :  { %9389 = vmatprep.subr.msk.bf16.mxu0 %vm9800_vm2, %v9387_v35 }
0x30c2   :  { %9392 = vmatpush3.bf16.xpose.msk.msra.mxu0 %vm9800_vm2, %v9387_v35  ;;  %v6706_v35 = vrot.slane %v6676_v51, %v9762_v37 }
0x30c3   :  { %8800 = vmatprep.subr.mxu0 %v6583_v53 }
0x30c9   :  { %8791 = vmatmul.mubr.msk.f32.vlgmr.msra.gmra.mrb[52].mxu0 %vm336_vm1, %v6228_v23  ;;  %v9397_v23 = vpack.c.bf16 %v6716_v3, %v6715_v63 }
0x30ca   :  { %8801 = vmatpush3.msra.mxu0 %v6583_v53  ;;  %v6829_v53 = vld [vmem:[#allocation2 + $0x6a0] sm:$0xff] }
0x30cb   :  { %9398 = vmatprep.subr.bf16.mxu1 %v9397_v23 }
0x319c   :  { %v8792_v17 = vpop.f32.mrb[52].mxu0 }
0x319d   :  { %v6477_v34 = vadd.f32 %v8792_v17, %v40_v52  ;;  %v6471_v36 = vpop.f32.mrb[53].mxu0 }
0x319e   :  { %v6472_v60 = vadd.f32 %v6471_v36, %v39_v33  ;;  %v6712_v36 = vrot.slane %v6676_v51, %v9765_v39 }
0x319f   :  { %v6483_v46 = vsel %vm424_vm3, %v6477_v34, -inf }
0x31a0   :  { %6484 = vmax.xlane.f32.xlu1 %v6483_v46  ;;  %v6480_v54 = vsel %vm424_vm3, %v6472_v60, -inf }
0x31a1   :  { %6481 = vmax.xlane.f32.xlu0 %v6480_v54 }
0x322d   :  { %v6485_v12 = vpop.xlane.xlu1 %6484 }
0x322e   :  { %v6487_v41 = vsub.f32 %v6477_v34, %v6485_v12  ;;  %v6482_v42 = vpop.xlane.xlu0 %6481 }
0x322f   :  { %v6486_v43 = vsub.f32 %v6472_v60, %v6482_v42  ;;  %v6824_v42 = vld [vmem:[#allocation2 + $0x678] sm:$0xff] }
0x3230   :  { %v6490_v8 = vmul.f32 1.442695, %v6487_v41  ;;  %v6823_v41 = vld [vmem:[#allocation2 + $0x670] sm:$0xff] }
0x3231   :  { %v6488_v44 = vmul.f32 1.442695, %v6486_v43  ;;  %v9405_v43 = vpack.c.bf16 %v6824_v42, %v6823_v41  ;;  %v6926_v41 = vld [vmem:[#allocation2 + $0x6f0] sm:$0xff] }
0x3232   :  { %9637 = vpow2.f32 %v6490_v8  ;;  %v6825_v8 = vld [vmem:[#allocation2 + $0x680] sm:$0xff] }
0x3233   :  { %9639 = vpow2.f32 %v6488_v44  ;;  %9406 = vmatprep.subr.bf16.mxu0 %v9405_v43  ;;  %v6826_v44 = vld [vmem:[#allocation2 + $0x688] sm:$0xff] }
0x323c   :  { %v9638_v45 = vpop.eup %9637 }
0x323d   :  { %v9640_v47 = vpop.eup %9639  ;;  %v6495_v48 = vsel %vm424_vm3, %v9638_v45, 0.0 }
0x323e   :  { %6496 = vadd.xlane.f32.xlu1 %v6495_v48  ;;  %v6492_v50 = vsel %vm424_vm3, %v9640_v47, 0.0  ;;  %v6828_v48 = vld [vmem:[#allocation2 + $0x698] sm:$0xff] }
0x323f   :  { %6493 = vadd.xlane.f32.xlu0 %v6492_v50 }
0x32cb   :  { %v6497_v55 = vpop.xlane.xlu1 %6496 }
0x32cc   :  { %9641 = vrcp.f32 %v6497_v55  ;;  %v6494_v56 = vpop.xlane.xlu0 %6493  ;;  %v6830_v55 = vld [vmem:[#allocation2 + $0x6a8] sm:$0xff] }
0x32cd   :  { %9643 = vrcp.f32 %v6494_v56  ;;  %v6831_v56 = vld [vmem:[#allocation2 + $0x6b0] sm:$0xff] }
0x32d6   :  { %v9642_v57 = vpop.eup %9641 }
0x32d7   :  { %v9644_v49 = vpop.eup %9643  ;;  %v6501_v4 = vmul.f32 %v9642_v57, %v9638_v45  ;;  %v9409_v45 = vpack.c.bf16 %v6826_v44, %v6825_v8  ;;  %v9417_v57 = vpack.c.bf16 %v6830_v55, %v6829_v53  ;;  %v7125_v44 = vld [vmem:[#allocation2 + $0x730] sm:$0xff]  ;;  %v7127_v53 = vld [vmem:[#allocation2 + $0x740] sm:$0xff] }
0x32d8   :  { %v6499_v62 = vmul.f32 %v9644_v49, %v9640_v47  ;;  %v6827_v47 = vld [vmem:[#allocation2 + $0x690] sm:$0xff]  ;;  %v6832_v49 = vld [vmem:[#allocation2 + $0x6b8] sm:$0xff] }
0x32d9   :  { %v9413_v50 = vpack.c.bf16 %v6828_v48, %v6827_v47  ;;  %v7206_v48 = vld [vmem:[#allocation2 + $0x750] sm:$0xff] }
0x32da   :  { %8797 = vmatprep.mubr.msk.f32.mxu1 %vm424_vm3, %v6499_v62  ;;  %v9421_v62 = vpack.c.bf16 %v6832_v49, %v6831_v56  ;;  %v7207_v56 = vld [vmem:[#allocation2 + $0x758] sm:$0xff] }
0x32db   :  { %8798 = vmatmul.mubr.msk.f32.vlgmr.msra.gmra.mrb[74].mxu1 %vm424_vm3, %v6501_v4  ;;  %v6833_v4 = vld [vmem:[#allocation2 + $0x6c0] sm:$0xff] }
0x32dc   :  { %9400 = vmatpush3.bf16.msra.mxu1 %v9397_v23 }
0x32dd   :  { %9402 = vmatprep.subr.bf16.mxu1 %v9401_v32 }
0x32e0   :  { %9404 = vmatpush3.bf16.msra.mxu1 %v9401_v32 }
0x33ae   :  { %v8799_v5 = vpop.f32.mrb[74].mxu1 }
0x33af   :  { %v6574_v10 = vpop.f32.mrb[75].mxu1 }
0x33b0   :  { %8802 = vmatprep.mubr.msk.f32.mxu0 %vm336_vm1, %v6574_v10 }
0x33b1   :  { %8803 = vmatmul.mubr.msk.f32.vlgmr.msra.gmra.mrb[44].mxu0 %vm336_vm1, %v8799_v5  ;;  %v6834_v5 = vld [vmem:[#allocation2 + $0x6c8] sm:$0xff] }
0x33b2   :  { %9408 = vmatpush3.bf16.msra.mxu0 %v9405_v43  ;;  %v9425_v10 = vpack.c.bf16 %v6834_v5, %v6833_v4 }
0x33b3   :  { %9410 = vmatprep.subr.bf16.mxu0 %v9409_v45 }
0x33b6   :  { %9412 = vmatpush3.bf16.msra.mxu0 %v9409_v45  ;;  %v7205_v45 = vld [vmem:[#allocation2 + $0x748] sm:$0xff] }
0x33b7   :  { %9414 = vmatprep.subr.bf16.mxu0 %v9413_v50  ;;  %v9448_v55 = vpack.c.bf16 %v7206_v48, %v7205_v45 }
0x33ba   :  { %9416 = vmatpush3.bf16.msra.mxu0 %v9413_v50  ;;  %v7126_v50 = vld [vmem:[#allocation2 + $0x738] sm:$0xff] }
0x33bb   :  { %9418 = vmatprep.subr.bf16.mxu0 %v9417_v57  ;;  %v9445_v49 = vpack.c.bf16 %v7127_v53, %v7126_v50 }
0x33be   :  { %9420 = vmatpush3.bf16.msra.mxu0 %v9417_v57  ;;  %v7208_v57 = vld [vmem:[#allocation2 + $0x760] sm:$0xff] }
0x33bf   :  { %9422 = vmatprep.subr.bf16.mxu0 %v9421_v62 }
0x33c2   :  { %9424 = vmatpush3.bf16.msra.mxu0 %v9421_v62 }
0x33c3   :  { %9426 = vmatprep.subr.bf16.mxu0 %v9425_v10 }
0x33c6   :  { %9428 = vmatpush3.bf16.msra.mxu0 %v9425_v10  ;;  %v7698_v10 = vld [vmem:[#allocation2 + $0x718] ss:$0 sm:$0xff] }
0x3484   :  { %v8804_v7 = vpop.f32.mrb[44].mxu0 }
0x3485   :  { %v6673_v9 = vadd.f32 %v8804_v7, %v7689_v6  ;;  %v6656_v13 = vpop.f32.mrb[45].mxu0  ;;  %v6928_v7 = vld [vmem:[#allocation2 + $0x700] sm:$0xff] }
0x3486   :  { %v6672_v14 = vadd.f32 %v7689_v6, %v6656_v13  ;;  %v6927_v6 = vld [vmem:[#allocation2 + $0x6f8] sm:$0xff] }
0x3487   :  { %v10242_v15 = vadd.f32 %v6673_v9, %v10094_v58  ;;  %v9708_v9 = vmov 0.0|0.0   ;;  %v9430_v13 = vpack.c.bf16 %v6928_v7, %v6927_v6 }
0x3488   :  { %v10245_v16 = vadd.f32 %v6672_v14, %v10097_v61  ;;  %9429 = vmatprep.subr.bf16.mxu1 %v9708_v9  ;;  %9447 = vmatprep.subr.bf16.mxu0 %v9708_v9  ;;  %v7690_v14 = vld [vmem:[#allocation2 + $0x668] ss:$0 sm:$0xff] }
0x3489   :  { %v6680_v24 = vsel %vm44_vm0, %v10242_v15, 0.0 }
0x348a   :  { %6681 = vadd.xlane.f32.xlu1 %v6680_v24  ;;  %v6677_v18 = vsel %vm44_vm0, %v10245_v16, 0.0 }
0x348b   :  { %6678 = vadd.xlane.f32.xlu0 %v6677_v18 }
0x3517   :  { %v6682_v19 = vpop.xlane.xlu1 %6681 }
0x3518   :  { %v6684_v1 = vmul.f32 0.03125, %v6682_v19  ;;  %v6679_v20 = vpop.xlane.xlu0 %6678 }
0x3519   :  { %v6683_v21 = vmul.f32 0.03125, %v6679_v20 }
0x351a   :  { %v6686_v25 = vsub.f32 %v10242_v15, %v6684_v1 }
0x351b   :  { %v6685_v58 = vsub.f32 %v10245_v16, %v6683_v21 }
0x351c   :  { %v6688_v59 = vmul.f32 %v6686_v25, %v6686_v25 }
0x351d   :  { %v6687_v0 = vmul.f32 %v6685_v58, %v6685_v58 }
0x351e   :  { %v6692_v61 = vsel %vm44_vm0, %v6688_v59, 0.0 }
0x351f   :  { %6693 = vadd.xlane.f32.xlu1 %v6692_v61  ;;  %v6689_v22 = vsel %vm44_vm0, %v6687_v0, 0.0 }
0x3520   :  { %6690 = vadd.xlane.f32.xlu0 %v6689_v22 }
0x35ac   :  { %v6694_v28 = vpop.xlane.xlu1 %6693 }
0x35ad   :  { %v6696_v29 = vmul.f32 0.03125, %v6694_v28  ;;  %v6691_v11 = vpop.xlane.xlu0 %6690 }
0x35ae   :  { %v6695_v30 = vmul.f32 0.03125, %v6691_v11 }
0x35af   :  { %v6698_v2 = vadd.f32 1e-05, %v6696_v29 }
0x35b0   :  { %v6697_v31 = vadd.f32 1e-05, %v6695_v30 }
0x35b1   :  { %9645 = vrsqrt.f32 %v6698_v2  ;;  %v6929_v2 = vld [vmem:[#allocation2 + $0x708] sm:$0xff] }
0x35b2   :  { %9647 = vrsqrt.f32 %v6697_v31  ;;  %v6930_v31 = vld [vmem:[#allocation2 + $0x710] sm:$0xff] }
0x35b3   :  { %v9433_v51 = vpack.c.bf16 %v6930_v31, %v6929_v2  ;;  %v7321_v2 = vld [vmem:[#allocation2 + $0x800] sm:$0xff]  ;;  %v7322_v31 = vld [vmem:[#allocation2 + $0x808] sm:$0xff] }
0x35bb   :  { %v9646_v52 = vpop.eup %9645 }
0x35bc   :  { %v9648_v33 = vpop.eup %9647  ;;  %v6702_v17 = vmul.f32 %v9646_v52, %v6686_v25  ;;  %v7693_v52 = vld [vmem:[#allocation2 + $0x6d0] ss:$0 sm:$0xff] }
0x35bd   :  { %v6701_v34 = vmul.f32 %v9648_v33, %v6685_v58  ;;  %v6923_v33 = vld [vmem:[#allocation2 + $0x6d8] sm:$0xff] }
0x35be   :  { %v6708_v60 = vmul.f32 %v6706_v35, %v6702_v17  ;;  %v6924_v17 = vld [vmem:[#allocation2 + $0x6e0] sm:$0xff] }
0x35bf   :  { %v6707_v46 = vmul.f32 %v6706_v35, %v6701_v34  ;;  %v9710_v35 = vmov 0.0  }
0x35c0   :  { %v6714_v12 = vadd.f32 %v6712_v36, %v6708_v60  ;;  %7492 = vst [vmem:[%s10332_s2] sm:$0xff] %v9710_v35 }
0x35c1   :  { %v6713_v54 = vadd.f32 %v6712_v36, %v6707_v46  ;;  %v9436_v46 = vpack.c.bf16 %v6924_v17, %v6923_v33  ;;  %v9457_v33 = vpack.c.bf16 %v7322_v31, %v7321_v2 }
0x35c3   :  { %8813 = vmatprep.mubr.msk.f32.mxu1 %vm44_vm0, %v6713_v54 }
0x35c4   :  { %8814 = vmatmul.mubr.msk.f32.vlgmr.msra.gmra.mrb[76].mxu1 %vm44_vm0, %v6714_v12  ;;  %v6925_v12 = vld [vmem:[#allocation2 + $0x6e8] sm:$0xff] }
0x35c5   :  { %9431 = vmatpush3.bf16.msra.mxu1 %v9430_v13  ;;  %8851 = vmatprep.mubr.msk.f32.mxu1 %vm9709_vm5, %v9710_v35  ;;  %v9439_v42 = vpack.c.bf16 %v6926_v41, %v6925_v12  ;;  %v7325_v41 = vld [vmem:[#allocation2 + $0x820] sm:$0xff] }
0x35c6   :  { %9432 = vmatprep.subr.bf16.mxu1 %v9708_v9 }
0x35c9   :  { %9434 = vmatpush3.bf16.msra.mxu1 %v9433_v51 }
0x35ca   :  { %9435 = vmatprep.subr.bf16.mxu1 %v9708_v9 }
0x3697   :  { %v8815_v24 = vpop.f32.mrb[76].mxu1 }
0x3698   :  { %v6802_v18 = vadd.f32 %v8815_v24, %v7690_v14  ;;  %v6796_v19 = vpop.f32.mrb[77].mxu1 }
0x3699   :  { %v6797_v1 = vadd.f32 %v7690_v14, %v6796_v19 }
0x369a   :  { %v6808_v20 = vmul.f32 0.044715, %v6802_v18  ;;  %v6806_v29 = vmul.f32 0.5, %v6802_v18 }
0x369b   :  { %v6807_v21 = vmul.f32 0.044715, %v6797_v1  ;;  %v6805_v32 = vmul.f32 0.5, %v6797_v1 }
0x369c   :  { %v6810_v25 = vmul.f32 %v6808_v20, %v6802_v18 }
0x369d   :  { %v6809_v58 = vmul.f32 %v6807_v21, %v6797_v1 }
0x369e   :  { %v6812_v59 = vmul.f32 %v6810_v25, %v6802_v18 }
0x369f   :  { %v6811_v0 = vmul.f32 %v6809_v58, %v6797_v1 }
0x36a0   :  { %v6814_v61 = vadd.f32 %v6812_v59, %v6802_v18  ;;  %v7123_v59 = vld [vmem:[#allocation2 + $0x768] sm:$0x3] }
0x36a1   :  { %v6813_v22 = vadd.f32 %v6811_v0, %v6797_v1  ;;  %v7131_v0 = vrot.slane %v7123_v59, %v9762_v37 }
0x36a2   :  { %v6816_v63 = vmul.f32 0.7978846, %v6814_v61  ;;  %v7212_v61 = vrot.slane %v7123_v59, %v9765_v39  ;;  %v7315_v59 = vld [vmem:[#allocation2 + $0x7d0] sm:$0xff] }
0x36a3   :  { %v6815_v3 = vmul.f32 0.7978846, %v6813_v22 }
0x36a4   :  { %9649 = vtanh.f32 %v6816_v63 }
0x36a5   :  { %9651 = vtanh.f32 %v6815_v3 }
0x36ae   :  { %v9650_v23 = vpop.eup %9649 }
0x36af   :  { %v9652_v26 = vpop.eup %9651  ;;  %v6820_v27 = vadd.f32 1.0, %v9650_v23 }
0x36b0   :  { %v6819_v28 = vadd.f32 1.0, %v9652_v26 }
0x36b1   :  { %v6822_v30 = vmul.f32 %v6820_v27, %v6806_v29  ;;  %v7303_v29 = vld [vmem:[#allocation2 + $0x770] sm:$0xff] }
0x36b2   :  { %v6821_v11 = vmul.f32 %v6819_v28, %v6805_v32  ;;  %v7319_v32 = vld [vmem:[#allocation2 + $0x7f0] sm:$0xff]  ;;  %v7320_v28 = vld [vmem:[#allocation2 + $0x7f8] sm:$0xff] }
0x36b4   :  { %8840 = vmatprep.mubr.msk.f32.mxu0 %vm2338_vm4, %v6821_v11  ;;  %v9454_v11 = vpack.c.bf16 %v7320_v28, %v7319_v32 }
0x36b5   :  { %8841 = vmatmul.mubr.msk.f32.vlgmr.msra.gmra.mrb[54].mxu0 %vm2338_vm4, %v6822_v30  ;;  %v7304_v30 = vld [vmem:[#allocation2 + $0x778] sm:$0xff] }
0x36b6   :  { %8884 = vmatprep.mubr.msk.f32.mxu0 %vm9709_vm5, %v9710_v35  ;;  %9449 = vmatpush3.bf16.msra.mxu0 %v9448_v55  ;;  %v9478_v51 = vpack.c.bf16 %v7304_v30, %v7303_v29 }
0x36b7   :  { %9450 = vmatprep.subr.bf16.mxu0 %v9708_v9 }
0x3788   :  { %v8842_v34 = vpop.f32.mrb[54].mxu0 }
0x3789   :  { %v6918_v36 = vadd.f32 %v8842_v34, %v7693_v52  ;;  %v6912_v60 = vpop.f32.mrb[55].mxu0  ;;  %v7323_v34 = vld [vmem:[#allocation2 + $0x810] sm:$0xff] }
0x378a   :  { %v6913_v43 = vadd.f32 %v7693_v52, %v6912_v60  ;;  %v7306_v52 = vld [vmem:[#allocation2 + $0x788] sm:$0xff]  ;;  %v7307_v60 = vld [vmem:[#allocation2 + $0x790] sm:$0xff] }
0x378b   :  { %v6922_v54 = vadd.f32 %v6918_v36, %v10242_v15  ;;  %v7124_v15 = vld [vmem:[#allocation2 + $0x728] sm:$0xff]  ;;  %v7324_v36 = vld [vmem:[#allocation2 + $0x818] sm:$0xff] }
0x378c   :  { %v6921_v8 = vadd.f32 %v6913_v43, %v10245_v16  ;;  %v9442_v47 = vpack.c.bf16 %v7125_v44, %v7124_v15  ;;  %v9451_v16 = vpack.c.bf16 %v7208_v57, %v7207_v56  ;;  %v7309_v43 = vld [vmem:[#allocation2 + $0x7a0] sm:$0xff] }
0x378d   :  { %8852 = vmatmul.mubr.msk.f32.vlgmr.msra.gmra.mrb[78].mxu1 %vm44_vm0, %v6922_v54  ;;  %v9460_v54 = vpack.c.bf16 %v7324_v36, %v7323_v34  ;;  %v7092_v57 = vld [vmem:[#allocation2 + $0x720] sm:$0x3] }
0x378e   :  { %9437 = vmatpush3.bf16.msra.mxu1 %v9436_v46  ;;  %8862 = vmatprep.mubr.msk.f32.mxu1 %vm9709_vm5, %v9710_v35  ;;  %v7308_v46 = vld [vmem:[#allocation2 + $0x798] sm:$0xff] }
0x378f   :  { %9438 = vmatprep.subr.bf16.mxu1 %v9708_v9  ;;  %9452 = vmatpush3.bf16.msra.mxu0 %v9451_v16  ;;  %v9484_v12 = vpack.c.bf16 %v7308_v46, %v7307_v60 }
0x3790   :  { %9453 = vmatprep.subr.bf16.mxu0 %v9708_v9 }
0x3792   :  { %9440 = vmatpush3.bf16.msra.mxu1 %v9439_v42  ;;  %v7326_v42 = vld [vmem:[#allocation2 + $0x828] sm:$0xff] }
0x3793   :  { %9441 = vmatprep.subr.bf16.mxu1 %v9708_v9  ;;  %v9463_v15 = vpack.c.bf16 %v7326_v42, %v7325_v41 }
0x3795   :  { %8863 = vmatmul.mubr.msk.f32.vlgmr.msra.gmra.mrb[80].mxu1 %vm44_vm0, %v6921_v8  ;;  %v7310_v8 = vld [vmem:[#allocation2 + $0x7a8] sm:$0xff] }
0x3796   :  { %8873 = vmatprep.mubr.msk.f32.mxu1 %vm9709_vm5, %v9710_v35  ;;  %9443 = vmatpush3.bf16.msra.mxu1 %v9442_v47  ;;  %v9487_v44 = vpack.c.bf16 %v7310_v8, %v7309_v43 }
0x3797   :  { %9444 = vmatprep.subr.bf16.mxu1 %v9708_v9 }
0x379a   :  { %9446 = vmatpush3.bf16.msra.mxu1 %v9445_v49  ;;  %v7096_v49 = vrot.slane %v7092_v57, %v9762_v37 }
0x379b   :  { %9477 = vmatprep.subr.bf16.mxu1 %v9708_v9 }
0x3860   :  { %v7000_v62 = vpop.f32.mrb[78].mxu1 }
0x3861   :  { %v8853_v4 = vpop.f32.mrb[79].mxu1 }
0x3868   :  { %v7073_v5 = vpop.f32.mrb[80].mxu1 }
0x3869   :  { %v7074_v6 = vadd.f32 %v7073_v5, %v7000_v62  ;;  %v8864_v7 = vpop.f32.mrb[81].mxu1  ;;  %v7097_v62 = vmul.f32 %v7096_v49, %v9949_v40  ;;  %v7098_v5 = vmul.f32 %v7096_v49, %v9946_v38  ;;  %v7329_v40 = vld [vmem:[#allocation2 + $0x840] sm:$0xff] }
0x386a   :  { %v7327_v7 = vld [vmem:[#allocation2 + $0x830] sm:$0xff]  ;;  %v7313_v38 = vld [vmem:[#allocation2 + $0x7c0] sm:$0xff] }
0x386b   :  { %v7082_v13 = vadd.f32 %v7698_v10, %v7074_v6  ;;  %v7099_v10 = vsel %vm44_vm0, %v7097_v62, 0.0  ;;  %v7102_v6 = vsel %vm44_vm0, %v7098_v5, 0.0 }
0x386d   :  { %v7084_v14 = vmul.f32 0.044715, %v7082_v13  ;;  %v7083_v21 = vmul.f32 0.5, %v7082_v13 }
0x386f   :  { %v7085_v24 = vmul.f32 %v7084_v14, %v7082_v13  ;;  %v7311_v14 = vld [vmem:[#allocation2 + $0x7b0] sm:$0xff] }
0x3871   :  { %v7086_v18 = vmul.f32 %v7085_v24, %v7082_v13 }
0x3873   :  { %v7087_v19 = vadd.f32 %v7086_v18, %v7082_v13  ;;  %v7328_v13 = vld [vmem:[#allocation2 + $0x838] sm:$0xff] }
0x3874   :  { %v9466_v24 = vpack.c.bf16 %v7328_v13, %v7327_v7  ;;  %v7312_v18 = vld [vmem:[#allocation2 + $0x7b8] sm:$0xff] }
0x3875   :  { %v7088_v1 = vmul.f32 0.7978846, %v7087_v19  ;;  %v9490_v37 = vpack.c.bf16 %v7312_v18, %v7311_v14  ;;  %v7330_v19 = vld [vmem:[#allocation2 + $0x848] sm:$0xff] }
0x3877   :  { %9653 = vtanh.f32 %v7088_v1  ;;  %v9469_v1 = vpack.c.bf16 %v7330_v19, %v7329_v40 }
0x3881   :  { %v9654_v20 = vpop.eup %9653 }
0x3882   :  { %v7090_v25 = vadd.f32 1.0, %v9654_v20  ;;  %v7314_v20 = vld [vmem:[#allocation2 + $0x7c8] sm:$0xff] }
0x3884   :  { %v7091_v58 = vmul.f32 %v7090_v25, %v7083_v21  ;;  %v9493_v21 = vpack.c.bf16 %v7314_v20, %v7313_v38  ;;  %v7331_v25 = vld [vmem:[#allocation2 + $0x850] sm:$0xff] }
0x3886   :  { %8874 = vmatmul.mubr.msk.f32.vlgmr.msra.gmra.mrb[82].mxu1 %vm44_vm0, %v7091_v58  ;;  %8885 = vmatmul.mubr.msk.f32.vlgmr.msra.gmra.mrb[56].mxu0 %vm44_vm0, %v7091_v58  ;;  %v7332_v58 = vld [vmem:[#allocation2 + $0x858] sm:$0xff] }
0x3887   :  { %8919 = vmatprep.mubr.msk.f32.mxu0 %vm9709_vm5, %v9710_v35  ;;  %8954 = vmatprep.mubr.msk.f32.mxu1 %vm9709_vm5, %v9710_v35  ;;  %v7305_v35 = vld [vmem:[#allocation2 + $0x780] sm:$0xff] }
0x3888   :  { %9455 = vmatpush3.bf16.msra.mxu0 %v9454_v11  ;;  %9479 = vmatpush3.bf16.msra.mxu1 %v9478_v51  ;;  %v9481_v17 = vpack.c.bf16 %v7306_v52, %v7305_v35  ;;  %v7108_v51 = vrot.slane %v7092_v57, %v9765_v39 }
0x3889   :  { %9456 = vmatprep.subr.bf16.mxu0 %v9708_v9  ;;  %9480 = vmatprep.subr.bf16.mxu1 %v9708_v9 }
0x388c   :  { %9458 = vmatpush3.bf16.msra.mxu0 %v9457_v33  ;;  %9482 = vmatpush3.bf16.msra.mxu1 %v9481_v17 }
0x388d   :  { %9459 = vmatprep.subr.bf16.mxu0 %v9708_v9  ;;  %9483 = vmatprep.subr.bf16.mxu1 %v9708_v9 }
0x3890   :  { %9461 = vmatpush3.bf16.msra.mxu0 %v9460_v54  ;;  %9485 = vmatpush3.bf16.msra.mxu1 %v9484_v12 }
0x3891   :  { %9462 = vmatprep.subr.bf16.mxu0 %v9708_v9  ;;  %9486 = vmatprep.subr.bf16.mxu1 %v9708_v9 }
0x3894   :  { %9464 = vmatpush3.bf16.msra.mxu0 %v9463_v15  ;;  %9488 = vmatpush3.bf16.msra.mxu1 %v9487_v44 }
0x3895   :  { %9465 = vmatprep.subr.bf16.mxu0 %v9708_v9  ;;  %9489 = vmatprep.subr.bf16.mxu1 %v9708_v9 }
0x3898   :  { %9467 = vmatpush3.bf16.msra.mxu0 %v9466_v24  ;;  %9491 = vmatpush3.bf16.msra.mxu1 %v9490_v37 }
0x3899   :  { %9468 = vmatprep.subr.bf16.mxu0 %v9708_v9  ;;  %9492 = vmatprep.subr.bf16.mxu1 %v9708_v9 }
0x389c   :  { %9470 = vmatpush3.bf16.msra.mxu0 %v9469_v1  ;;  %9494 = vmatpush3.bf16.msra.mxu1 %v9493_v21 }
0x389d   :  { %9471 = vmatprep.subr.bf16.mxu0 %v9708_v9  ;;  %9495 = vmatprep.subr.bf16.mxu1 %v9708_v9 }
0x3959   :  { %v7201_v22 = vpop.f32.mrb[82].mxu1  ;;  %v7279_v63 = vpop.f32.mrb[56].mxu0 }
0x395a   :  { %v7202_v3 = vadd.f32 %v7201_v22, %v7131_v0  ;;  %v7280_v23 = vadd.f32 %v7279_v63, %v7212_v61  ;;  %v8875_v26 = vpop.f32.mrb[83].mxu1  ;;  %v8886_v27 = vpop.f32.mrb[57].mxu0  ;;  %v9472_v0 = vpack.c.bf16 %v7332_v58, %v7331_v25  ;;  %v7316_v61 = vld [vmem:[#allocation2 + $0x7d8] sm:$0xff]  ;;  %v7333_v63 = vld [vmem:[#allocation2 + $0x860] sm:$0xff] }
0x395b   :  { %v9496_v22 = vpack.c.bf16 %v7316_v61, %v7315_v59  ;;  %v7318_v27 = vld [vmem:[#allocation2 + $0x7e8] sm:$0xff] }
0x395c   :  { %7285 = vmax.xlane.f32.xlu1 %v7280_v23  ;;  %7283 = vmax.xlane.f32.xlu0 %v7202_v3 }
0x395d   :  { %9473 = vmatpush3.bf16.msra.mxu0 %v9472_v0  ;;  %9497 = vmatpush3.bf16.msra.mxu1 %v9496_v22 }
0x395e   :  { %9474 = vmatprep.subr.bf16.mxu0 %v9708_v9  ;;  %9498 = vmatprep.subr.bf16.mxu1 %v9708_v9 }
0x39e9   :  { %v7286_v45 = vpop.xlane.xlu1 %7285  ;;  %v7284_v47 = vpop.xlane.xlu0 %7283 }
0x39ea   :  { %v7287_v48 = vmax.f32 %v7284_v47, %v7286_v45 }
0x39ec   :  { %v7288_v50 = vsub.f32 %v7202_v3, %v7287_v48  ;;  %v7291_v53 = vsub.f32 %v7280_v23, %v7287_v48  ;;  %v7334_v3 = vld [vmem:[#allocation2 + $0x868] sm:$0xff]  ;;  %v7317_v23 = vld [vmem:[#allocation2 + $0x7e0] sm:$0xff] }
0x39ed   :  { %v9475_v26 = vpack.c.bf16 %v7334_v3, %v7333_v63  ;;  %v9499_v32 = vpack.c.bf16 %v7318_v27, %v7317_v23 }
0x39ee   :  { %v7289_v55 = vmul.f32 1.442695, %v7288_v50  ;;  %v7292_v56 = vmul.f32 1.442695, %v7291_v53 }
0x39ef   :  { %9476 = vmatpush3.bf16.msra.mxu0 %v9475_v26  ;;  %9500 = vmatpush3.bf16.msra.mxu1 %v9499_v32 }
0x39f0   :  { %9655 = vpow2.f32 %v7289_v55 }
0x39f1   :  { %9657 = vpow2.f32 %v7292_v56 }
0x39fa   :  { %v9656_v16 = vpop.eup %9655 }
0x39fb   :  { %v9658_v4 = vpop.eup %9657  ;;  %7294 = vadd.xlane.f32.xlu0 %v9656_v16 }
0x39fc   :  { %7296 = vadd.xlane.f32.xlu1 %v9658_v4 }
0x39ff   :  { %7100 = vadd.xlane.f32.xlu0 %v7099_v10 }
0x3a00   :  { %7103 = vadd.xlane.f32.xlu1 %v7102_v6 }
0x3a88   :  { %v7295_v28 = vpop.xlane.xlu0 %7294 }
0x3a89   :  { %v7297_v29 = vpop.xlane.xlu1 %7296 }
0x3a8a   :  { %v7298_v11 = vadd.f32 %v7297_v29, %v7295_v28 }
0x3a8c   :  { %9659 = vrcp.f32 %v7298_v11  ;;  %v7101_v42 = vpop.xlane.xlu0 %7100 }
0x3a8d   :  { %v7104_v35 = vpop.xlane.xlu1 %7103  ;;  %v7109_v43 = vadd.f32 %v7108_v51, %v7101_v42 }
0x3a8e   :  { %v7110_v52 = vadd.f32 %v7108_v51, %v7104_v35 }
0x3a8f   :  { %v7111_v8 = vsub.f32 0.0, %v7109_v43 }
0x3a90   :  { %v7112_v33 = vsub.f32 0.0, %v7110_v52 }
0x3a91   :  { %v7113_v15 = vmul.f32 1.442695, %v7111_v8 }
0x3a92   :  { %v7115_v9 = vmul.f32 1.442695, %v7112_v33 }
0x3a94   :  { %9661 = vpow2.f32 %v7115_v9 }
0x3a96   :  { %v9660_v30 = vpop.eup %9659 }
0x3a97   :  { %v7302_v2 = vmul.f32 %v9660_v30, %v9658_v4  ;;  %v7301_v31 = vmul.f32 %v9660_v30, %v9656_v16 }
0x3a99   :  { %8920 = vmatmul.mubr.f32.vlgmr.msra.gmra.mrb[58].mxu0 %v7302_v2  ;;  %8955 = vmatmul.mubr.f32.vlgmr.msra.gmra.mrb[84].mxu1 %v7301_v31 }
0x3a9e   :  { %v9662_v17 = vpop.eup %9661 }
0x3a9f   :  { %v7118_v34 = vadd.f32 1.0, %v9662_v17 }
0x3aa1   :  { %9663 = vrcp.f32 %v7118_v34 }
0x3aa2   :  { %9665 = vpow2.f32 %v7113_v15 }
0x3aab   :  { %v9664_v39 = vpop.eup %9663 }
0x3aac   :  { %v9666_v45 = vpop.eup %9665 }
0x3aad   :  { %v7117_v48 = vadd.f32 1.0, %v9666_v45 }
0x3aaf   :  { %9667 = vrcp.f32 %v7117_v48 }
0x3ab9   :  { %v9668_v50 = vpop.eup %9667 }
0x3b6c   :  { %v7401_v36 = vpop.f32.mrb[58].mxu0  ;;  %v7471_v60 = vpop.f32.mrb[84].mxu1 }
0x3b6d   :  { %v7472_v46 = vadd.f32 %v7471_v60, %v7401_v36  ;;  %v8921_v54 = vpop.f32.mrb[59].mxu0  ;;  %v8956_v12 = vpop.f32.mrb[85].mxu1 }
0x3b6f   :  { %7483 = vrot.lane.b32.xlu0 %v7472_v46, %s9711_s27  ;;  %v7476_v41 = vsel %vm7475_vm6, %v7472_v46, 0.0 }
0x3b70   :  { %7477 = vadd.xlane.f32.xlu1 %v7476_v41 }
0x3b73   :  { %7503 = vrot.lane.b32.xlu0 %v9664_v39, %s9712_s28 }
0x3be1   :  { %v7484_v44 = vpop.permute.xlu0 %7483 }
0x3be2   :  { %v7486_v47 = vsel %vm7475_vm6, %v7484_v44, 0.0 }
0x3be3   :  { %7487 = vadd.xlane.f32.xlu1 %v7486_v47 }
0x3be5   :  { %v7504_v10 = vpop.permute.xlu0 %7503 }
0x3bf4   :  { %7497 = vrot.lane.b32.xlu1 %v9668_v50, %s9713_s29 }
0x3bfd   :  { %v7478_v53 = vpop.xlane.xlu1 %7477 }
0x3bfe   :  { %v7479_v55 = vadd.f32 1e-05, %v7478_v53 }
0x3c00   :  { %9669 = vrcp.f32 %v7479_v55 }
0x3c0a   :  { %v9670_v56 = vpop.eup %9669 }
0x3c0b   :  { %v7481_v57 = vmul.f32 %v9670_v56, %v7472_v46 }
0x3c0d   :  { %7493 = vst.msk [vmem:[%s10332_s2] sm:$0xff] %vm7475_vm6, %v7481_v57 }
0x3c70   :  { %v7488_v49 = vpop.xlane.xlu1 %7487 }
0x3c71   :  { %v7489_v16 = vadd.f32 1e-05, %v7488_v49 }
0x3c73   :  { %9671 = vrcp.f32 %v7489_v16 }
0x3c74   :  { %v7498_v5 = vpop.permute.xlu1 %7497 }
0x3c7d   :  { %v9672_v62 = vpop.eup %9671 }
0x3c7e   :  { %v7491_v4 = vmul.f32 %v9672_v62, %v7472_v46 }
0x3c80   :  { %7495 = vst.msk [vmem:[%s10332_s2] sm:$0xff] %vm7494_vm7, %v7491_v4 }
0x3c81   :  { %7501 = vst.msk [vmem:[%s10332_s2] sm:$0xff] %vm7500_vm8, %v7498_v5 }
0x3c82   :  { %7507 = vst.msk [vmem:[%s10332_s2] sm:$0xff] %vm7506_vm9, %v7504_v10 }
0x3c83   :  { %7512 = vsyncpa [#allocation3], 1 }

</bundles_post_ra>
